<compile_context>
chip_gen: v6e
topology: v6e:2x2x1
jax: 0.10.0
libtpu: 0.0.40
codegen_flags: <defaults>
</compile_context>

<pallas_src>
import jax
import jax.numpy as jnp
from jax.experimental import pallas as pl
from jax.experimental.pallas import tpu as pltpu

# --------------------- scaled-down wav2vec2-base config ----------------------
B = 2
T_RAW = 340
CONV_KERNELS = (10, 3, 2)        # wav2vec2-base: (10,3,3,3,3,2,2)
CONV_STRIDES = (5, 2, 2)         # wav2vec2-base: (5,2,2,2,2,2,2)
CONV_DIM = 32                    # wav2vec2-base: 512
HIDDEN = 32                      # wav2vec2-base: 768
NUM_LAYERS = 2                   # wav2vec2-base: 12
NUM_HEADS = 4                    # wav2vec2-base: 12
HEAD_DIM = HIDDEN // NUM_HEADS
INTERMEDIATE = 64                # wav2vec2-base: 3072
POS_CONV_KERNEL = 8              # wav2vec2-base: 128
POS_CONV_GROUPS = 4              # wav2vec2-base: 16
POS_PAD = POS_CONV_KERNEL // 2
MASK_TIME_LENGTH = 3             # module uses 15; scaled to the small seq len (16)
MASK_TIME_PROB = 0.06
OBSERVE_TIME_PROB = 0.0
LN_EPS = 1e-5

MXU_DTYPE = jnp.bfloat16         # MXU operands bf16, accumulation/elementwise f32


def _conv_out_len(n, k, s):
    return (n - k) // s + 1


_t = T_RAW
_T_CONV = []
for _k, _s in zip(CONV_KERNELS, CONV_STRIDES):
    _t = _conv_out_len(_t, _k, _s)
    _T_CONV.append(_t)
T0, T1, T_FEAT = _T_CONV         # 67, 33, 16
T0_PAD = ((T0 + 7) // 8) * 8     # 72: sublane-aligned per-batch conv0 row count
K0_PAD = 16                      # conv0 contraction dim padded 10 -> 16
N_TOK = B * T_FEAT               # 32

_VMEM = pl.BlockSpec(memory_space=pltpu.MemorySpace.VMEM)


# ------------------------------ in-kernel helpers -----------------------------
def _ln(x, g, b):
    # One-pass stats (shorter critical path than mean -> center -> square -> mean).
    mu = jnp.mean(x, axis=-1, keepdims=True)
    ex2 = jnp.mean(x * x, axis=-1, keepdims=True)
    var = ex2 - mu * mu
    return (x - mu) * jax.lax.rsqrt(var + LN_EPS) * g + b


def _mm(a, w):
    return jnp.dot(a.astype(MXU_DTYPE), w.astype(MXU_DTYPE),
                   preferred_element_type=jnp.float32)


def _bmm(a, b, ca, cb):
    # Batched matmul, batch dim 0 on both operands, contracting dims (ca, cb).
    return jax.lax.dot_general(
        a.astype(MXU_DTYPE), b.astype(MXU_DTYPE),
        (((ca,), (cb,)), ((0,), (0,))),
        preferred_element_type=jnp.float32)


def _gelu(x):
    # TODO(synk): HF wav2vec2 uses exact (erf) GELU; tanh approximation used here.
    return jax.nn.gelu(x, approximate=True)


# ------------------------------ Pallas kernels --------------------------------
def _feature_projection_kernel(p0_ref, w0_ref, gng_ref, gnb_ref,
                               sel1_ref, w1c_ref, sel2_ref, w2c_ref,
                               fplng_ref, fplnb_ref, fpw_ref, fpb_ref,
                               emb_ref, rep_ref, keep_ref, o_ref):
    # conv0: ONE batched im2col matmul over B*T0_PAD rows (conv_bias=False, so the
    # zero pad rows stay exactly zero and drop out of the GroupNorm sums).
    y0 = _mm(p0_ref[...], w0_ref[...])                    # (B*T0_PAD, C)
    feats = []
    for bi in range(B):                                   # static unrolled batch loop
        yb = y0[bi * T0_PAD:(bi + 1) * T0_PAD, :]         # tile-aligned row slice
        # GroupNorm(groups == channels): per-(batch, channel) stats over time.
        mu = jnp.sum(yb, axis=0, keepdims=True) / T0
        ex2 = jnp.sum(yb * yb, axis=0, keepdims=True) / T0
        var = ex2 - mu * mu
        a = _gelu((yb - mu) * jax.lax.rsqrt(var + LN_EPS)
                  * gng_ref[...] + gnb_ref[...])          # (T0_PAD, C)
        # conv1/conv2 (stride 2, no bias) fully in VMEM: y = sum_k S_k @ (a @ W_k)
        # where S_k is a precomputed 0/1 row-selection matrix (strided im2col as a
        # matmul, so no XLA gathers / HBM round trips between conv layers).
        y1 = _mm(sel1_ref[0], _mm(a, w1c_ref[0]))
        for k in range(1, CONV_KERNELS[1]):
            y1 = y1 + _mm(sel1_ref[k], _mm(a, w1c_ref[k]))
        a1 = _gelu(y1)                                    # (T1, C)
        y2 = _mm(sel2_ref[0], _mm(a1, w2c_ref[0]))
        for k in range(1, CONV_KERNELS[2]):
            y2 = y2 + _mm(sel2_ref[k], _mm(a1, w2c_ref[k]))
        feats.append(_gelu(y2))                           # (T_FEAT, C)
    x2d = jnp.concatenate(feats, axis=0)                  # (B*T_FEAT, C)

    # feature projection: LN -> Linear -> SpecAugment masked_spec_embed -> zero pads
    xn = _ln(x2d, fplng_ref[...], fplnb_ref[...])
    y = _mm(xn, fpw_ref[...]) + fpb_ref[...]
    y = jnp.where(rep_ref[...] > 0.5, emb_ref[...], y)
    y = y * keep_ref[...]

    # Emit a time-zero-padded slab so the encoder's pos-conv needs no wrapper pad.
    zpad = jnp.zeros((POS_PAD, HIDDEN), jnp.float32)
    for bi in range(B):
        o_ref[bi, :POS_PAD, :] = zpad
        o_ref[bi, POS_PAD:POS_PAD + T_FEAT, :] = y[bi * T_FEAT:(bi + 1) * T_FEAT, :]
        o_ref[bi, POS_PAD + T_FEAT:, :] = zpad


def _encoder_kernel(xp_ref, m_ref, posw_ref, posb_ref, encg_ref, encb_ref,
                    wq_ref, wk_ref, wv_ref, bq_ref, bk_ref, bv_ref,
                    wo_ref, bo_ref, ln1g_ref, ln1b_ref,
                    w1_ref, b1_ref, w2_ref, b2_ref, ln2g_ref, ln2b_ref, o_ref):
    T = T_FEAT
    # Positional grouped conv (SamePad drops the last tap position) as 8 shifted
    # dense matmuls with block-diagonal per-tap weights, then GELU + residual + LN.
    x_rows, pos_rows = [], []
    for bi in range(B):
        xb = xp_ref[bi]                                   # (T + 2*PAD, H)
        pos = _mm(xb[0:T, :], posw_ref[0])
        for k in range(1, POS_CONV_KERNEL):
            pos = pos + _mm(xb[k:k + T, :], posw_ref[k])
        pos_rows.append(pos)
        x_rows.append(xb[POS_PAD:POS_PAD + T, :])
    x2d = jnp.concatenate(x_rows, axis=0)                 # (B*T, H)
    pos = _gelu(jnp.concatenate(pos_rows, axis=0) + posb_ref[...])
    h = _ln(x2d + pos, encg_ref[...], encb_ref[...])

    scale = HEAD_DIM ** -0.5
    for l in range(NUM_LAYERS):                           # static loop over layers
        # ---- self-attention: heads as a dot_general batch dim (no lane slices) ----
        attn_rows = []
        for bi in range(B):                               # static loop over batch
            hb = h[bi * T:(bi + 1) * T, :]                # (T, H) row slice
            xb = jnp.broadcast_to(hb.astype(MXU_DTYPE)[None],
                                  (NUM_HEADS, T, HIDDEN))
            q = _bmm(xb, wq_ref[l], 2, 1) + bq_ref[l]     # (NH, T, d)
            k_ = _bmm(xb, wk_ref[l], 2, 1) + bk_ref[l]
            v = _bmm(xb, wv_ref[l], 2, 1) + bv_ref[l]
            s = _bmm(q, k_, 2, 2) * scale + m_ref[bi]     # (NH, T, T) + (1, T) key mask
            s = s - jnp.max(s, axis=-1, keepdims=True)
            p = jnp.exp(s)
            p = p * pl.reciprocal(jnp.sum(p, axis=-1, keepdims=True), approx=True)
            ctx = _bmm(p, v, 2, 1)                        # (NH, T, d)
            ob = _bmm(ctx, wo_ref[l], 2, 1)               # (NH, T, H)
            attn_rows.append(jnp.sum(ob, axis=0))         # == concat-heads @ Wo
        attn = jnp.concatenate(attn_rows, axis=0) + bo_ref[l]   # (B*T, H)
        h = _ln(h + attn, ln1g_ref[l], ln1b_ref[l])

        # ---- feed-forward (batch folded into matmul rows) ----
        ff = _gelu(_mm(h, w1_ref[l]) + b1_ref[l])
        ff = _mm(ff, w2_ref[l]) + b2_ref[l]
        h = _ln(h + ff, ln2g_ref[l], ln2b_ref[l])

    o_ref[...] = jnp.maximum(h, 0.0)                      # final ReLU fused in-kernel


# ------------------------------ kernel wrappers --------------------------------
def _sel_matrices(t_out, t_in, kernel, stride):
    # 0/1 selection matrices: sel[k][t, stride*t + k] = 1 (strided conv as matmul).
    t = jnp.arange(t_out)[:, None]
    j = jnp.arange(t_in)[None, :]
    return jnp.stack([(j == stride * t + k) for k in range(kernel)]).astype(MXU_DTYPE)


def feature_extractor_projection(params, x_raw, replace, valid):
    # conv0 im2col on the raw waveform only; everything downstream stays in VMEM.
    k0, s0 = CONV_KERNELS[0], CONV_STRIDES[0]
    idx = jnp.arange(T0)[:, None] * s0 + jnp.arange(k0)[None, :]
    patches = x_raw[:, idx]                                         # (B, T0, 10)
    patches = jnp.pad(patches, ((0, 0), (0, T0_PAD - T0), (0, K0_PAD - k0)))
    patches = patches.reshape(B * T0_PAD, K0_PAD).astype(MXU_DTYPE)

    w0 = jnp.pad(params["conv0_w"], ((0, K0_PAD - k0), (0, 0))).astype(MXU_DTYPE)
    sel1 = _sel_matrices(T1, T0_PAD, CONV_KERNELS[1], CONV_STRIDES[1])
    sel2 = _sel_matrices(T_FEAT, T1, CONV_KERNELS[2], CONV_STRIDES[2])

    out_t = T_FEAT + 2 * POS_PAD
    return pl.pallas_call(
        _feature_projection_kernel,
        out_shape=jax.ShapeDtypeStruct((B, out_t, HIDDEN), jnp.float32),
        in_specs=[_VMEM] * 15,
        out_specs=_VMEM,
    )(patches, w0,
      params["gn_g"].reshape(1, -1), params["gn_b"].reshape(1, -1),
      sel1, params["conv1_w"].astype(MXU_DTYPE),
      sel2, params["conv2_w"].astype(MXU_DTYPE),
      params["fp_ln_g"].reshape(1, -1), params["fp_ln_b"].reshape(1, -1),
      params["fp_w"].astype(MXU_DTYPE), params["fp_b"].reshape(1, -1),
      params["masked_spec_embed"].reshape(1, -1),
      replace.reshape(N_TOK, 1).astype(jnp.float32),
      valid.reshape(N_TOK, 1).astype(jnp.float32))


def _stack_layer(params, name):
    return jnp.stack([lyr[name] for lyr in params["layers"]])


def encoder_forward(params, xp, add_mask):
    L, H, NH, d, I = NUM_LAYERS, HIDDEN, NUM_HEADS, HEAD_DIM, INTERMEDIATE

    def heads_in(w):       # (L, H_in, H_out) -> (L, NH, H_in, d) per-head weights
        return w.reshape(L, H, NH, d).transpose(0, 2, 1, 3)

    wq = heads_in(_stack_layer(params, "wq")).astype(MXU_DTYPE)
    wk = heads_in(_stack_layer(params, "wk")).astype(MXU_DTYPE)
    wv = heads_in(_stack_layer(params, "wv")).astype(MXU_DTYPE)
    bq = _stack_layer(params, "bq").reshape(L, NH, 1, d)
    bk = _stack_layer(params, "bk").reshape(L, NH, 1, d)
    bv = _stack_layer(params, "bv").reshape(L, NH, 1, d)
    wo = _stack_layer(params, "wo").reshape(L, NH, d, H).astype(MXU_DTYPE)
    bo = _stack_layer(params, "bo").reshape(L, 1, H)
    ln1g = _stack_layer(params, "ln1_g").reshape(L, 1, H)
    ln1b = _stack_layer(params, "ln1_b").reshape(L, 1, H)
    w1 = _stack_layer(params, "w1").astype(MXU_DTYPE)
    b1 = _stack_layer(params, "b1").reshape(L, 1, I)
    w2 = _stack_layer(params, "w2").astype(MXU_DTYPE)
    b2 = _stack_layer(params, "b2").reshape(L, 1, H)
    ln2g = _stack_layer(params, "ln2_g").reshape(L, 1, H)
    ln2b = _stack_layer(params, "ln2_b").reshape(L, 1, H)

    # TODO(synk): at full wav2vec2 dims this fused kernel must be tiled (rows / K
    # grid, pl.Buffered(1) on grid-invariant weight specs, explicit
    # vmem_limit_bytes) to fit v7x's 64 MiB VMEM; on v7x batch could also become a
    # leading "parallel" grid axis so each TensorCore takes one batch element.
    out = pl.pallas_call(
        _encoder_kernel,
        out_shape=jax.ShapeDtypeStruct((N_TOK, HIDDEN), jnp.float32),
        in_specs=[_VMEM] * 22,
        out_specs=_VMEM,
    )(xp, add_mask,
      params["pos_w"].astype(MXU_DTYPE), params["pos_b"].reshape(1, H),
      params["enc_ln_g"].reshape(1, H), params["enc_ln_b"].reshape(1, H),
      wq, wk, wv, bq, bk, bv, wo, bo, ln1g, ln1b, w1, b1, w2, b2, ln2g, ln2b)
    return out.reshape(B, T_FEAT, HIDDEN)


# --------------------------------- glue ----------------------------------------
def get_feat_extract_output_lengths(lengths):
    for k, s in zip(CONV_KERNELS, CONV_STRIDES):
        lengths = (lengths - k) // s + 1
    return lengths


def prepare_mask(length, shape):
    mask = jnp.zeros(shape, jnp.float32)
    mask = mask.at[jnp.arange(shape[0]), length - 1].set(1.0)
    mask = jnp.flip(jnp.cumsum(jnp.flip(mask, -1), -1), -1)
    return mask.astype(bool)


def compute_mask_indices(key, shape, mask_prob, mask_length, min_masks):
    # TODO(synk): simplified SpecAugment sampler; HF _compute_mask_indices samples
    # span counts with random epsilon and starts without replacement.
    bsz, seq = shape
    num_spans = max(min_masks, int(mask_prob * seq / mask_length + 0.5))
    starts = jax.random.randint(key, (bsz, num_spans), 0, seq - mask_length + 1)
    idx = starts[:, :, None] + jnp.arange(mask_length)[None, None, :]
    mask = jnp.zeros((bsz, seq), bool)
    mask = mask.at[jnp.arange(bsz)[:, None, None], idx].set(True)
    return mask


# ------------------------------- forward ----------------------------------------
def wav2vec2_wrapper_forward(params, x_raw, length, rng, pretrain=True):
    out_len = get_feat_extract_output_lengths(length)
    valid = prepare_mask(out_len, (B, T_FEAT))            # (B, T) bool, True = valid

    k1, k2 = jax.random.split(rng)
    mask_time_indices = compute_mask_indices(
        k1, (B, T_FEAT), MASK_TIME_PROB, MASK_TIME_LENGTH, min_masks=2)
    masked_indices = mask_time_indices & valid
    flip_mask = jax.random.uniform(k2, (B, T_FEAT)) > OBSERVE_TIME_PROB
    replace = masked_indices & flip_mask
    # mask_feature_prob == 0 when pretrain=True -> no feature-axis masking

    # kernel 1: conv stack + GroupNorm + GELU + LN + projection + SpecAugment + pads
    xp = feature_extractor_projection(params, x_raw, replace, valid)  # (B, T+2*PAD, H)

    # kernel 2: pos-conv + LN + transformer layers + final ReLU
    add_mask = jnp.where(valid, 0.0, -1e30).astype(jnp.float32)[:, None, :]  # (B,1,T)
    reps = encoder_forward(params, xp, add_mask)          # (B, T, H)
    if pretrain:
        return reps, masked_indices
    return reps


# ------------------------------ parameter init ----------------------------------
def init_params(key):
    keys = iter(jax.random.split(key, 64))

    def w(shape, scale=0.02):
        return (scale * jax.random.normal(next(keys), shape)).astype(jnp.float32)

    p = {}
    p["conv0_w"] = w((CONV_KERNELS[0], CONV_DIM))                 # (K0, C), C_in = 1
    p["conv1_w"] = w((CONV_KERNELS[1], CONV_DIM, CONV_DIM))       # per-tap (C_in, C_out)
    p["conv2_w"] = w((CONV_KERNELS[2], CONV_DIM, CONV_DIM))
    p["gn_g"] = jnp.ones((CONV_DIM,), jnp.float32)
    p["gn_b"] = jnp.zeros((CONV_DIM,), jnp.float32)
    p["fp_ln_g"] = jnp.ones((CONV_DIM,), jnp.float32)
    p["fp_ln_b"] = jnp.zeros((CONV_DIM,), jnp.float32)
    p["fp_w"] = w((CONV_DIM, HIDDEN))
    p["fp_b"] = jnp.zeros((HIDDEN,), jnp.float32)
    p["masked_spec_embed"] = w((HIDDEN,), scale=1.0)
    # grouped positional conv stored as per-tap block-diagonal dense (K, H, H)
    # TODO(synk): HF applies weight_norm to the positional conv weight; omitted here.
    gsz = HIDDEN // POS_CONV_GROUPS
    gmask = (jnp.arange(HIDDEN)[:, None] // gsz
             == jnp.arange(HIDDEN)[None, :] // gsz).astype(jnp.float32)
    p["pos_w"] = w((POS_CONV_KERNEL, HIDDEN, HIDDEN)) * gmask[None]
    p["pos_b"] = jnp.zeros((HIDDEN,), jnp.float32)
    p["enc_ln_g"] = jnp.ones((HIDDEN,), jnp.float32)
    p["enc_ln_b"] = jnp.zeros((HIDDEN,), jnp.float32)
    p["layers"] = []
    for _ in range(NUM_LAYERS):
        p["layers"].append(dict(
            wq=w((HIDDEN, HIDDEN)), bq=jnp.zeros((HIDDEN,), jnp.float32),
            wk=w((HIDDEN, HIDDEN)), bk=jnp.zeros((HIDDEN,), jnp.float32),
            wv=w((HIDDEN, HIDDEN)), bv=jnp.zeros((HIDDEN,), jnp.float32),
            wo=w((HIDDEN, HIDDEN)), bo=jnp.zeros((HIDDEN,), jnp.float32),
            ln1_g=jnp.ones((HIDDEN,), jnp.float32),
            ln1_b=jnp.zeros((HIDDEN,), jnp.float32),
            w1=w((HIDDEN, INTERMEDIATE)), b1=jnp.zeros((INTERMEDIATE,), jnp.float32),
            w2=w((INTERMEDIATE, HIDDEN)), b2=jnp.zeros((HIDDEN,), jnp.float32),
            ln2_g=jnp.ones((HIDDEN,), jnp.float32),
            ln2_b=jnp.zeros((HIDDEN,), jnp.float32),
        ))
    return p


# ----------------------------------- main ----------------------------------------
if __name__ == "__main__":
    root = jax.random.PRNGKey(0)
    kp, kx, km = jax.random.split(root, 3)
    params = init_params(kp)
    x_raw = jax.random.normal(kx, (B, T_RAW), jnp.float32)
    length = jnp.array([T_RAW, 300], jnp.int32)

    reps, masked_indices = wav2vec2_wrapper_forward(params, x_raw, length, km,
                                                    pretrain=True)
    jax.block_until_ready((reps, masked_indices))

    t_seq = int(get_feat_extract_output_lengths(jnp.array(T_RAW, jnp.int32)))
    assert t_seq == T_FEAT
    assert reps.shape == (B, T_FEAT, HIDDEN), reps.shape
    assert reps.dtype == jnp.float32
    assert masked_indices.shape == (B, T_FEAT) and masked_indices.dtype == jnp.bool_
    assert bool(jnp.all(jnp.isfinite(reps)))
    print("KERNEL_OK")
</pallas_src>

<mosaic_0001>
module attributes {stable_mosaic.version = 11 : i64} {
  func.func @_feature_projection_kernel(%arg0: memref<144x16xbf16, #tpu.memory_space<vmem>>, %arg1: memref<16x32xbf16, #tpu.memory_space<vmem>>, %arg2: memref<1x32xf32, #tpu.memory_space<vmem>>, %arg3: memref<1x32xf32, #tpu.memory_space<vmem>>, %arg4: memref<3x33x72xbf16, #tpu.memory_space<vmem>>, %arg5: memref<3x32x32xbf16, #tpu.memory_space<vmem>>, %arg6: memref<2x16x33xbf16, #tpu.memory_space<vmem>>, %arg7: memref<2x32x32xbf16, #tpu.memory_space<vmem>>, %arg8: memref<1x32xf32, #tpu.memory_space<vmem>>, %arg9: memref<1x32xf32, #tpu.memory_space<vmem>>, %arg10: memref<32x32xbf16, #tpu.memory_space<vmem>>, %arg11: memref<1x32xf32, #tpu.memory_space<vmem>>, %arg12: memref<1x32xf32, #tpu.memory_space<vmem>>, %arg13: memref<32x1xf32, #tpu.memory_space<vmem>>, %arg14: memref<32x1xf32, #tpu.memory_space<vmem>>, %arg15: memref<2x24x32xf32, #tpu.memory_space<vmem>>) attributes {dimension_semantics = [], scalar_prefetch = 0 : i64, scratch_operands = 0 : i64, tpu.core_type = #tpu.core_type<tc>} {
    %c0 = arith.constant 0 : index
    %c0_0 = arith.constant 0 : index
    %0 = vector.load %arg0[%c0, %c0_0] : memref<144x16xbf16, #tpu.memory_space<vmem>>, vector<144x16xbf16>
    %c0_1 = arith.constant 0 : index
    %c0_2 = arith.constant 0 : index
    %1 = vector.load %arg1[%c0_1, %c0_2] : memref<16x32xbf16, #tpu.memory_space<vmem>>, vector<16x32xbf16>
    %cst = arith.constant dense<0.000000e+00> : vector<144x32xf32>
    %2 = tpu.matmul %0, %1, %cst {dimension_numbers = #tpu.dot_dimension_numbers<[1], [0], [0], [1], [0, 0, 1, 1], [], []>} : vector<144x16xbf16>, vector<16x32xbf16>, vector<144x32xf32> -> vector<144x32xf32>
    %3 = vector.extract_strided_slice %2 {offsets = [0, 0], sizes = [72, 32], strides = [1, 1]} : vector<144x32xf32> to vector<72x32xf32>
    %cst_3 = arith.constant dense<0.000000e+00> : vector<32xf32>
    %4 = vector.multi_reduction <add>, %3, %cst_3 [0] : vector<72x32xf32> to vector<32xf32>
    %5 = vector.shape_cast %4 : vector<32xf32> to vector<1x32xf32>
    %cst_4 = arith.constant 6.700000e+01 : f32
    %6 = vector.broadcast %cst_4 : f32 to vector<1x32xf32>
    %7 = arith.divf %5, %6 : vector<1x32xf32>
    %8 = arith.mulf %3, %3 : vector<72x32xf32>
    %cst_5 = arith.constant dense<0.000000e+00> : vector<32xf32>
    %9 = vector.multi_reduction <add>, %8, %cst_5 [0] : vector<72x32xf32> to vector<32xf32>
    %10 = vector.shape_cast %9 : vector<32xf32> to vector<1x32xf32>
    %cst_6 = arith.constant 6.700000e+01 : f32
    %11 = vector.broadcast %cst_6 : f32 to vector<1x32xf32>
    %12 = arith.divf %10, %11 : vector<1x32xf32>
    %13 = arith.mulf %7, %7 : vector<1x32xf32>
    %14 = arith.subf %12, %13 : vector<1x32xf32>
    %15 = vector.broadcast %7 : vector<1x32xf32> to vector<72x32xf32>
    %16 = arith.subf %3, %15 : vector<72x32xf32>
    %cst_7 = arith.constant 9.99999974E-6 : f32
    %17 = vector.broadcast %cst_7 : f32 to vector<1x32xf32>
    %18 = arith.addf %14, %17 : vector<1x32xf32>
    %19 = math.rsqrt %18 : vector<1x32xf32>
    %20 = vector.broadcast %19 : vector<1x32xf32> to vector<72x32xf32>
    %21 = arith.mulf %16, %20 : vector<72x32xf32>
    %c0_8 = arith.constant 0 : index
    %c0_9 = arith.constant 0 : index
    %22 = vector.load %arg2[%c0_8, %c0_9] : memref<1x32xf32, #tpu.memory_space<vmem>>, vector<1x32xf32>
    %23 = vector.broadcast %22 : vector<1x32xf32> to vector<72x32xf32>
    %24 = arith.mulf %21, %23 : vector<72x32xf32>
    %c0_10 = arith.constant 0 : index
    %c0_11 = arith.constant 0 : index
    %25 = vector.load %arg3[%c0_10, %c0_11] : memref<1x32xf32, #tpu.memory_space<vmem>>, vector<1x32xf32>
    %26 = vector.broadcast %25 : vector<1x32xf32> to vector<72x32xf32>
    %27 = arith.addf %24, %26 : vector<72x32xf32>
    %28 = arith.mulf %27, %27 : vector<72x32xf32>
    %29 = arith.mulf %27, %28 : vector<72x32xf32>
    %cst_12 = arith.constant 4.471500e-02 : f32
    %30 = vector.broadcast %cst_12 : f32 to vector<72x32xf32>
    %31 = arith.mulf %30, %29 : vector<72x32xf32>
    %32 = arith.addf %27, %31 : vector<72x32xf32>
    %cst_13 = arith.constant 0.797884583 : f32
    %33 = vector.broadcast %cst_13 : f32 to vector<72x32xf32>
    %34 = arith.mulf %33, %32 : vector<72x32xf32>
    %35 = math.tanh %34 : vector<72x32xf32>
    %cst_14 = arith.constant 1.000000e+00 : f32
    %36 = vector.broadcast %cst_14 : f32 to vector<72x32xf32>
    %37 = arith.addf %36, %35 : vector<72x32xf32>
    %cst_15 = arith.constant 5.000000e-01 : f32
    %38 = vector.broadcast %cst_15 : f32 to vector<72x32xf32>
    %39 = arith.mulf %38, %37 : vector<72x32xf32>
    %40 = arith.mulf %27, %39 : vector<72x32xf32>
    %c0_16 = arith.constant 0 : index
    %c0_17 = arith.constant 0 : index
    %c0_18 = arith.constant 0 : index
    %41 = vector.load %arg4[%c0_16, %c0_17, %c0_18] : memref<3x33x72xbf16, #tpu.memory_space<vmem>>, vector<1x33x72xbf16>
    %42 = vector.shape_cast %41 : vector<1x33x72xbf16> to vector<33x72xbf16>
    %c0_19 = arith.constant 0 : index
    %c0_20 = arith.constant 0 : index
    %c0_21 = arith.constant 0 : index
    %43 = vector.load %arg5[%c0_19, %c0_20, %c0_21] : memref<3x32x32xbf16, #tpu.memory_space<vmem>>, vector<1x32x32xbf16>
    %44 = vector.shape_cast %43 : vector<1x32x32xbf16> to vector<32x32xbf16>
    %45 = arith.truncf %40 : vector<72x32xf32> to vector<72x32xbf16>
    %cst_22 = arith.constant dense<0.000000e+00> : vector<72x32xf32>
    %46 = tpu.matmul %45, %44, %cst_22 {dimension_numbers = #tpu.dot_dimension_numbers<[1], [0], [0], [1], [0, 0, 1, 1], [], []>} : vector<72x32xbf16>, vector<32x32xbf16>, vector<72x32xf32> -> vector<72x32xf32>
    %47 = arith.truncf %46 : vector<72x32xf32> to vector<72x32xbf16>
    %cst_23 = arith.constant dense<0.000000e+00> : vector<33x32xf32>
    %48 = tpu.matmul %42, %47, %cst_23 {dimension_numbers = #tpu.dot_dimension_numbers<[1], [0], [0], [1], [0, 0, 1, 1], [], []>} : vector<33x72xbf16>, vector<72x32xbf16>, vector<33x32xf32> -> vector<33x32xf32>
    %c1 = arith.constant 1 : index
    %c0_24 = arith.constant 0 : index
    %c0_25 = arith.constant 0 : index
    %49 = vector.load %arg4[%c1, %c0_24, %c0_25] : memref<3x33x72xbf16, #tpu.memory_space<vmem>>, vector<1x33x72xbf16>
    %50 = vector.shape_cast %49 : vector<1x33x72xbf16> to vector<33x72xbf16>
    %c1_26 = arith.constant 1 : index
    %c0_27 = arith.constant 0 : index
    %c0_28 = arith.constant 0 : index
    %51 = vector.load %arg5[%c1_26, %c0_27, %c0_28] : memref<3x32x32xbf16, #tpu.memory_space<vmem>>, vector<1x32x32xbf16>
    %52 = vector.shape_cast %51 : vector<1x32x32xbf16> to vector<32x32xbf16>
    %53 = arith.truncf %40 : vector<72x32xf32> to vector<72x32xbf16>
    %cst_29 = arith.constant dense<0.000000e+00> : vector<72x32xf32>
    %54 = tpu.matmul %53, %52, %cst_29 {dimension_numbers = #tpu.dot_dimension_numbers<[1], [0], [0], [1], [0, 0, 1, 1], [], []>} : vector<72x32xbf16>, vector<32x32xbf16>, vector<72x32xf32> -> vector<72x32xf32>
    %55 = arith.truncf %54 : vector<72x32xf32> to vector<72x32xbf16>
    %cst_30 = arith.constant dense<0.000000e+00> : vector<33x32xf32>
    %56 = tpu.matmul %50, %55, %cst_30 {dimension_numbers = #tpu.dot_dimension_numbers<[1], [0], [0], [1], [0, 0, 1, 1], [], []>} : vector<33x72xbf16>, vector<72x32xbf16>, vector<33x32xf32> -> vector<33x32xf32>
    %57 = arith.addf %48, %56 : vector<33x32xf32>
    %c2 = arith.constant 2 : index
    %c0_31 = arith.constant 0 : index
    %c0_32 = arith.constant 0 : index
    %58 = vector.load %arg4[%c2, %c0_31, %c0_32] : memref<3x33x72xbf16, #tpu.memory_space<vmem>>, vector<1x33x72xbf16>
    %59 = vector.shape_cast %58 : vector<1x33x72xbf16> to vector<33x72xbf16>
    %c2_33 = arith.constant 2 : index
    %c0_34 = arith.constant 0 : index
    %c0_35 = arith.constant 0 : index
    %60 = vector.load %arg5[%c2_33, %c0_34, %c0_35] : memref<3x32x32xbf16, #tpu.memory_space<vmem>>, vector<1x32x32xbf16>
    %61 = vector.shape_cast %60 : vector<1x32x32xbf16> to vector<32x32xbf16>
    %62 = arith.truncf %40 : vector<72x32xf32> to vector<72x32xbf16>
    %cst_36 = arith.constant dense<0.000000e+00> : vector<72x32xf32>
    %63 = tpu.matmul %62, %61, %cst_36 {dimension_numbers = #tpu.dot_dimension_numbers<[1], [0], [0], [1], [0, 0, 1, 1], [], []>} : vector<72x32xbf16>, vector<32x32xbf16>, vector<72x32xf32> -> vector<72x32xf32>
    %64 = arith.truncf %63 : vector<72x32xf32> to vector<72x32xbf16>
    %cst_37 = arith.constant dense<0.000000e+00> : vector<33x32xf32>
    %65 = tpu.matmul %59, %64, %cst_37 {dimension_numbers = #tpu.dot_dimension_numbers<[1], [0], [0], [1], [0, 0, 1, 1], [], []>} : vector<33x72xbf16>, vector<72x32xbf16>, vector<33x32xf32> -> vector<33x32xf32>
    %66 = arith.addf %57, %65 : vector<33x32xf32>
    %67 = arith.mulf %66, %66 : vector<33x32xf32>
    %68 = arith.mulf %66, %67 : vector<33x32xf32>
    %cst_38 = arith.constant 4.471500e-02 : f32
    %69 = vector.broadcast %cst_38 : f32 to vector<33x32xf32>
    %70 = arith.mulf %69, %68 : vector<33x32xf32>
    %71 = arith.addf %66, %70 : vector<33x32xf32>
    %cst_39 = arith.constant 0.797884583 : f32
    %72 = vector.broadcast %cst_39 : f32 to vector<33x32xf32>
    %73 = arith.mulf %72, %71 : vector<33x32xf32>
    %74 = math.tanh %73 : vector<33x32xf32>
    %cst_40 = arith.constant 1.000000e+00 : f32
    %75 = vector.broadcast %cst_40 : f32 to vector<33x32xf32>
    %76 = arith.addf %75, %74 : vector<33x32xf32>
    %cst_41 = arith.constant 5.000000e-01 : f32
    %77 = vector.broadcast %cst_41 : f32 to vector<33x32xf32>
    %78 = arith.mulf %77, %76 : vector<33x32xf32>
    %79 = arith.mulf %66, %78 : vector<33x32xf32>
    %c0_42 = arith.constant 0 : index
    %c0_43 = arith.constant 0 : index
    %c0_44 = arith.constant 0 : index
    %80 = vector.load %arg6[%c0_42, %c0_43, %c0_44] : memref<2x16x33xbf16, #tpu.memory_space<vmem>>, vector<1x16x33xbf16>
    %81 = vector.shape_cast %80 : vector<1x16x33xbf16> to vector<16x33xbf16>
    %c0_45 = arith.constant 0 : index
    %c0_46 = arith.constant 0 : index
    %c0_47 = arith.constant 0 : index
    %82 = vector.load %arg7[%c0_45, %c0_46, %c0_47] : memref<2x32x32xbf16, #tpu.memory_space<vmem>>, vector<1x32x32xbf16>
    %83 = vector.shape_cast %82 : vector<1x32x32xbf16> to vector<32x32xbf16>
    %84 = arith.truncf %79 : vector<33x32xf32> to vector<33x32xbf16>
    %cst_48 = arith.constant dense<0.000000e+00> : vector<33x32xf32>
    %85 = tpu.matmul %84, %83, %cst_48 {dimension_numbers = #tpu.dot_dimension_numbers<[1], [0], [0], [1], [0, 0, 1, 1], [], []>} : vector<33x32xbf16>, vector<32x32xbf16>, vector<33x32xf32> -> vector<33x32xf32>
    %86 = arith.truncf %85 : vector<33x32xf32> to vector<33x32xbf16>
    %cst_49 = arith.constant dense<0.000000e+00> : vector<16x32xf32>
    %87 = tpu.matmul %81, %86, %cst_49 {dimension_numbers = #tpu.dot_dimension_numbers<[1], [0], [0], [1], [0, 0, 1, 1], [], []>} : vector<16x33xbf16>, vector<33x32xbf16>, vector<16x32xf32> -> vector<16x32xf32>
    %c1_50 = arith.constant 1 : index
    %c0_51 = arith.constant 0 : index
    %c0_52 = arith.constant 0 : index
    %88 = vector.load %arg6[%c1_50, %c0_51, %c0_52] : memref<2x16x33xbf16, #tpu.memory_space<vmem>>, vector<1x16x33xbf16>
    %89 = vector.shape_cast %88 : vector<1x16x33xbf16> to vector<16x33xbf16>
    %c1_53 = arith.constant 1 : index
    %c0_54 = arith.constant 0 : index
    %c0_55 = arith.constant 0 : index
    %90 = vector.load %arg7[%c1_53, %c0_54, %c0_55] : memref<2x32x32xbf16, #tpu.memory_space<vmem>>, vector<1x32x32xbf16>
    %91 = vector.shape_cast %90 : vector<1x32x32xbf16> to vector<32x32xbf16>
    %92 = arith.truncf %79 : vector<33x32xf32> to vector<33x32xbf16>
    %cst_56 = arith.constant dense<0.000000e+00> : vector<33x32xf32>
    %93 = tpu.matmul %92, %91, %cst_56 {dimension_numbers = #tpu.dot_dimension_numbers<[1], [0], [0], [1], [0, 0, 1, 1], [], []>} : vector<33x32xbf16>, vector<32x32xbf16>, vector<33x32xf32> -> vector<33x32xf32>
    %94 = arith.truncf %93 : vector<33x32xf32> to vector<33x32xbf16>
    %cst_57 = arith.constant dense<0.000000e+00> : vector<16x32xf32>
    %95 = tpu.matmul %89, %94, %cst_57 {dimension_numbers = #tpu.dot_dimension_numbers<[1], [0], [0], [1], [0, 0, 1, 1], [], []>} : vector<16x33xbf16>, vector<33x32xbf16>, vector<16x32xf32> -> vector<16x32xf32>
    %96 = arith.addf %87, %95 : vector<16x32xf32>
    %97 = arith.mulf %96, %96 : vector<16x32xf32>
    %98 = arith.mulf %96, %97 : vector<16x32xf32>
    %cst_58 = arith.constant 4.471500e-02 : f32
    %99 = vector.broadcast %cst_58 : f32 to vector<16x32xf32>
    %100 = arith.mulf %99, %98 : vector<16x32xf32>
    %101 = arith.addf %96, %100 : vector<16x32xf32>
    %cst_59 = arith.constant 0.797884583 : f32
    %102 = vector.broadcast %cst_59 : f32 to vector<16x32xf32>
    %103 = arith.mulf %102, %101 : vector<16x32xf32>
    %104 = math.tanh %103 : vector<16x32xf32>
    %cst_60 = arith.constant 1.000000e+00 : f32
    %105 = vector.broadcast %cst_60 : f32 to vector<16x32xf32>
    %106 = arith.addf %105, %104 : vector<16x32xf32>
    %cst_61 = arith.constant 5.000000e-01 : f32
    %107 = vector.broadcast %cst_61 : f32 to vector<16x32xf32>
    %108 = arith.mulf %107, %106 : vector<16x32xf32>
    %109 = arith.mulf %96, %108 : vector<16x32xf32>
    %110 = vector.extract_strided_slice %2 {offsets = [72, 0], sizes = [72, 32], strides = [1, 1]} : vector<144x32xf32> to vector<72x32xf32>
    %cst_62 = arith.constant dense<0.000000e+00> : vector<32xf32>
    %111 = vector.multi_reduction <add>, %110, %cst_62 [0] : vector<72x32xf32> to vector<32xf32>
    %112 = vector.shape_cast %111 : vector<32xf32> to vector<1x32xf32>
    %cst_63 = arith.constant 6.700000e+01 : f32
    %113 = vector.broadcast %cst_63 : f32 to vector<1x32xf32>
    %114 = arith.divf %112, %113 : vector<1x32xf32>
    %115 = arith.mulf %110, %110 : vector<72x32xf32>
    %cst_64 = arith.constant dense<0.000000e+00> : vector<32xf32>
    %116 = vector.multi_reduction <add>, %115, %cst_64 [0] : vector<72x32xf32> to vector<32xf32>
    %117 = vector.shape_cast %116 : vector<32xf32> to vector<1x32xf32>
    %cst_65 = arith.constant 6.700000e+01 : f32
    %118 = vector.broadcast %cst_65 : f32 to vector<1x32xf32>
    %119 = arith.divf %117, %118 : vector<1x32xf32>
    %120 = arith.mulf %114, %114 : vector<1x32xf32>
    %121 = arith.subf %119, %120 : vector<1x32xf32>
    %122 = vector.broadcast %114 : vector<1x32xf32> to vector<72x32xf32>
    %123 = arith.subf %110, %122 : vector<72x32xf32>
    %cst_66 = arith.constant 9.99999974E-6 : f32
    %124 = vector.broadcast %cst_66 : f32 to vector<1x32xf32>
    %125 = arith.addf %121, %124 : vector<1x32xf32>
    %126 = math.rsqrt %125 : vector<1x32xf32>
    %127 = vector.broadcast %126 : vector<1x32xf32> to vector<72x32xf32>
    %128 = arith.mulf %123, %127 : vector<72x32xf32>
    %c0_67 = arith.constant 0 : index
    %c0_68 = arith.constant 0 : index
    %129 = vector.load %arg2[%c0_67, %c0_68] : memref<1x32xf32, #tpu.memory_space<vmem>>, vector<1x32xf32>
    %130 = vector.broadcast %129 : vector<1x32xf32> to vector<72x32xf32>
    %131 = arith.mulf %128, %130 : vector<72x32xf32>
    %c0_69 = arith.constant 0 : index
    %c0_70 = arith.constant 0 : index
    %132 = vector.load %arg3[%c0_69, %c0_70] : memref<1x32xf32, #tpu.memory_space<vmem>>, vector<1x32xf32>
    %133 = vector.broadcast %132 : vector<1x32xf32> to vector<72x32xf32>
    %134 = arith.addf %131, %133 : vector<72x32xf32>
    %135 = arith.mulf %134, %134 : vector<72x32xf32>
    %136 = arith.mulf %134, %135 : vector<72x32xf32>
    %cst_71 = arith.constant 4.471500e-02 : f32
    %137 = vector.broadcast %cst_71 : f32 to vector<72x32xf32>
    %138 = arith.mulf %137, %136 : vector<72x32xf32>
    %139 = arith.addf %134, %138 : vector<72x32xf32>
    %cst_72 = arith.constant 0.797884583 : f32
    %140 = vector.broadcast %cst_72 : f32 to vector<72x32xf32>
    %141 = arith.mulf %140, %139 : vector<72x32xf32>
    %142 = math.tanh %141 : vector<72x32xf32>
    %cst_73 = arith.constant 1.000000e+00 : f32
    %143 = vector.broadcast %cst_73 : f32 to vector<72x32xf32>
    %144 = arith.addf %143, %142 : vector<72x32xf32>
    %cst_74 = arith.constant 5.000000e-01 : f32
    %145 = vector.broadcast %cst_74 : f32 to vector<72x32xf32>
    %146 = arith.mulf %145, %144 : vector<72x32xf32>
    %147 = arith.mulf %134, %146 : vector<72x32xf32>
    %c0_75 = arith.constant 0 : index
    %c0_76 = arith.constant 0 : index
    %c0_77 = arith.constant 0 : index
    %148 = vector.load %arg4[%c0_75, %c0_76, %c0_77] : memref<3x33x72xbf16, #tpu.memory_space<vmem>>, vector<1x33x72xbf16>
    %149 = vector.shape_cast %148 : vector<1x33x72xbf16> to vector<33x72xbf16>
    %c0_78 = arith.constant 0 : index
    %c0_79 = arith.constant 0 : index
    %c0_80 = arith.constant 0 : index
    %150 = vector.load %arg5[%c0_78, %c0_79, %c0_80] : memref<3x32x32xbf16, #tpu.memory_space<vmem>>, vector<1x32x32xbf16>
    %151 = vector.shape_cast %150 : vector<1x32x32xbf16> to vector<32x32xbf16>
    %152 = arith.truncf %147 : vector<72x32xf32> to vector<72x32xbf16>
    %cst_81 = arith.constant dense<0.000000e+00> : vector<72x32xf32>
    %153 = tpu.matmul %152, %151, %cst_81 {dimension_numbers = #tpu.dot_dimension_numbers<[1], [0], [0], [1], [0, 0, 1, 1], [], []>} : vector<72x32xbf16>, vector<32x32xbf16>, vector<72x32xf32> -> vector<72x32xf32>
    %154 = arith.truncf %153 : vector<72x32xf32> to vector<72x32xbf16>
    %cst_82 = arith.constant dense<0.000000e+00> : vector<33x32xf32>
    %155 = tpu.matmul %149, %154, %cst_82 {dimension_numbers = #tpu.dot_dimension_numbers<[1], [0], [0], [1], [0, 0, 1, 1], [], []>} : vector<33x72xbf16>, vector<72x32xbf16>, vector<33x32xf32> -> vector<33x32xf32>
    %c1_83 = arith.constant 1 : index
    %c0_84 = arith.constant 0 : index
    %c0_85 = arith.constant 0 : index
    %156 = vector.load %arg4[%c1_83, %c0_84, %c0_85] : memref<3x33x72xbf16, #tpu.memory_space<vmem>>, vector<1x33x72xbf16>
    %157 = vector.shape_cast %156 : vector<1x33x72xbf16> to vector<33x72xbf16>
    %c1_86 = arith.constant 1 : index
    %c0_87 = arith.constant 0 : index
    %c0_88 = arith.constant 0 : index
    %158 = vector.load %arg5[%c1_86, %c0_87, %c0_88] : memref<3x32x32xbf16, #tpu.memory_space<vmem>>, vector<1x32x32xbf16>
    %159 = vector.shape_cast %158 : vector<1x32x32xbf16> to vector<32x32xbf16>
    %160 = arith.truncf %147 : vector<72x32xf32> to vector<72x32xbf16>
    %cst_89 = arith.constant dense<0.000000e+00> : vector<72x32xf32>
    %161 = tpu.matmul %160, %159, %cst_89 {dimension_numbers = #tpu.dot_dimension_numbers<[1], [0], [0], [1], [0, 0, 1, 1], [], []>} : vector<72x32xbf16>, vector<32x32xbf16>, vector<72x32xf32> -> vector<72x32xf32>
    %162 = arith.truncf %161 : vector<72x32xf32> to vector<72x32xbf16>
    %cst_90 = arith.constant dense<0.000000e+00> : vector<33x32xf32>
    %163 = tpu.matmul %157, %162, %cst_90 {dimension_numbers = #tpu.dot_dimension_numbers<[1], [0], [0], [1], [0, 0, 1, 1], [], []>} : vector<33x72xbf16>, vector<72x32xbf16>, vector<33x32xf32> -> vector<33x32xf32>
    %164 = arith.addf %155, %163 : vector<33x32xf32>
    %c2_91 = arith.constant 2 : index
    %c0_92 = arith.constant 0 : index
    %c0_93 = arith.constant 0 : index
    %165 = vector.load %arg4[%c2_91, %c0_92, %c0_93] : memref<3x33x72xbf16, #tpu.memory_space<vmem>>, vector<1x33x72xbf16>
    %166 = vector.shape_cast %165 : vector<1x33x72xbf16> to vector<33x72xbf16>
    %c2_94 = arith.constant 2 : index
    %c0_95 = arith.constant 0 : index
    %c0_96 = arith.constant 0 : index
    %167 = vector.load %arg5[%c2_94, %c0_95, %c0_96] : memref<3x32x32xbf16, #tpu.memory_space<vmem>>, vector<1x32x32xbf16>
    %168 = vector.shape_cast %167 : vector<1x32x32xbf16> to vector<32x32xbf16>
    %169 = arith.truncf %147 : vector<72x32xf32> to vector<72x32xbf16>
    %cst_97 = arith.constant dense<0.000000e+00> : vector<72x32xf32>
    %170 = tpu.matmul %169, %168, %cst_97 {dimension_numbers = #tpu.dot_dimension_numbers<[1], [0], [0], [1], [0, 0, 1, 1], [], []>} : vector<72x32xbf16>, vector<32x32xbf16>, vector<72x32xf32> -> vector<72x32xf32>
    %171 = arith.truncf %170 : vector<72x32xf32> to vector<72x32xbf16>
    %cst_98 = arith.constant dense<0.000000e+00> : vector<33x32xf32>
    %172 = tpu.matmul %166, %171, %cst_98 {dimension_numbers = #tpu.dot_dimension_numbers<[1], [0], [0], [1], [0, 0, 1, 1], [], []>} : vector<33x72xbf16>, vector<72x32xbf16>, vector<33x32xf32> -> vector<33x32xf32>
    %173 = arith.addf %164, %172 : vector<33x32xf32>
    %174 = arith.mulf %173, %173 : vector<33x32xf32>
    %175 = arith.mulf %173, %174 : vector<33x32xf32>
    %cst_99 = arith.constant 4.471500e-02 : f32
    %176 = vector.broadcast %cst_99 : f32 to vector<33x32xf32>
    %177 = arith.mulf %176, %175 : vector<33x32xf32>
    %178 = arith.addf %173, %177 : vector<33x32xf32>
    %cst_100 = arith.constant 0.797884583 : f32
    %179 = vector.broadcast %cst_100 : f32 to vector<33x32xf32>
    %180 = arith.mulf %179, %178 : vector<33x32xf32>
    %181 = math.tanh %180 : vector<33x32xf32>
    %cst_101 = arith.constant 1.000000e+00 : f32
    %182 = vector.broadcast %cst_101 : f32 to vector<33x32xf32>
    %183 = arith.addf %182, %181 : vector<33x32xf32>
    %cst_102 = arith.constant 5.000000e-01 : f32
    %184 = vector.broadcast %cst_102 : f32 to vector<33x32xf32>
    %185 = arith.mulf %184, %183 : vector<33x32xf32>
    %186 = arith.mulf %173, %185 : vector<33x32xf32>
    %c0_103 = arith.constant 0 : index
    %c0_104 = arith.constant 0 : index
    %c0_105 = arith.constant 0 : index
    %187 = vector.load %arg6[%c0_103, %c0_104, %c0_105] : memref<2x16x33xbf16, #tpu.memory_space<vmem>>, vector<1x16x33xbf16>
    %188 = vector.shape_cast %187 : vector<1x16x33xbf16> to vector<16x33xbf16>
    %c0_106 = arith.constant 0 : index
    %c0_107 = arith.constant 0 : index
    %c0_108 = arith.constant 0 : index
    %189 = vector.load %arg7[%c0_106, %c0_107, %c0_108] : memref<2x32x32xbf16, #tpu.memory_space<vmem>>, vector<1x32x32xbf16>
    %190 = vector.shape_cast %189 : vector<1x32x32xbf16> to vector<32x32xbf16>
    %191 = arith.truncf %186 : vector<33x32xf32> to vector<33x32xbf16>
    %cst_109 = arith.constant dense<0.000000e+00> : vector<33x32xf32>
    %192 = tpu.matmul %191, %190, %cst_109 {dimension_numbers = #tpu.dot_dimension_numbers<[1], [0], [0], [1], [0, 0, 1, 1], [], []>} : vector<33x32xbf16>, vector<32x32xbf16>, vector<33x32xf32> -> vector<33x32xf32>
    %193 = arith.truncf %192 : vector<33x32xf32> to vector<33x32xbf16>
    %cst_110 = arith.constant dense<0.000000e+00> : vector<16x32xf32>
    %194 = tpu.matmul %188, %193, %cst_110 {dimension_numbers = #tpu.dot_dimension_numbers<[1], [0], [0], [1], [0, 0, 1, 1], [], []>} : vector<16x33xbf16>, vector<33x32xbf16>, vector<16x32xf32> -> vector<16x32xf32>
    %c1_111 = arith.constant 1 : index
    %c0_112 = arith.constant 0 : index
    %c0_113 = arith.constant 0 : index
    %195 = vector.load %arg6[%c1_111, %c0_112, %c0_113] : memref<2x16x33xbf16, #tpu.memory_space<vmem>>, vector<1x16x33xbf16>
    %196 = vector.shape_cast %195 : vector<1x16x33xbf16> to vector<16x33xbf16>
    %c1_114 = arith.constant 1 : index
    %c0_115 = arith.constant 0 : index
    %c0_116 = arith.constant 0 : index
    %197 = vector.load %arg7[%c1_114, %c0_115, %c0_116] : memref<2x32x32xbf16, #tpu.memory_space<vmem>>, vector<1x32x32xbf16>
    %198 = vector.shape_cast %197 : vector<1x32x32xbf16> to vector<32x32xbf16>
    %199 = arith.truncf %186 : vector<33x32xf32> to vector<33x32xbf16>
    %cst_117 = arith.constant dense<0.000000e+00> : vector<33x32xf32>
    %200 = tpu.matmul %199, %198, %cst_117 {dimension_numbers = #tpu.dot_dimension_numbers<[1], [0], [0], [1], [0, 0, 1, 1], [], []>} : vector<33x32xbf16>, vector<32x32xbf16>, vector<33x32xf32> -> vector<33x32xf32>
    %201 = arith.truncf %200 : vector<33x32xf32> to vector<33x32xbf16>
    %cst_118 = arith.constant dense<0.000000e+00> : vector<16x32xf32>
    %202 = tpu.matmul %196, %201, %cst_118 {dimension_numbers = #tpu.dot_dimension_numbers<[1], [0], [0], [1], [0, 0, 1, 1], [], []>} : vector<16x33xbf16>, vector<33x32xbf16>, vector<16x32xf32> -> vector<16x32xf32>
    %203 = arith.addf %194, %202 : vector<16x32xf32>
    %204 = arith.mulf %203, %203 : vector<16x32xf32>
    %205 = arith.mulf %203, %204 : vector<16x32xf32>
    %cst_119 = arith.constant 4.471500e-02 : f32
    %206 = vector.broadcast %cst_119 : f32 to vector<16x32xf32>
    %207 = arith.mulf %206, %205 : vector<16x32xf32>
    %208 = arith.addf %203, %207 : vector<16x32xf32>
    %cst_120 = arith.constant 0.797884583 : f32
    %209 = vector.broadcast %cst_120 : f32 to vector<16x32xf32>
    %210 = arith.mulf %209, %208 : vector<16x32xf32>
    %211 = math.tanh %210 : vector<16x32xf32>
    %cst_121 = arith.constant 1.000000e+00 : f32
    %212 = vector.broadcast %cst_121 : f32 to vector<16x32xf32>
    %213 = arith.addf %212, %211 : vector<16x32xf32>
    %cst_122 = arith.constant 5.000000e-01 : f32
    %214 = vector.broadcast %cst_122 : f32 to vector<16x32xf32>
    %215 = arith.mulf %214, %213 : vector<16x32xf32>
    %216 = arith.mulf %203, %215 : vector<16x32xf32>
    %217 = tpu.concatenate %109, %216 in 0 : vector<16x32xf32>, vector<16x32xf32> -> vector<32x32xf32>
    %c0_123 = arith.constant 0 : index
    %c0_124 = arith.constant 0 : index
    %218 = vector.load %arg8[%c0_123, %c0_124] : memref<1x32xf32, #tpu.memory_space<vmem>>, vector<1x32xf32>
    %c0_125 = arith.constant 0 : index
    %c0_126 = arith.constant 0 : index
    %219 = vector.load %arg9[%c0_125, %c0_126] : memref<1x32xf32, #tpu.memory_space<vmem>>, vector<1x32xf32>
    %cst_127 = arith.constant dense<0.000000e+00> : vector<32xf32>
    %220 = vector.multi_reduction <add>, %217, %cst_127 [1] : vector<32x32xf32> to vector<32xf32>
    %221 = vector.shape_cast %220 : vector<32xf32> to vector<32x1xf32>
    %cst_128 = arith.constant 3.200000e+01 : f32
    %222 = vector.broadcast %cst_128 : f32 to vector<32x1xf32>
    %223 = arith.divf %221, %222 : vector<32x1xf32>
    %224 = arith.mulf %217, %217 : vector<32x32xf32>
    %cst_129 = arith.constant dense<0.000000e+00> : vector<32xf32>
    %225 = vector.multi_reduction <add>, %224, %cst_129 [1] : vector<32x32xf32> to vector<32xf32>
    %226 = vector.shape_cast %225 : vector<32xf32> to vector<32x1xf32>
    %cst_130 = arith.constant 3.200000e+01 : f32
    %227 = vector.broadcast %cst_130 : f32 to vector<32x1xf32>
    %228 = arith.divf %226, %227 : vector<32x1xf32>
    %229 = arith.mulf %223, %223 : vector<32x1xf32>
    %230 = arith.subf %228, %229 : vector<32x1xf32>
    %231 = vector.broadcast %223 : vector<32x1xf32> to vector<32x32xf32>
    %232 = arith.subf %217, %231 : vector<32x32xf32>
    %cst_131 = arith.constant 9.99999974E-6 : f32
    %233 = vector.broadcast %cst_131 : f32 to vector<32x1xf32>
    %234 = arith.addf %230, %233 : vector<32x1xf32>
    %235 = math.rsqrt %234 : vector<32x1xf32>
    %236 = vector.broadcast %235 : vector<32x1xf32> to vector<32x32xf32>
    %237 = arith.mulf %232, %236 : vector<32x32xf32>
    %238 = vector.broadcast %218 : vector<1x32xf32> to vector<32x32xf32>
    %239 = arith.mulf %237, %238 : vector<32x32xf32>
    %240 = vector.broadcast %219 : vector<1x32xf32> to vector<32x32xf32>
    %241 = arith.addf %239, %240 : vector<32x32xf32>
    %c0_132 = arith.constant 0 : index
    %c0_133 = arith.constant 0 : index
    %242 = vector.load %arg10[%c0_132, %c0_133] : memref<32x32xbf16, #tpu.memory_space<vmem>>, vector<32x32xbf16>
    %243 = arith.truncf %241 : vector<32x32xf32> to vector<32x32xbf16>
    %cst_134 = arith.constant dense<0.000000e+00> : vector<32x32xf32>
    %244 = tpu.matmul %243, %242, %cst_134 {dimension_numbers = #tpu.dot_dimension_numbers<[1], [0], [0], [1], [0, 0, 1, 1], [], []>} : vector<32x32xbf16>, vector<32x32xbf16>, vector<32x32xf32> -> vector<32x32xf32>
    %c0_135 = arith.constant 0 : index
    %c0_136 = arith.constant 0 : index
    %245 = vector.load %arg11[%c0_135, %c0_136] : memref<1x32xf32, #tpu.memory_space<vmem>>, vector<1x32xf32>
    %246 = vector.broadcast %245 : vector<1x32xf32> to vector<32x32xf32>
    %247 = arith.addf %244, %246 : vector<32x32xf32>
    %c0_137 = arith.constant 0 : index
    %c0_138 = arith.constant 0 : index
    %248 = vector.load %arg13[%c0_137, %c0_138] : memref<32x1xf32, #tpu.memory_space<vmem>>, vector<32x1xf32>
    %cst_139 = arith.constant 5.000000e-01 : f32
    %249 = vector.broadcast %cst_139 : f32 to vector<32x1xf32>
    %250 = arith.cmpf ogt, %248, %249 : vector<32x1xf32>
    %c0_140 = arith.constant 0 : index
    %c0_141 = arith.constant 0 : index
    %251 = vector.load %arg12[%c0_140, %c0_141] : memref<1x32xf32, #tpu.memory_space<vmem>>, vector<1x32xf32>
    %252 = vector.shape_cast %250 : vector<32x1xi1> to vector<32x1xi1>
    %253 = vector.broadcast %252 : vector<32x1xi1> to vector<32x32xi1>
    %254 = vector.shape_cast %251 : vector<1x32xf32> to vector<1x32xf32>
    %255 = vector.broadcast %254 : vector<1x32xf32> to vector<32x32xf32>
    %256 = arith.select %253, %255, %247 : vector<32x32xi1>, vector<32x32xf32>
    %c0_142 = arith.constant 0 : index
    %c0_143 = arith.constant 0 : index
    %257 = vector.load %arg14[%c0_142, %c0_143] : memref<32x1xf32, #tpu.memory_space<vmem>>, vector<32x1xf32>
    %258 = vector.broadcast %257 : vector<32x1xf32> to vector<32x32xf32>
    %259 = arith.mulf %256, %258 : vector<32x32xf32>
    %cst_144 = arith.constant 0.000000e+00 : f32
    %260 = vector.broadcast %cst_144 : f32 to vector<4x32xf32>
    %c0_145 = arith.constant 0 : index
    %c0_146 = arith.constant 0 : index
    %c0_147 = arith.constant 0 : index
    %261 = vector.load %arg15[%c0_145, %c0_146, %c0_147] : memref<2x24x32xf32, #tpu.memory_space<vmem>>, vector<1x4x32xf32>
    %262 = vector.shape_cast %261 : vector<1x4x32xf32> to vector<4x32xf32>
    %263 = vector.shape_cast %260 : vector<4x32xf32> to vector<1x4x32xf32>
    tpu.vector_store %arg15[%c0_145, %c0_146, %c0_147], %263 {strides = array<i32>} : memref<2x24x32xf32, #tpu.memory_space<vmem>>, vector<1x4x32xf32>,
    %264 = vector.extract_strided_slice %259 {offsets = [0, 0], sizes = [16, 32], strides = [1, 1]} : vector<32x32xf32> to vector<16x32xf32>
    %c0_148 = arith.constant 0 : index
    %c4 = arith.constant 4 : index
    %c0_149 = arith.constant 0 : index
    %265 = vector.load %arg15[%c0_148, %c4, %c0_149] : memref<2x24x32xf32, #tpu.memory_space<vmem>>, vector<1x16x32xf32>
    %266 = vector.shape_cast %265 : vector<1x16x32xf32> to vector<16x32xf32>
    %267 = vector.shape_cast %264 : vector<16x32xf32> to vector<1x16x32xf32>
    tpu.vector_store %arg15[%c0_148, %c4, %c0_149], %267 {strides = array<i32>} : memref<2x24x32xf32, #tpu.memory_space<vmem>>, vector<1x16x32xf32>,
    %c0_150 = arith.constant 0 : index
    %c20 = arith.constant 20 : index
    %c0_151 = arith.constant 0 : index
    %268 = vector.load %arg15[%c0_150, %c20, %c0_151] : memref<2x24x32xf32, #tpu.memory_space<vmem>>, vector<1x4x32xf32>
    %269 = vector.shape_cast %268 : vector<1x4x32xf32> to vector<4x32xf32>
    %270 = vector.shape_cast %260 : vector<4x32xf32> to vector<1x4x32xf32>
    tpu.vector_store %arg15[%c0_150, %c20, %c0_151], %270 {strides = array<i32>} : memref<2x24x32xf32, #tpu.memory_space<vmem>>, vector<1x4x32xf32>,
    %c1_152 = arith.constant 1 : index
    %c0_153 = arith.constant 0 : index
    %c0_154 = arith.constant 0 : index
    %271 = vector.load %arg15[%c1_152, %c0_153, %c0_154] : memref<2x24x32xf32, #tpu.memory_space<vmem>>, vector<1x4x32xf32>
    %272 = vector.shape_cast %271 : vector<1x4x32xf32> to vector<4x32xf32>
    %273 = vector.shape_cast %260 : vector<4x32xf32> to vector<1x4x32xf32>
    tpu.vector_store %arg15[%c1_152, %c0_153, %c0_154], %273 {strides = array<i32>} : memref<2x24x32xf32, #tpu.memory_space<vmem>>, vector<1x4x32xf32>,
    %274 = vector.extract_strided_slice %259 {offsets = [16, 0], sizes = [16, 32], strides = [1, 1]} : vector<32x32xf32> to vector<16x32xf32>
    %c1_155 = arith.constant 1 : index
    %c4_156 = arith.constant 4 : index
    %c0_157 = arith.constant 0 : index
    %275 = vector.load %arg15[%c1_155, %c4_156, %c0_157] : memref<2x24x32xf32, #tpu.memory_space<vmem>>, vector<1x16x32xf32>
    %276 = vector.shape_cast %275 : vector<1x16x32xf32> to vector<16x32xf32>
    %277 = vector.shape_cast %274 : vector<16x32xf32> to vector<1x16x32xf32>
    tpu.vector_store %arg15[%c1_155, %c4_156, %c0_157], %277 {strides = array<i32>} : memref<2x24x32xf32, #tpu.memory_space<vmem>>, vector<1x16x32xf32>,
    %c1_158 = arith.constant 1 : index
    %c20_159 = arith.constant 20 : index
    %c0_160 = arith.constant 0 : index
    %278 = vector.load %arg15[%c1_158, %c20_159, %c0_160] : memref<2x24x32xf32, #tpu.memory_space<vmem>>, vector<1x4x32xf32>
    %279 = vector.shape_cast %278 : vector<1x4x32xf32> to vector<4x32xf32>
    %280 = vector.shape_cast %260 : vector<4x32xf32> to vector<1x4x32xf32>
    tpu.vector_store %arg15[%c1_158, %c20_159, %c0_160], %280 {strides = array<i32>} : memref<2x24x32xf32, #tpu.memory_space<vmem>>, vector<1x4x32xf32>,
    return
  }
}

</mosaic_0001>

<bundles_post_ra>
// kernel: tpu_custom_call.1
= control target key start
LH: loop header
LB: loop body
LE: loop exit
PB: predicated region body
PF: predicated region fallthrough
CT: control target
= control target key end

     0   :  { %20 = vsyncpa [#allocation3], 0  ;;  %s4735_s0 = inlined_call_operand.vmem [shape: bf16[144,16], index: 0, kind: input, shape index: {}]   ;;  %s4736_s1 = inlined_call_operand.hbm [shape: bf16[16,32], index: 1, kind: input, shape index: {}]   ;;  %s4737_s2 = inlined_call_operand.hbm [shape: f32[1,32], index: 2, kind: input, shape index: {}]   ;;  %s4738_s3 = inlined_call_operand.hbm [shape: f32[1,32], index: 3, kind: input, shape index: {}]   ;;  %s4739_s4 = inlined_call_operand.vmem [shape: bf16[3,33,72], index: 4, kind: input, shape index: {}]   ;;  %s4740_s5 = inlined_call_operand.vmem [shape: bf16[3,32,32], index: 5, kind: input, shape index: {}]   ;;  %s4741_s6 = inlined_call_operand.vmem [shape: bf16[2,16,33], index: 6, kind: input, shape index: {}]   ;;  %s4742_s7 = inlined_call_operand.vmem [shape: bf16[2,32,32], index: 7, kind: input, shape index: {}]   ;;  %s4743_s8 = inlined_call_operand.hbm [shape: f32[1,32], index: 8, kind: input, shape index: {}]   ;;  %s4744_s9 = inlined_call_operand.hbm [shape: f32[1,32], index: 9, kind: input, shape index: {}]   ;;  %s4745_s10 = inlined_call_operand.vmem [shape: bf16[32,32], index: 10, kind: input, shape index: {}]   ;;  %s4746_s11 = inlined_call_operand.hbm [shape: f32[1,32], index: 11, kind: input, shape index: {}]   ;;  %s4747_s12 = inlined_call_operand.vmem [shape: f32[1,32], index: 12, kind: input, shape index: {}]   ;;  %s4748_s13 = inlined_call_operand.vmem [shape: f32[32,1], index: 13, kind: input, shape index: {}]   ;;  %s4749_s14 = inlined_call_operand.vmem [shape: f32[32,1], index: 14, kind: input, shape index: {}]   ;;  %s4750_s15 = inlined_call_operand.hbm [shape: f32[2,24,32], index: 15, kind: output, shape index: {}]  }
   0x1   :  { %21 = vsyncpa [#allocation6], 0 }
   0x2   :  { %22 = vsyncpa [#allocation9], 0 }
   0x3   :  { %23 = vsyncpa [#allocation12], 0 }
   0x4   :  { %24 = vsyncpa [#allocation4], 0  ;;  %s3562_s18 = smov [#allocation5]   ;;  %s3563_s20 = smov [#allocation8]  }
   0x5   :  { %s45_s19 = sshll.u32 %s3562_s18, 4  ;;  %s73_s21 = sshll.u32 %s3563_s20, 4  ;;  %s46_s19 = int_to_ptr.vmem [resolvable:$true] %s45_s19  ;;  %s74_s21 = int_to_ptr.vmem [resolvable:$true] %s73_s21 }
   0x6   :  { %s3420_s22 = scalar_lea.vmem %s46_s19, 16  ;;  %s3424_s23 = scalar_lea.vmem %s46_s19, 32 }
   0x7   :  { %p3421_p0 = scmp.ne.s32.totalorder %s46_s19, %s3420_s22  ;;  %p3425_p1 = scmp.lt.s32.totalorder %s46_s19, %s46_s19 }
   0x8   :  { %p3426_p2 = scmp.lt.s32.totalorder %s3424_s23, %s3420_s22 }
   0xa   :  { %p3427_p3 = por %p3426_p2, %p3425_p1 }
   0xc   :  { %p3428_p4 = pnand %p3427_p3, %p3421_p0 }
   0xe   :  { %3431 = shalt.err (!%p3428_p4)
}
   0xf   :  { %48 = dma.hbm_to_vmem [thread:$0]  %s4737_s2, 16, %s46_s19, [#allocation6]  }
  0x10   :  { %s3440_s26 = scalar_lea.vmem %s74_s21, 16  ;;  %s3444_s27 = scalar_lea.vmem %s74_s21, 32 }
  0x11   :  { %p3441_p5 = scmp.ne.s32.totalorder %s74_s21, %s3440_s26  ;;  %p3445_p6 = scmp.lt.s32.totalorder %s74_s21, %s74_s21 }
  0x12   :  { %p3446_p7 = scmp.lt.s32.totalorder %s3444_s27, %s3440_s26 }
  0x14   :  { %p3447_p8 = por %p3446_p7, %p3445_p6 }
  0x16   :  { %p3448_p9 = pnand %p3447_p8, %p3441_p5 }
  0x18   :  { %3451 = shalt.err (!%p3448_p9)
}
  0x19   :  { %76 = dma.hbm_to_vmem [thread:$0]  %s4743_s8, 16, %s74_s21, [#allocation9]  }
  0x1a   :  { %s3564_s30 = smov [#allocation2]  }
  0x1b   :  { %s32_s16 = sshll.u32 %s3564_s30, 4  ;;  %s33_s16 = int_to_ptr.vmem [resolvable:$true] %s32_s16 }
  0x1c   :  { %s3460_s17 = scalar_lea.vmem %s33_s16, 128  ;;  %p3465_p11 = scmp.lt.s32.totalorder %s33_s16, %s33_s16 }
  0x1d   :  { %p3461_p10 = scmp.ne.s32.totalorder %s33_s16, %s3460_s17  ;;  %p3466_p12 = scmp.lt.s32.totalorder %s3460_s17, %s3460_s17 }
  0x1f   :  { %p3467_p13 = por %p3466_p12, %p3465_p11 }
  0x21   :  { %p3468_p0 = pnand %p3467_p13, %p3461_p10 }
  0x23   :  { %3471 = shalt.err (!%p3468_p0)
}
  0x24   :  { %s3565_s2 = smov 64   ;;  %s3566_s18 = smov 4  }
  0x25   :  { %38 = dma.hbm_to_vmem [thread:$0]  %s4736_s1, 128, %s33_s16, [#allocation3], %s3565_s2, %s3565_s2, %s3566_s18  }
  0x26   :  { %s3567_s22 = smov [#allocation7]   ;;  %s3568_s8 = smov [#allocation10]  }
  0x27   :  { %s55_s23 = sshll.u32 %s3567_s22, 4  ;;  %s83_s21 = sshll.u32 %s3568_s8, 4  ;;  %s56_s23 = int_to_ptr.vmem [resolvable:$true] %s55_s23  ;;  %s84_s21 = int_to_ptr.vmem [resolvable:$true] %s83_s21 }
  0x28   :  { %s3480_s24 = scalar_lea.vmem %s56_s23, 16  ;;  %s3484_s25 = scalar_lea.vmem %s56_s23, 32 }
  0x29   :  { %p3481_p1 = scmp.ne.s32.totalorder %s56_s23, %s3480_s24  ;;  %p3485_p2 = scmp.lt.s32.totalorder %s56_s23, %s56_s23 }
  0x2a   :  { %p3486_p3 = scmp.lt.s32.totalorder %s3484_s25, %s3480_s24 }
  0x2c   :  { %p3487_p4 = por %p3486_p3, %p3485_p2 }
  0x2e   :  { %p3488_p5 = pnand %p3487_p4, %p3481_p1 }
  0x30   :  { %3491 = shalt.err (!%p3488_p5)
}
  0x31   :  { %58 = dma.hbm_to_vmem [thread:$0]  %s4738_s3, 16, %s56_s23, [#allocation6]  }
  0x32   :  { %s3500_s28 = scalar_lea.vmem %s84_s21, 16  ;;  %s3504_s1 = scalar_lea.vmem %s84_s21, 32 }
  0x33   :  { %p3501_p6 = scmp.ne.s32.totalorder %s84_s21, %s3500_s28  ;;  %p3505_p7 = scmp.lt.s32.totalorder %s84_s21, %s84_s21 }
  0x34   :  { %p3506_p8 = scmp.lt.s32.totalorder %s3504_s1, %s3500_s28 }
  0x36   :  { %p3507_p9 = por %p3506_p8, %p3505_p7 }
  0x38   :  { %p3508_p10 = pnand %p3507_p9, %p3501_p6 }
  0x3a   :  { %3511 = shalt.err (!%p3508_p10)
}
  0x3b   :  { %86 = dma.hbm_to_vmem [thread:$0]  %s4744_s9, 16, %s84_s21, [#allocation9]  }
  0x3c   :  { %s3569_s16 = smov [#allocation11]  }
  0x3d   :  { %s95_s17 = sshll.u32 %s3569_s16, 4  ;;  %s96_s17 = int_to_ptr.vmem [resolvable:$true] %s95_s17 }
  0x3e   :  { %s3520_s2 = scalar_lea.vmem %s96_s17, 16  ;;  %s3524_s18 = scalar_lea.vmem %s96_s17, 32 }
  0x3f   :  { %p3521_p11 = scmp.ne.s32.totalorder %s96_s17, %s3520_s2  ;;  %p3525_p12 = scmp.lt.s32.totalorder %s96_s17, %s96_s17 }
  0x40   :  { %p3526_p13 = scmp.lt.s32.totalorder %s3524_s18, %s3520_s2 }
  0x42   :  { %p3527_p0 = por %p3526_p13, %p3525_p12 }
  0x44   :  { %p3528_p1 = pnand %p3527_p0, %p3521_p11 }
  0x46   :  { %3531 = shalt.err (!%p3528_p1)
}
  0x47   :  { %98 = dma.hbm_to_vmem [thread:$0]  %s4746_s11, 16, %s96_s17, [#allocation12]  }
  0x48   :  { %3552 = dma.done.wait [#allocation3], 128  }
  0x49   :  { %3553 = vsyncadd [#allocation3], 4294967168 }
  0x4a   :  { %3554 = dma.done.wait [#allocation6], 32  }
  0x4b   :  { %3555 = vsyncadd [#allocation6], 4294967264 }
  0x4c   :  { %3556 = dma.done.wait [#allocation9], 32  }
  0x4d   :  { %3557 = vsyncadd [#allocation9], 4294967264 }
  0x4e   :  { %3558 = dma.done.wait [#allocation12], 16  }
  0x4f   :  { %3559 = vsyncadd [#allocation12], 4294967280  ;;  %v3570_v0 = vmov 0.0   ;;  %vm3571_vm0 = vmmov 0   ;;  %v3301_v1 = vld [vmem:[#allocation2] sm:$0xff]   ;;  %vm195_vm1 = vcmask 130048  }
  0x50   :  { %2859 = vmatprep.subr.bf16.mxu0 %v3570_v0  ;;  %2861 = vmatprep.mubr.msk.bf16.mxu0 %vm3571_vm0, %v3570_v0  ;;  %v3302_v2 = vld [vmem:[%s4735_s0] sm:$0xff]   ;;  %v3303_v3 = vld [vmem:[%s4735_s0 + $0x8] sm:$0xff]   ;;  %v3304_v4 = vld [vmem:[%s4735_s0 + $0x10] sm:$0xff]   ;;  %vm328_vm2 = vcmask 261120   ;;  %vm763_vm3 = vcmask 1043456   ;;  %vm753_vm4 = vcmask 588800  }
  0x51   :  { %2897 = vmatprep.subr.bf16.mxu1 %v3570_v0  ;;  %2901 = vmatprep.mubr.msk.bf16.mxu1 %vm3571_vm0, %v3570_v0  ;;  %v3305_v5 = vld [vmem:[%s4735_s0 + $0x18] sm:$0xff]   ;;  %v3306_v6 = vld [vmem:[%s4735_s0 + $0x20] sm:$0xff]   ;;  %v3307_v7 = vld [vmem:[%s4735_s0 + $0x28] sm:$0xff]   ;;  %vm1312_vm5 = vcmask 1040384   ;;  %vm1308_vm6 = vcmask 269312   ;;  %vm2551_vm11 = vcmask 257024  }
  0x52   :  { %2860 = vmatpush3.bf16.msra.mxu0 %v3301_v1  ;;  %v3308_v8 = vld [vmem:[%s4735_s0 + $0x30] sm:$0xff]   ;;  %v3309_v9 = vld [vmem:[%s4735_s0 + $0x38] sm:$0xff]   ;;  %v3310_v10 = vld [vmem:[%s4735_s0 + $0x40] sm:$0xff]   ;;  %2552 = vst.msk [vmem:[#allocation13] sm:$0xf] %vm2551_vm11, %v3570_v0 }
  0x53   :  { %2945 = vmatprep.subr.bf16.mxu0 %v3570_v0  ;;  %v3311_v11 = vld [vmem:[%s4740_s5 + $0x8] sm:$0xff]   ;;  %v3312_v12 = vld [vmem:[%s4740_s5] sm:$0xff]   ;;  %2555 = vst.msk [vmem:[#allocation13 + $0x14] sm:$0xf] %vm2551_vm11, %v3570_v0  ;;  %2557 = vst.msk [vmem:[#allocation13 + $0x18] sm:$0xf] %vm2551_vm11, %v3570_v0 }
  0x54   :  { %2898 = vmatpush3.bf16.msra.mxu1 %v3311_v11  ;;  %2560 = vst.msk [vmem:[#allocation13 + $0x2c] sm:$0xf] %vm2551_vm11, %v3570_v0 }
  0x55   :  { %2862 = vmatmul.mubr.msk.bf16.vlgmr.msra.gmra.mxu0 %vm195_vm1, %v3302_v2  ;;  %2899 = vmatprep.subr.bf16.mxu1 %v3570_v0 }
  0x56   :  { %2865 = vmatprep.mubr.msk.bf16.mxu0 %vm3571_vm0, %v3570_v0 }
  0x58   :  { %2900 = vmatpush3.bf16.msra.mxu1 %v3312_v12 }
  0x59   :  { %2921 = vmatprep.subr.bf16.mxu1 %v3570_v0 }
  0x5d   :  { %2866 = vmatmul.mubr.msk.bf16.gmra.mxu0 %vm195_vm1, %v3303_v3 }
  0x5e   :  { %2869 = vmatprep.mubr.msk.bf16.mxu0 %vm3571_vm0, %v3570_v0 }
  0x65   :  { %2870 = vmatmul.mubr.msk.bf16.gmra.mxu0 %vm195_vm1, %v3304_v4 }
  0x66   :  { %2873 = vmatprep.mubr.msk.bf16.mxu0 %vm3571_vm0, %v3570_v0 }
  0x6d   :  { %2874 = vmatmul.mubr.msk.bf16.gmra.mxu0 %vm195_vm1, %v3305_v5 }
  0x6e   :  { %2877 = vmatprep.mubr.msk.bf16.mxu0 %vm3571_vm0, %v3570_v0 }
  0x75   :  { %2878 = vmatmul.mubr.msk.bf16.gmra.mxu0 %vm195_vm1, %v3306_v6 }
  0x76   :  { %2881 = vmatprep.mubr.msk.bf16.mxu0 %vm3571_vm0, %v3570_v0 }
  0x7d   :  { %2882 = vmatmul.mubr.msk.bf16.gmra.mxu0 %vm195_vm1, %v3307_v7 }
  0x7e   :  { %2885 = vmatprep.mubr.msk.bf16.mxu0 %vm3571_vm0, %v3570_v0 }
  0x85   :  { %2886 = vmatmul.mubr.msk.bf16.gmra.mxu0 %vm195_vm1, %v3308_v8 }
  0x86   :  { %2889 = vmatprep.mubr.msk.bf16.mxu0 %vm3571_vm0, %v3570_v0 }
  0x8d   :  { %2890 = vmatmul.mubr.msk.bf16.gmra.mxu0 %vm195_vm1, %v3309_v9 }
  0x8e   :  { %2893 = vmatprep.mubr.msk.bf16.mxu0 %vm3571_vm0, %v3570_v0 }
  0x95   :  { %2894 = vmatmul.mubr.msk.bf16.gmra.mxu0 %vm195_vm1, %v3310_v10 }
  0x96   :  { %2955 = vmatprep.mubr.msk.bf16.mxu0 %vm3571_vm0, %v3570_v0 }
 0x115   :  { %v3743_v13 = vpop.f32.mrf.mxu0 }
 0x116   :  { %v354_v23 = vmul.f32 %v3743_v13, %v3743_v13  ;;  %v329_v27 = vsel %vm328_vm2, %v3743_v13, 0.0 }
 0x117   :  { %v2863_v14 = vpop.f32.mrf.mxu0 }
 0x118   :  { %v363_v33 = vsel %vm328_vm2, %v354_v23, 0.0 }
 0x119   :  { %v3745_v15 = vpop.f32.mrf.mxu0 }
 0x11a   :  { %v355_v21 = vmul.f32 %v3745_v15, %v3745_v15  ;;  %v330_v24 = vsel %vm328_vm2, %v3745_v15, 0.0 }
 0x11b   :  { %v2864_v16 = vpop.f32.mrf.mxu0  ;;  %v331_v31 = vadd.f32 %v330_v24, %v329_v27 }
 0x11c   :  { %v364_v28 = vsel %vm328_vm2, %v355_v21, 0.0 }
 0x11d   :  { %v3747_v17 = vpop.f32.mrf.mxu0  ;;  %v365_v37 = vadd.f32 %v364_v28, %v363_v33 }
 0x11e   :  { %v356_v25 = vmul.f32 %v3747_v17, %v3747_v17  ;;  %v332_v29 = vsel %vm328_vm2, %v3747_v17, 0.0 }
 0x11f   :  { %v2867_v18 = vpop.f32.mrf.mxu0  ;;  %v333_v38 = vadd.f32 %v332_v29, %v331_v31 }
 0x120   :  { %v366_v34 = vsel %vm328_vm2, %v356_v25, 0.0 }
 0x121   :  { %v3749_v19 = vpop.f32.mrf.mxu0  ;;  %v367_v43 = vadd.f32 %v366_v34, %v365_v37 }
 0x122   :  { %v357_v30 = vmul.f32 %v3749_v19, %v3749_v19  ;;  %v334_v35 = vsel %vm328_vm2, %v3749_v19, 0.0 }
 0x123   :  { %v2868_v20 = vpop.f32.mrf.mxu0  ;;  %v335_v44 = vadd.f32 %v334_v35, %v333_v38 }
 0x124   :  { %v368_v40 = vsel %vm328_vm2, %v357_v30, 0.0 }
 0x125   :  { %v3753_v22 = vpop.f32.mrf.mxu0  ;;  %v369_v49 = vadd.f32 %v368_v40, %v367_v43 }
 0x126   :  { %v358_v36 = vmul.f32 %v3753_v22, %v3753_v22  ;;  %v336_v41 = vsel %vm328_vm2, %v3753_v22, 0.0 }
 0x127   :  { %v2871_v26 = vpop.f32.mrf.mxu0  ;;  %v337_v50 = vadd.f32 %v336_v41, %v335_v44 }
 0x128   :  { %v370_v46 = vsel %vm328_vm2, %v358_v36, 0.0 }
 0x129   :  { %v3768_v32 = vpop.f32.mrf.mxu0  ;;  %v371_v54 = vadd.f32 %v370_v46, %v369_v49 }
 0x12a   :  { %v359_v42 = vmul.f32 %v3768_v32, %v3768_v32  ;;  %v338_v47 = vsel %vm328_vm2, %v3768_v32, 0.0 }
 0x12b   :  { %v2872_v39 = vpop.f32.mrf.mxu0  ;;  %v339_v55 = vadd.f32 %v338_v47, %v337_v50 }
 0x12c   :  { %v372_v52 = vsel %vm328_vm2, %v359_v42, 0.0 }
 0x12d   :  { %v3781_v45 = vpop.f32.mrf.mxu0  ;;  %v373_v60 = vadd.f32 %v372_v52, %v371_v54 }
 0x12e   :  { %v360_v48 = vmul.f32 %v3781_v45, %v3781_v45  ;;  %v340_v53 = vsel %vm328_vm2, %v3781_v45, 0.0 }
 0x12f   :  { %v2875_v51 = vpop.f32.mrf.mxu0  ;;  %v341_v61 = vadd.f32 %v340_v53, %v339_v55 }
 0x130   :  { %v374_v57 = vsel %vm328_vm2, %v360_v48, 0.0 }
 0x131   :  { %v3791_v56 = vpop.f32.mrf.mxu0  ;;  %v375_v1 = vadd.f32 %v374_v57, %v373_v60 }
 0x132   :  { %v342_v58 = vsel %vm328_vm2, %v3791_v56, 0.0  ;;  %v361_v59 = vmul.f32 %v3791_v56, %v3791_v56 }
 0x133   :  { %v2876_v62 = vpop.f32.mrf.mxu0  ;;  %v343_v2 = vadd.f32 %v342_v58, %v341_v61 }
 0x134   :  { %v376_v63 = vsel %vm328_vm2, %v361_v59, 0.0 }
 0x135   :  { %v3799_v3 = vpop.f32.mrf.mxu0  ;;  %v377_v6 = vadd.f32 %v376_v63, %v375_v1 }
 0x136   :  { %v344_v4 = vsel %vm328_vm2, %v3799_v3, 0.0  ;;  %v362_v5 = vmul.f32 %v3799_v3, %v3799_v3 }
 0x137   :  { %v345_v7 = vadd.f32 %v344_v4, %v343_v2  ;;  %v2879_v8 = vpop.f32.mrf.mxu0 }
 0x138   :  { %v378_v9 = vsel %vm328_vm2, %v362_v5, 0.0 }
 0x139   :  { %v346_v10 = vrot.slane %v345_v7, 4  ;;  %v379_v11 = vadd.f32 %v378_v9, %v377_v6  ;;  %v3806_v12 = vpop.f32.mrf.mxu0 }
 0x13a   :  { %v1453_v20 = vmul.f32 %v3806_v12, %v3806_v12  ;;  %v1429_v25 = vsel %vm328_vm2, %v3806_v12, 0.0 }
 0x13b   :  { %v347_v14 = vadd.f32 %v346_v10, %v345_v7  ;;  %v380_v16 = vrot.slane %v379_v11, 4  ;;  %v2880_v18 = vpop.f32.mrf.mxu0 }
 0x13c   :  { %v1462_v33 = vsel %vm328_vm2, %v1453_v20, 0.0 }
 0x13d   :  { %v348_v21 = vrot.slane %v347_v14, 2  ;;  %v381_v23 = vadd.f32 %v380_v16, %v379_v11  ;;  %v3810_v24 = vpop.f32.mrf.mxu0 }
 0x13e   :  { %v1430_v26 = vsel %vm328_vm2, %v3810_v24, 0.0  ;;  %v1454_v27 = vmul.f32 %v3810_v24, %v3810_v24 }
 0x13f   :  { %v349_v28 = vadd.f32 %v348_v21, %v347_v14  ;;  %v382_v29 = vrot.slane %v381_v23, 2  ;;  %v1431_v30 = vadd.f32 %v1430_v26, %v1429_v25  ;;  %v2883_v31 = vpop.f32.mrf.mxu0 }
 0x140   :  { %v1463_v34 = vsel %vm328_vm2, %v1454_v27, 0.0 }
 0x141   :  { %v350_v35 = vrot.slane %v349_v28, 1  ;;  %v383_v36 = vadd.f32 %v382_v29, %v381_v23  ;;  %v1464_v37 = vadd.f32 %v1463_v34, %v1462_v33  ;;  %v3820_v38 = vpop.f32.mrf.mxu0 }
 0x142   :  { %v1432_v39 = vsel %vm328_vm2, %v3820_v38, 0.0  ;;  %v1455_v40 = vmul.f32 %v3820_v38, %v3820_v38 }
 0x143   :  { %v351_v41 = vadd.f32 %v350_v35, %v349_v28  ;;  %v384_v42 = vrot.slane %v383_v36, 1  ;;  %v1433_v43 = vadd.f32 %v1432_v39, %v1431_v30  ;;  %v2884_v44 = vpop.f32.mrf.mxu0 }
 0x144   :  { %v1465_v46 = vsel %vm328_vm2, %v1455_v40, 0.0  ;;  %v3882_v44 = vld [vmem:[#allocation5] ss:$0 sm:$0xff] }
 0x145   :  { %v3827_v47 = vmul.f32 0.014925373, %v351_v41  ;;  %v385_v48 = vadd.f32 %v384_v42, %v383_v36  ;;  %v1466_v49 = vadd.f32 %v1465_v46, %v1464_v37  ;;  %v3829_v50 = vpop.f32.mrf.mxu0 }
 0x146   :  { %v1434_v51 = vsel %vm328_vm2, %v3829_v50, 0.0  ;;  %v1456_v52 = vmul.f32 %v3829_v50, %v3829_v50 }
 0x147   :  { %v386_v53 = vmul.f32 0.014925373, %v385_v48  ;;  %v387_v54 = vmul.f32 %v3827_v47, %v3827_v47  ;;  %v1435_v55 = vadd.f32 %v1434_v51, %v1433_v43  ;;  %v2887_v57 = vpop.f32.mrf.mxu0  ;;  %v397_v34 = vsub.f32 %v3799_v3, %v3827_v47 }
 0x148   :  { %v1467_v58 = vsel %vm328_vm2, %v1456_v52, 0.0  ;;  %v389_v36 = vsub.f32 %v3743_v13, %v3827_v47  ;;  %v390_v37 = vsub.f32 %v3745_v15, %v3827_v47  ;;  %v391_v41 = vsub.f32 %v3747_v17, %v3827_v47  ;;  %v3895_v52 = vld [vmem:[#allocation7] ss:$0 sm:$0xff] }
 0x149   :  { %v388_v59 = vsub.f32 %v386_v53, %v387_v54  ;;  %v1468_v60 = vadd.f32 %v1467_v58, %v1466_v49  ;;  %v3838_v61 = vpop.f32.mrf.mxu0  ;;  %v392_v42 = vsub.f32 %v3749_v19, %v3827_v47  ;;  %v393_v3 = vsub.f32 %v3753_v22, %v3827_v47 }
 0x14a   :  { %v1436_v62 = vsel %vm328_vm2, %v3838_v61, 0.0  ;;  %v1457_v63 = vmul.f32 %v3838_v61, %v3838_v61  ;;  %v394_v46 = vsub.f32 %v3768_v32, %v3827_v47  ;;  %v395_v17 = vsub.f32 %v3781_v45, %v3827_v47 }
 0x14b   :  { %v398_v1 = vadd.f32 1e-05, %v388_v59  ;;  %v1437_v2 = vadd.f32 %v1436_v62, %v1435_v55  ;;  %v2888_v4 = vpop.f32.mrf.mxu0 }
 0x14c   :  { %v1469_v5 = vsel %vm328_vm2, %v1457_v63, 0.0 }
 0x14d   :  { %3334 = vrsqrt.f32 %v398_v1  ;;  %v1470_v6 = vadd.f32 %v1469_v5, %v1468_v60  ;;  %v3845_v7 = vpop.f32.mrf.mxu0 }
 0x14e   :  { %v1438_v8 = vsel %vm328_vm2, %v3845_v7, 0.0  ;;  %v1458_v9 = vmul.f32 %v3845_v7, %v3845_v7 }
 0x14f   :  { %v1439_v10 = vadd.f32 %v1438_v8, %v1437_v2  ;;  %v2891_v11 = vpop.f32.mrf.mxu0  ;;  %v396_v8 = vsub.f32 %v3791_v56, %v3827_v47 }
 0x150   :  { %v1471_v14 = vsel %vm328_vm2, %v1458_v9, 0.0 }
 0x151   :  { %v1472_v16 = vadd.f32 %v1471_v14, %v1470_v6  ;;  %v3852_v18 = vpop.f32.mrf.mxu0 }
 0x152   :  { %v1440_v20 = vsel %vm328_vm2, %v3852_v18, 0.0  ;;  %v1459_v21 = vmul.f32 %v3852_v18, %v3852_v18 }
 0x153   :  { %v1441_v23 = vadd.f32 %v1440_v20, %v1439_v10  ;;  %v2892_v25 = vpop.f32.mrf.mxu0 }
 0x154   :  { %v1473_v26 = vsel %vm328_vm2, %v1459_v21, 0.0 }
 0x155   :  { %v1474_v27 = vadd.f32 %v1473_v26, %v1472_v16  ;;  %v3859_v28 = vpop.f32.mrf.mxu0 }
 0x156   :  { %v1442_v29 = vsel %vm328_vm2, %v3859_v28, 0.0  ;;  %v1460_v30 = vmul.f32 %v3859_v28, %v3859_v28 }
 0x157   :  { %v1443_v31 = vadd.f32 %v1442_v29, %v1441_v23  ;;  %v2895_v33 = vpop.f32.mrf.mxu0 }
 0x158   :  { %v1475_v35 = vsel %vm328_vm2, %v1460_v30, 0.0 }
 0x159   :  { %v1476_v39 = vadd.f32 %v1475_v35, %v1474_v27  ;;  %v3872_v40 = vpop.f32.mrf.mxu0 }
 0x15a   :  { %v3880_v43 = vpop.eup %3334  ;;  %v1444_v13 = vsel %vm328_vm2, %v3872_v40, 0.0  ;;  %v1461_v15 = vmul.f32 %v3872_v40, %v3872_v40 }
 0x15b   :  { %v408_v19 = vmul.f32 %v3880_v43, %v397_v34  ;;  %v1445_v48 = vadd.f32 %v1444_v13, %v1443_v31  ;;  %v400_v22 = vmul.f32 %v3880_v43, %v389_v36  ;;  %v401_v49 = vmul.f32 %v3880_v43, %v390_v37  ;;  %v2896_v51 = vpop.f32.mrf.mxu0 }
 0x15c   :  { %v1477_v53 = vsel %vm328_vm2, %v1461_v15, 0.0  ;;  %v402_v54 = vmul.f32 %v3880_v43, %v391_v41  ;;  %v403_v55 = vmul.f32 %v3880_v43, %v392_v42  ;;  %v404_v32 = vmul.f32 %v3880_v43, %v393_v3 }
 0x15d   :  { %v424_v57 = vmul.f32 %v3882_v44, %v408_v19  ;;  %v1446_v58 = vrot.slane %v1445_v48, 4  ;;  %v1478_v59 = vadd.f32 %v1477_v53, %v1476_v39  ;;  %v416_v60 = vmul.f32 %v3882_v44, %v400_v22 }
 0x15e   :  { %v417_v62 = vmul.f32 %v3882_v44, %v401_v49  ;;  %v418_v63 = vmul.f32 %v3882_v44, %v402_v54  ;;  %v419_v1 = vmul.f32 %v3882_v44, %v403_v55  ;;  %v405_v2 = vmul.f32 %v3880_v43, %v394_v46 }
 0x15f   :  { %v1447_v4 = vadd.f32 %v1446_v58, %v1445_v48  ;;  %v1479_v5 = vrot.slane %v1478_v59, 4  ;;  %v3908_v6 = vadd.f32 %v3895_v52, %v416_v60  ;;  %v420_v14 = vmul.f32 %v3882_v44, %v404_v32 }
 0x160   :  { %v3913_v9 = vadd.f32 %v3895_v52, %v417_v62  ;;  %v3916_v10 = vadd.f32 %v3895_v52, %v418_v63  ;;  %v3919_v11 = vadd.f32 %v3895_v52, %v419_v1  ;;  %v3923_v16 = vadd.f32 %v3895_v52, %v424_v57 }
 0x161   :  { %v1448_v20 = vrot.slane %v1447_v4, 2  ;;  %v1480_v21 = vadd.f32 %v1479_v5, %v1478_v59  ;;  %v441_v23 = vmul.f32 %v3908_v6, %v3908_v6  ;;  %v421_v27 = vmul.f32 %v3882_v44, %v405_v2 }
 0x162   :  { %v442_v56 = vmul.f32 %v3913_v9, %v3913_v9  ;;  %v443_v25 = vmul.f32 %v3916_v10, %v3916_v10  ;;  %v444_v26 = vmul.f32 %v3919_v11, %v3919_v11  ;;  %v3936_v33 = vadd.f32 %v3895_v52, %v420_v14 }
 0x163   :  { %v1449_v29 = vadd.f32 %v1448_v20, %v1447_v4  ;;  %v1481_v30 = vrot.slane %v1480_v21, 2  ;;  %v450_v31 = vmul.f32 %v441_v23, %v3908_v6  ;;  %v3942_v37 = vadd.f32 %v3895_v52, %v421_v27 }
 0x164   :  { %v451_v34 = vmul.f32 %v442_v56, %v3913_v9  ;;  %v452_v35 = vmul.f32 %v443_v25, %v3916_v10  ;;  %v453_v36 = vmul.f32 %v444_v26, %v3919_v11  ;;  %v445_v3 = vmul.f32 %v3936_v33, %v3936_v33 }
 0x165   :  { %v1450_v39 = vrot.slane %v1449_v29, 1  ;;  %v1482_v41 = vadd.f32 %v1481_v30, %v1480_v21  ;;  %v459_v42 = vmul.f32 0.044715, %v450_v31  ;;  %v446_v19 = vmul.f32 %v3942_v37, %v3942_v37 }
 0x166   :  { %v460_v13 = vmul.f32 0.044715, %v451_v34  ;;  %v461_v15 = vmul.f32 0.044715, %v452_v35  ;;  %v462_v46 = vmul.f32 0.044715, %v453_v36  ;;  %v454_v51 = vmul.f32 %v445_v3, %v3936_v33 }
 0x167   :  { %v1451_v48 = vadd.f32 %v1450_v39, %v1449_v29  ;;  %v1483_v22 = vrot.slane %v1482_v41, 1  ;;  %v468_v49 = vadd.f32 %v459_v42, %v3908_v6  ;;  %v455_v32 = vmul.f32 %v446_v19, %v3942_v37 }
 0x168   :  { %v469_v53 = vadd.f32 %v460_v13, %v3913_v9  ;;  %v470_v54 = vadd.f32 %v461_v15, %v3916_v10  ;;  %v471_v55 = vadd.f32 %v462_v46, %v3919_v11  ;;  %v463_v60 = vmul.f32 0.044715, %v454_v51 }
 0x169   :  { %v3954_v57 = vmul.f32 0.014925373, %v1451_v48  ;;  %v1484_v58 = vadd.f32 %v1483_v22, %v1482_v41  ;;  %v477_v59 = vmul.f32 0.7978846, %v468_v49  ;;  %v406_v2 = vmul.f32 %v3880_v43, %v395_v17 }
 0x16a   :  { %v478_v62 = vmul.f32 0.7978846, %v469_v53  ;;  %v479_v63 = vmul.f32 0.7978846, %v470_v54  ;;  %v480_v1 = vmul.f32 0.7978846, %v471_v55  ;;  %v472_v21 = vadd.f32 %v463_v60, %v3936_v33 }
 0x16b   :  { %v1485_v4 = vmul.f32 0.014925373, %v1484_v58  ;;  %v1486_v5 = vmul.f32 %v3954_v57, %v3954_v57  ;;  %v1496_v14 = vsub.f32 %v3872_v40, %v3954_v57  ;;  %3336 = vtanh.f32 %v477_v59 }
 0x16c   :  { %3338 = vtanh.f32 %v478_v62  ;;  %v464_v20 = vmul.f32 0.044715, %v455_v32  ;;  %v407_v23 = vmul.f32 %v3880_v43, %v396_v8  ;;  %v449_v56 = vmul.f32 %v3923_v16, %v3923_v16 }
 0x16d   :  { %v1487_v45 = vsub.f32 %v1485_v4, %v1486_v5  ;;  %3340 = vtanh.f32 %v479_v63  ;;  %v422_v47 = vmul.f32 %v3882_v44, %v406_v2  ;;  %v481_v25 = vmul.f32 0.7978846, %v472_v21 }
 0x16e   :  { %3342 = vtanh.f32 %v480_v1  ;;  %v473_v17 = vadd.f32 %v464_v20, %v3942_v37  ;;  %v423_v26 = vmul.f32 %v3882_v44, %v407_v23  ;;  %v1488_v43 = vsub.f32 %v3806_v12, %v3954_v57 }
 0x16f   :  { %v1497_v27 = vadd.f32 1e-05, %v1487_v45  ;;  %v3972_v29 = vadd.f32 %v3895_v52, %v422_v47  ;;  %3344 = vtanh.f32 %v481_v25  ;;  %v1489_v31 = vsub.f32 %v3810_v24, %v3954_v57 }
 0x170   :  { %v482_v8 = vmul.f32 0.7978846, %v473_v17  ;;  %v3977_v30 = vadd.f32 %v3895_v52, %v423_v26  ;;  %v458_v35 = vmul.f32 %v449_v56, %v3923_v16  ;;  %v1490_v36 = vsub.f32 %v3820_v38, %v3954_v57 }
 0x171   :  { %3346 = vrsqrt.f32 %v1497_v27  ;;  %v447_v34 = vmul.f32 %v3972_v29, %v3972_v29  ;;  %v1491_v39 = vsub.f32 %v3829_v50, %v3954_v57  ;;  %v1492_v41 = vsub.f32 %v3838_v61, %v3954_v57 }
 0x172   :  { %3348 = vtanh.f32 %v482_v8  ;;  %v448_v12 = vmul.f32 %v3977_v30, %v3977_v30  ;;  %v1493_v42 = vsub.f32 %v3845_v7, %v3954_v57  ;;  %v1494_v3 = vsub.f32 %v3852_v18, %v3954_v57 }
 0x173   :  { %v456_v24 = vmul.f32 %v447_v34, %v3972_v29  ;;  %v1495_v13 = vsub.f32 %v3859_v28, %v3954_v57  ;;  %v467_v19 = vmul.f32 0.044715, %v458_v35 }
 0x174   :  { %v457_v38 = vmul.f32 %v448_v12, %v3977_v30 }
 0x175   :  { %v465_v15 = vmul.f32 0.044715, %v456_v24  ;;  %v476_v58 = vadd.f32 %v467_v19, %v3923_v16 }
 0x176   :  { %v466_v46 = vmul.f32 0.044715, %v457_v38 }
 0x177   :  { %v474_v50 = vadd.f32 %v465_v15, %v3972_v29  ;;  %v485_v45 = vmul.f32 0.7978846, %v476_v58 }
 0x178   :  { %v3337_v48 = vpop.eup %3336  ;;  %v475_v22 = vadd.f32 %v466_v46, %v3977_v30 }
 0x179   :  { %v3339_v49 = vpop.eup %3338  ;;  %v495_v51 = vadd.f32 1.0, %v3337_v48  ;;  %v483_v53 = vmul.f32 0.7978846, %v474_v50 }
 0x17a   :  { %v3341_v54 = vpop.eup %3340  ;;  %v496_v55 = vadd.f32 1.0, %v3339_v49  ;;  %v484_v32 = vmul.f32 0.7978846, %v475_v22 }
 0x17b   :  { %v3343_v59 = vpop.eup %3342  ;;  %v504_v60 = vmul.f32 0.5, %v495_v51  ;;  %v497_v62 = vadd.f32 1.0, %v3341_v54  ;;  %3350 = vtanh.f32 %v483_v53 }
 0x17c   :  { %v505_v63 = vmul.f32 0.5, %v496_v55  ;;  %v498_v1 = vadd.f32 1.0, %v3343_v59  ;;  %3352 = vtanh.f32 %v484_v32  ;;  %v3345_v2 = vpop.eup %3344 }
 0x17d   :  { %v513_v4 = vmul.f32 %v504_v60, %v3908_v6  ;;  %v506_v5 = vmul.f32 0.5, %v497_v62  ;;  %v499_v56 = vadd.f32 1.0, %v3345_v2  ;;  %v4015_v6 = vld [vmem:[%s4740_s5 + $0x18] sm:$0xff]   ;;  %3354 = vtanh.f32 %v485_v45 }
 0x17e   :  { %v4004_v20 = vpop.eup %3346  ;;  %v514_v21 = vmul.f32 %v505_v63, %v3913_v9  ;;  %v507_v23 = vmul.f32 0.5, %v498_v1 }
 0x17f   :  { %v3349_v47 = vpop.eup %3348  ;;  %v1507_v17 = vmul.f32 %v4004_v20, %v1496_v14  ;;  %v515_v25 = vmul.f32 %v506_v5, %v3916_v10  ;;  %v1499_v26 = vmul.f32 %v4004_v20, %v1488_v43  ;;  %v1500_v9 = vmul.f32 %v4004_v20, %v1489_v31 }
 0x180   :  { %v4019_v27 = vpack.c.bf16 %v514_v21, %v513_v4  ;;  %v516_v8 = vmul.f32 %v507_v23, %v3919_v11  ;;  %v500_v34 = vadd.f32 1.0, %v3349_v47  ;;  %v508_v35 = vmul.f32 0.5, %v499_v56 }
 0x181   :  { %v1516_v40 = vmul.f32 %v3882_v44, %v1507_v17  ;;  %v1508_v14 = vmul.f32 %v3882_v44, %v1499_v26  ;;  %v1509_v10 = vmul.f32 %v3882_v44, %v1500_v9  ;;  %v1501_v12 = vmul.f32 %v4004_v20, %v1490_v36  ;;  %v4041_v36 = vld [vmem:[%s4740_s5 + $0x10] sm:$0xff]  }
 0x182   :  { %2902 = vmatmul.mubr.msk.bf16.vlgmr.msra.gmra.mxu1 %vm328_vm2, %v4019_v27  ;;  %v4028_v43 = vpack.c.bf16 %v516_v8, %v515_v25  ;;  %v509_v31 = vmul.f32 0.5, %v500_v34  ;;  %v517_v24 = vmul.f32 %v508_v35, %v3936_v33  ;;  %v1502_v11 = vmul.f32 %v4004_v20, %v1491_v39 }
 0x183   :  { %v4033_v38 = vadd.f32 %v3895_v52, %v1516_v40  ;;  %2905 = vmatprep.mubr.msk.bf16.mxu1 %vm3571_vm0, %v3570_v0  ;;  %2922 = vmatpush3.bf16.msra.mxu1 %v4015_v6  ;;  %v4044_v15 = vadd.f32 %v3895_v52, %v1508_v14  ;;  %v4047_v33 = vadd.f32 %v3895_v52, %v1509_v10 }
 0x184   :  { %v518_v39 = vmul.f32 %v509_v31, %v3942_v37  ;;  %2923 = vmatprep.subr.bf16.mxu1 %v3570_v0  ;;  %v1510_v46 = vmul.f32 %v3882_v44, %v1501_v12  ;;  %v1511_v19 = vmul.f32 %v3882_v44, %v1502_v11  ;;  %v1503_v50 = vmul.f32 %v4004_v20, %v1492_v41 }
 0x185   :  { %v1526_v48 = vmul.f32 %v4044_v15, %v4044_v15  ;;  %v1527_v22 = vmul.f32 %v4047_v33, %v4047_v33  ;;  %v1504_v61 = vmul.f32 %v4004_v20, %v1493_v42  ;;  %v1505_v42 = vmul.f32 %v4004_v20, %v1494_v3 }
 0x186   :  { %v4061_v49 = vpack.c.bf16 %v518_v39, %v517_v24  ;;  %v4064_v37 = vadd.f32 %v3895_v52, %v1510_v46  ;;  %v4067_v51 = vadd.f32 %v3895_v52, %v1511_v19  ;;  %v1512_v54 = vmul.f32 %v3882_v44, %v1503_v50 }
 0x187   :  { %2924 = vmatpush3.bf16.msra.mxu1 %v4041_v36  ;;  %v1535_v41 = vmul.f32 %v1526_v48, %v4044_v15  ;;  %v1536_v53 = vmul.f32 %v1527_v22, %v4047_v33  ;;  %v1513_v7 = vmul.f32 %v3882_v44, %v1504_v61  ;;  %v1514_v12 = vmul.f32 %v3882_v44, %v1505_v42 }
 0x188   :  { %v3351_v55 = vpop.eup %3350  ;;  %2967 = vmatprep.subr.bf16.mxu1 %v3570_v0  ;;  %v1528_v32 = vmul.f32 %v4064_v37, %v4064_v37  ;;  %v1529_v58 = vmul.f32 %v4067_v51, %v4067_v51  ;;  %v4092_v5 = vadd.f32 %v3895_v52, %v1512_v54 }
 0x189   :  { %v3353_v59 = vpop.eup %3352  ;;  %v501_v60 = vadd.f32 1.0, %v3351_v55  ;;  %v1544_v62 = vmul.f32 0.044715, %v1535_v41  ;;  %v1545_v63 = vmul.f32 0.044715, %v1536_v53  ;;  %v4099_v23 = vadd.f32 %v3895_v52, %v1513_v7 }
 0x18a   :  { %2906 = vmatmul.mubr.msk.bf16.gmra.mxu1 %vm328_vm2, %v4028_v43  ;;  %v502_v1 = vadd.f32 1.0, %v3353_v59  ;;  %v1537_v2 = vmul.f32 %v1528_v32, %v4064_v37  ;;  %v1538_v4 = vmul.f32 %v1529_v58, %v4067_v51  ;;  %v1530_v17 = vmul.f32 %v4092_v5, %v4092_v5  ;;  %v3355_v31 = vpop.eup %3354 }
 0x18b   :  { %2909 = vmatprep.mubr.msk.bf16.mxu1 %vm3571_vm0, %v3570_v0  ;;  %v510_v18 = vmul.f32 0.5, %v501_v60  ;;  %v1553_v3 = vadd.f32 %v1544_v62, %v4044_v15  ;;  %v1554_v21 = vadd.f32 %v1545_v63, %v4047_v33  ;;  %v1531_v8 = vmul.f32 %v4099_v23, %v4099_v23 }
 0x18c   :  { %v511_v56 = vmul.f32 0.5, %v502_v1  ;;  %v1546_v45 = vmul.f32 0.044715, %v1537_v2  ;;  %v1547_v47 = vmul.f32 0.044715, %v1538_v4  ;;  %v1539_v14 = vmul.f32 %v1530_v17, %v4092_v5 }
 0x18d   :  { %v519_v25 = vmul.f32 %v510_v18, %v3972_v29  ;;  %v1562_v26 = vmul.f32 0.7978846, %v1553_v3  ;;  %v1563_v9 = vmul.f32 0.7978846, %v1554_v21  ;;  %v1540_v10 = vmul.f32 %v1531_v8, %v4099_v23 }
 0x18e   :  { %v520_v34 = vmul.f32 %v511_v56, %v3977_v30  ;;  %v1555_v35 = vadd.f32 %v1546_v45, %v4064_v37  ;;  %v1556_v40 = vadd.f32 %v1547_v47, %v4067_v51  ;;  %v1506_v29 = vmul.f32 %v4004_v20, %v1495_v13 }
 0x18f   :  { %3356 = vtanh.f32 %v1562_v26  ;;  %v1548_v39 = vmul.f32 0.044715, %v1539_v14  ;;  %v1549_v46 = vmul.f32 0.044715, %v1540_v10  ;;  %v4120_v50 = vadd.f32 %v3895_v52, %v1514_v12 }
 0x190   :  { %v4116_v24 = vpack.c.bf16 %v520_v34, %v519_v25  ;;  %3358 = vtanh.f32 %v1563_v9  ;;  %v1564_v30 = vmul.f32 0.7978846, %v1555_v35  ;;  %v1565_v11 = vmul.f32 0.7978846, %v1556_v40 }
 0x191   :  { %v1515_v19 = vmul.f32 %v3882_v44, %v1506_v29  ;;  %v1557_v28 = vadd.f32 %v1548_v39, %v4092_v5  ;;  %v1558_v57 = vadd.f32 %v1549_v46, %v4099_v23  ;;  %v503_v20 = vadd.f32 1.0, %v3355_v31 }
 0x192   :  { %2910 = vmatmul.mubr.msk.bf16.gmra.mxu1 %vm328_vm2, %v4061_v49  ;;  %3360 = vtanh.f32 %v1564_v30  ;;  %v1532_v44 = vmul.f32 %v4120_v50, %v4120_v50 }
 0x193   :  { %2913 = vmatprep.mubr.msk.bf16.mxu1 %vm3571_vm0, %v3570_v0  ;;  %3362 = vtanh.f32 %v1565_v11  ;;  %v1524_v13 = vadd.f32 %v3895_v52, %v1515_v19  ;;  %v1566_v48 = vmul.f32 0.7978846, %v1557_v28  ;;  %v1567_v22 = vmul.f32 0.7978846, %v1558_v57 }
 0x194   :  { %v1541_v41 = vmul.f32 %v1532_v44, %v4120_v50  ;;  %v512_v54 = vmul.f32 0.5, %v503_v20 }
 0x195   :  { %v1533_v61 = vmul.f32 %v1524_v13, %v1524_v13  ;;  %3364 = vtanh.f32 %v1566_v48 }
 0x196   :  { %3366 = vtanh.f32 %v1567_v22  ;;  %v1550_v55 = vmul.f32 0.044715, %v1541_v41  ;;  %v521_v42 = vmul.f32 %v512_v54, %v3923_v16 }
 0x197   :  { %v1542_v53 = vmul.f32 %v1533_v61, %v1524_v13 }
 0x198   :  { %v1559_v52 = vadd.f32 %v1550_v55, %v4120_v50  ;;  %v4138_v3 = vpack.c.bf16 %v521_v42, %v521_v42 }
 0x199   :  { %v1551_v32 = vmul.f32 0.044715, %v1542_v53 }
 0x19a   :  { %2914 = vmatmul.mubr.msk.bf16.gmra.mxu1 %vm328_vm2, %v4116_v24  ;;  %v1568_v59 = vmul.f32 0.7978846, %v1559_v52 }
 0x19b   :  { %2917 = vmatprep.mubr.msk.bf16.mxu1 %vm3571_vm0, %v3570_v0  ;;  %v1560_v58 = vadd.f32 %v1551_v32, %v1524_v13 }
 0x19c   :  { %v3357_v7 = vpop.eup %3356  ;;  %3368 = vtanh.f32 %v1568_v59 }
 0x19d   :  { %v3359_v60 = vpop.eup %3358  ;;  %v1580_v62 = vadd.f32 1.0, %v3357_v7  ;;  %v1569_v63 = vmul.f32 0.7978846, %v1560_v58 }
 0x19e   :  { %v1581_v1 = vadd.f32 1.0, %v3359_v60 }
 0x19f   :  { %v3361_v2 = vpop.eup %3360  ;;  %v1589_v4 = vmul.f32 0.5, %v1580_v62  ;;  %3370 = vtanh.f32 %v1569_v63 }
 0x1a0   :  { %v3363_v18 = vpop.eup %3362  ;;  %v1590_v21 = vmul.f32 0.5, %v1581_v1  ;;  %v1582_v56 = vadd.f32 1.0, %v3361_v2 }
 0x1a1   :  { %v1598_v45 = vmul.f32 %v1589_v4, %v4044_v15  ;;  %v1583_v47 = vadd.f32 1.0, %v3363_v18 }
 0x1a2   :  { %2918 = vmatmul.mubr.msk.bf16.gmra.mxu1 %vm328_vm2, %v4138_v3  ;;  %v1599_v16 = vmul.f32 %v1590_v21, %v4047_v33  ;;  %v1591_v17 = vmul.f32 0.5, %v1582_v56  ;;  %v3365_v26 = vpop.eup %3364 }
 0x1a3   :  { %2925 = vmatprep.mubr.msk.bf16.mxu1 %vm3571_vm0, %v3570_v0  ;;  %v1592_v25 = vmul.f32 0.5, %v1583_v47  ;;  %v3367_v34 = vpop.eup %3366  ;;  %v1584_v15 = vadd.f32 1.0, %v3365_v26 }
 0x1a4   :  { %v4146_v9 = vpack.c.bf16 %v1599_v16, %v1598_v45  ;;  %v1600_v8 = vmul.f32 %v1591_v17, %v4064_v37  ;;  %v1585_v40 = vadd.f32 1.0, %v3367_v34 }
 0x1a5   :  { %v1601_v35 = vmul.f32 %v1592_v25, %v4067_v51  ;;  %v1593_v10 = vmul.f32 0.5, %v1584_v15  ;;  %v4187_v25 = vld [vmem:[%s4739_s4] sm:$0xff]   ;;  %v4197_v15 = vld [vmem:[%s4739_s4 + $0x8] sm:$0xff]  }
 0x1a6   :  { %v1594_v29 = vmul.f32 0.5, %v1585_v40 }
 0x1a7   :  { %v4150_v14 = vpack.c.bf16 %v1601_v35, %v1600_v8  ;;  %v1602_v33 = vmul.f32 %v1593_v10, %v4092_v5 }
 0x1a8   :  { %v1603_v12 = vmul.f32 %v1594_v29, %v4099_v23 }
 0x1a9   :  { %v3369_v31 = vpop.eup %3368 }
 0x1aa   :  { %2926 = vmatmul.mubr.msk.bf16.vlgmr.msra.gmra.mxu1 %vm328_vm2, %v4019_v27  ;;  %v4158_v30 = vpack.c.bf16 %v1603_v12, %v1602_v33  ;;  %v1586_v51 = vadd.f32 1.0, %v3369_v31  ;;  %v4206_v12 = vld [vmem:[%s4739_s4 + $0x10] ss:$0 sps:$4 sm:$0x11]  }
 0x1ab   :  { %2929 = vmatprep.mubr.msk.bf16.mxu1 %vm3571_vm0, %v3570_v0 }
 0x1ac   :  { %v3371_v37 = vpop.eup %3370  ;;  %v1595_v39 = vmul.f32 0.5, %v1586_v51 }
 0x1ad   :  { %v1587_v11 = vadd.f32 1.0, %v3371_v37 }
 0x1ae   :  { %v1604_v19 = vmul.f32 %v1595_v39, %v4120_v50 }
 0x1af   :  { %v1596_v46 = vmul.f32 0.5, %v1587_v11 }
 0x1b1   :  { %v1605_v28 = vmul.f32 %v1596_v46, %v1524_v13 }
 0x1b2   :  { %2930 = vmatmul.mubr.msk.bf16.gmra.mxu1 %vm328_vm2, %v4028_v43 }
 0x1b3   :  { %2933 = vmatprep.mubr.msk.bf16.mxu1 %vm3571_vm0, %v3570_v0  ;;  %v4165_v5 = vpack.c.bf16 %v1605_v28, %v1604_v19 }
 0x1ba   :  { %2934 = vmatmul.mubr.msk.bf16.gmra.mxu1 %vm328_vm2, %v4061_v49 }
 0x1bb   :  { %2937 = vmatprep.mubr.msk.bf16.mxu1 %vm3571_vm0, %v3570_v0 }
 0x1c2   :  { %2938 = vmatmul.mubr.msk.bf16.gmra.mxu1 %vm328_vm2, %v4116_v24 }
 0x1c3   :  { %2941 = vmatprep.mubr.msk.bf16.mxu1 %vm3571_vm0, %v3570_v0 }
 0x1ca   :  { %2942 = vmatmul.mubr.msk.bf16.gmra.mxu1 %vm328_vm2, %v4138_v3 }
 0x1cb   :  { %2977 = vmatprep.mubr.msk.bf16.mxu1 %vm3571_vm0, %v3570_v0 }
 0x242   :  { %v597_v23 = vpop.f32.mrf.mxu1 }
 0x244   :  { %v2903_v50 = vpop.f32.mrf.mxu1 }
 0x246   :  { %v600_v57 = vpop.f32.mrf.mxu1 }
 0x247   :  { %v635_v16 = vpack.c.bf16 %v600_v57, %v597_v23 }
 0x248   :  { %v2904_v13 = vpop.f32.mrf.mxu1 }
 0x24a   :  { %v605_v20 = vpop.f32.mrf.mxu1 }
 0x24c   :  { %v2907_v44 = vpop.f32.mrf.mxu1 }
 0x24d   :  { %v4225_v44 = vld [vmem:[%s4740_s5 + $0x28] sm:$0xff]  }
 0x24e   :  { %v608_v48 = vpop.f32.mrf.mxu1 }
 0x24f   :  { %v636_v56 = vpack.c.bf16 %v608_v48, %v605_v20  ;;  %v4220_v20 = vld [vmem:[%s4739_s4 + $0x14] sm:$0xff]   ;;  %v4236_v48 = vld [vmem:[%s4740_s5 + $0x20] sm:$0xff]  }
 0x250   :  { %v2908_v22 = vpop.f32.mrf.mxu1 }
 0x251   :  { %v4242_v22 = vld [vmem:[%s4739_s4 + $0x1c] sm:$0xff]  }
 0x252   :  { %v613_v61 = vpop.f32.mrf.mxu1 }
 0x254   :  { %v2911_v41 = vpop.f32.mrf.mxu1 }
 0x256   :  { %v616_v53 = vpop.f32.mrf.mxu1 }
 0x257   :  { %v637_v4 = vpack.c.bf16 %v616_v53, %v613_v61  ;;  %v4253_v61 = vld [vmem:[%s4739_s4 + $0x24] ss:$0 sps:$4 sm:$0x11]  }
 0x258   :  { %v2912_v54 = vpop.f32.mrf.mxu1 }
 0x25a   :  { %v621_v55 = vpop.f32.mrf.mxu1 }
 0x25c   :  { %v2915_v32 = vpop.f32.mrf.mxu1 }
 0x25e   :  { %v624_v52 = vpop.f32.mrf.mxu1 }
 0x25f   :  { %v638_v63 = vpack.c.bf16 %v624_v52, %v621_v55 }
 0x260   :  { %v2916_v58 = vpop.f32.mrf.mxu1 }
 0x262   :  { %v629_v7 = vpop.f32.mrf.mxu1 }
 0x263   :  { %v639_v42 = vpack.c.bf16 %v629_v7, %v629_v7 }
 0x264   :  { %v2919_v59 = vpop.f32.mrf.mxu1 }
 0x265   :  { %v846_v60 = vsel %vm763_vm3, %v639_v42, 0 }
 0x266   :  { %v632_v62 = vpop.f32.mrf.mxu1  ;;  %2968 = vmatpush3.bf16.msra.mxu1 %v846_v60 }
 0x267   :  { %2969 = vmatprep.subr.bf16.mxu1 %v3570_v0 }
 0x268   :  { %v2920_v1 = vpop.f32.mrf.mxu1 }
 0x26a   :  { %v697_v2 = vpop.f32.mrf.mxu1  ;;  %2970 = vmatpush3.bf16.msra.mxu1 %v638_v63 }
 0x26b   :  { %2971 = vmatprep.subr.bf16.mxu1 %v3570_v0 }
 0x26c   :  { %v2927_v18 = vpop.f32.mrf.mxu1 }
 0x26e   :  { %v700_v21 = vpop.f32.mrf.mxu1  ;;  %2972 = vmatpush3.bf16.msra.mxu1 %v637_v4 }
 0x26f   :  { %2973 = vmatprep.subr.bf16.mxu1 %v3570_v0  ;;  %v735_v13 = vpack.c.bf16 %v700_v21, %v697_v2 }
 0x270   :  { %v2928_v45 = vpop.f32.mrf.mxu1 }
 0x272   :  { %v705_v47 = vpop.f32.mrf.mxu1  ;;  %2974 = vmatpush3.bf16.msra.mxu1 %v636_v56 }
 0x273   :  { %2975 = vmatprep.subr.bf16.mxu1 %v3570_v0 }
 0x274   :  { %v2931_v17 = vpop.f32.mrf.mxu1 }
 0x276   :  { %v708_v26 = vpop.f32.mrf.mxu1  ;;  %2976 = vmatpush3.bf16.msra.mxu1 %v635_v16 }
 0x277   :  { %3013 = vmatprep.subr.bf16.mxu1 %v3570_v0  ;;  %v736_v57 = vpack.c.bf16 %v708_v26, %v705_v47 }
 0x278   :  { %v2932_v8 = vpop.f32.mrf.mxu1 }
 0x279   :  { %2978 = vmatmul.mubr.msk.bf16.vlgmr.msra.gmra.mxu1 %vm753_vm4, %v4187_v25 }
 0x27a   :  { %v713_v34 = vpop.f32.mrf.mxu1  ;;  %2981 = vmatprep.mubr.msk.bf16.mxu1 %vm3571_vm0, %v3570_v0 }
 0x27c   :  { %v2935_v35 = vpop.f32.mrf.mxu1 }
 0x27e   :  { %v716_v40 = vpop.f32.mrf.mxu1 }
 0x27f   :  { %v737_v50 = vpack.c.bf16 %v716_v40, %v713_v34 }
 0x280   :  { %v2936_v10 = vpop.f32.mrf.mxu1 }
 0x281   :  { %2982 = vmatmul.mubr.msk.bf16.gmra.mxu1 %vm753_vm4, %v4197_v15 }
 0x282   :  { %v721_v29 = vpop.f32.mrf.mxu1  ;;  %2985 = vmatprep.mubr.msk.bf16.mxu1 %vm3571_vm0, %v3570_v0 }
 0x284   :  { %v2939_v33 = vpop.f32.mrf.mxu1 }
 0x286   :  { %v724_v31 = vpop.f32.mrf.mxu1 }
 0x287   :  { %v738_v28 = vpack.c.bf16 %v724_v31, %v721_v29 }
 0x288   :  { %v2940_v37 = vpop.f32.mrf.mxu1 }
 0x289   :  { %2986 = vmatmul.mubr.msk.bf16.gmra.mxu1 %vm753_vm4, %v4206_v12 }
 0x28a   :  { %v729_v51 = vpop.f32.mrf.mxu1  ;;  %3023 = vmatprep.mubr.msk.bf16.mxu1 %vm3571_vm0, %v3570_v0 }
 0x28b   :  { %v739_v11 = vpack.c.bf16 %v729_v51, %v729_v51 }
 0x28c   :  { %v2943_v39 = vpop.f32.mrf.mxu1 }
 0x28d   :  { %v765_v46 = vsel %vm763_vm3, %v739_v11, 0 }
 0x28e   :  { %v732_v19 = vpop.f32.mrf.mxu1  ;;  %2946 = vmatpush3.bf16.msra.mxu0 %v765_v46 }
 0x28f   :  { %2947 = vmatprep.subr.bf16.mxu0 %v3570_v0 }
 0x290   :  { %v2944_v23 = vpop.f32.mrf.mxu1 }
 0x292   :  { %2948 = vmatpush3.bf16.msra.mxu0 %v738_v28 }
 0x293   :  { %2949 = vmatprep.subr.bf16.mxu0 %v3570_v0 }
 0x296   :  { %2950 = vmatpush3.bf16.msra.mxu0 %v737_v50 }
 0x297   :  { %2951 = vmatprep.subr.bf16.mxu0 %v3570_v0 }
 0x29a   :  { %2952 = vmatpush3.bf16.msra.mxu0 %v736_v57 }
 0x29b   :  { %2953 = vmatprep.subr.bf16.mxu0 %v3570_v0 }
 0x29e   :  { %2954 = vmatpush3.bf16.msra.mxu0 %v735_v13 }
 0x29f   :  { %2989 = vmatprep.subr.bf16.mxu0 %v3570_v0 }
 0x2a1   :  { %2956 = vmatmul.mubr.msk.bf16.vlgmr.msra.gmra.mxu0 %vm753_vm4, %v4220_v20 }
 0x2a2   :  { %2959 = vmatprep.mubr.msk.bf16.mxu0 %vm3571_vm0, %v3570_v0  ;;  %2990 = vmatpush3.bf16.msra.mxu0 %v4225_v44 }
 0x2a3   :  { %2991 = vmatprep.subr.bf16.mxu0 %v3570_v0 }
 0x2a6   :  { %2992 = vmatpush3.bf16.msra.mxu0 %v4236_v48 }
 0x2a7   :  { %3051 = vmatprep.subr.bf16.mxu0 %v3570_v0 }
 0x2a9   :  { %2960 = vmatmul.mubr.msk.bf16.gmra.mxu0 %vm753_vm4, %v4242_v22 }
 0x2aa   :  { %2963 = vmatprep.mubr.msk.bf16.mxu0 %vm3571_vm0, %v3570_v0 }
 0x2b1   :  { %2964 = vmatmul.mubr.msk.bf16.gmra.mxu0 %vm753_vm4, %v4253_v61 }
 0x2b2   :  { %2993 = vmatprep.mubr.msk.bf16.mxu0 %vm3571_vm0, %v3570_v0 }
 0x2b9   :  { %2994 = vmatmul.mubr.msk.bf16.vlgmr.msra.gmra.mxu0 %vm328_vm2, %v4019_v27 }
 0x2ba   :  { %2997 = vmatprep.mubr.msk.bf16.mxu0 %vm3571_vm0, %v3570_v0 }
 0x2c1   :  { %2998 = vmatmul.mubr.msk.bf16.gmra.mxu0 %vm328_vm2, %v4028_v43 }
 0x2c2   :  { %3001 = vmatprep.mubr.msk.bf16.mxu0 %vm3571_vm0, %v3570_v0 }
 0x2c9   :  { %3002 = vmatmul.mubr.msk.bf16.gmra.mxu0 %vm328_vm2, %v4061_v49 }
 0x2ca   :  { %3005 = vmatprep.mubr.msk.bf16.mxu0 %vm3571_vm0, %v3570_v0 }
 0x2d1   :  { %3006 = vmatmul.mubr.msk.bf16.gmra.mxu0 %vm328_vm2, %v4116_v24 }
 0x2d2   :  { %3009 = vmatprep.mubr.msk.bf16.mxu0 %vm3571_vm0, %v3570_v0 }
 0x2d9   :  { %3010 = vmatmul.mubr.msk.bf16.gmra.mxu0 %vm328_vm2, %v4138_v3 }
 0x2da   :  { %3055 = vmatprep.mubr.msk.bf16.mxu0 %vm3571_vm0, %v3570_v0 }
 0x339   :  { %v882_v27 = vpop.f32.mrf.mxu1 }
 0x33b   :  { %v2979_v43 = vpop.f32.mrf.mxu1 }
 0x33d   :  { %v885_v41 = vpop.f32.mrf.mxu1 }
 0x33f   :  { %v2980_v53 = vpop.f32.mrf.mxu1 }
 0x341   :  { %v890_v49 = vpop.f32.mrf.mxu1 }
 0x343   :  { %v2983_v54 = vpop.f32.mrf.mxu1 }
 0x345   :  { %v893_v55 = vpop.f32.mrf.mxu1 }
 0x347   :  { %v2984_v32 = vpop.f32.mrf.mxu1 }
 0x348   :  { %v4297_v32 = vld [vmem:[%s4739_s4 + $0x28] sm:$0xff]  }
 0x349   :  { %v898_v52 = vpop.f32.mrf.mxu1 }
 0x34b   :  { %v2987_v58 = vpop.f32.mrf.mxu1 }
 0x34c   :  { %v4316_v58 = vld [vmem:[%s4739_s4 + $0x38] ss:$0 sps:$4 sm:$0x11]  }
 0x34d   :  { %v901_v24 = vpop.f32.mrf.mxu1 }
 0x34e   :  { %v4325_v24 = vld [vmem:[%s4742_s7 + $0x8] sm:$0xff]  }
 0x34f   :  { %v2988_v7 = vpop.f32.mrf.mxu1 }
 0x350   :  { %v4330_v7 = vld [vmem:[%s4742_s7 + $0x18] sm:$0xff]  }
 0x351   :  { %3052 = vmatpush3.bf16.msra.mxu0 %v4330_v7 }
 0x352   :  { %3053 = vmatprep.subr.bf16.mxu0 %v3570_v0 }
 0x361   :  { %v801_v42 = vpop.f32.mrf.mxu0 }
 0x362   :  { %v4279_v59 = vadd.f32 %v882_v27, %v801_v42  ;;  %v4337_v42 = vld [vmem:[%s4742_s7] sm:$0xff]  }
 0x363   :  { %v2957_v60 = vpop.f32.mrf.mxu0 }
 0x364   :  { %v4342_v60 = vld [vmem:[%s4742_s7 + $0x10] sm:$0xff]  }
 0x365   :  { %v804_v3 = vpop.f32.mrf.mxu0  ;;  %3054 = vmatpush3.bf16.msra.mxu0 %v4342_v60 }
 0x366   :  { %v4281_v62 = vadd.f32 %v885_v41, %v804_v3  ;;  %3077 = vmatprep.subr.bf16.mxu0 %v3570_v0 }
 0x367   :  { %v2958_v63 = vpop.f32.mrf.mxu0 }
 0x369   :  { %v809_v1 = vpop.f32.mrf.mxu0 }
 0x36a   :  { %v4283_v2 = vadd.f32 %v890_v49, %v809_v1 }
 0x36b   :  { %v2961_v4 = vpop.f32.mrf.mxu0 }
 0x36d   :  { %v812_v18 = vpop.f32.mrf.mxu0 }
 0x36e   :  { %v4285_v21 = vadd.f32 %v893_v55, %v812_v18 }
 0x36f   :  { %v2962_v56 = vpop.f32.mrf.mxu0 }
 0x371   :  { %v817_v45 = vpop.f32.mrf.mxu0 }
 0x372   :  { %v4287_v47 = vadd.f32 %v898_v52, %v817_v45  ;;  %v4307_v52 = vld [vmem:[%s4739_s4 + $0x30] sm:$0xff]  }
 0x373   :  { %v2965_v16 = vpop.f32.mrf.mxu0 }
 0x375   :  { %v820_v17 = vpop.f32.mrf.mxu0 }
 0x377   :  { %v2966_v26 = vpop.f32.mrf.mxu0 }
 0x379   :  { %v961_v8 = vpop.f32.mrf.mxu0 }
 0x37b   :  { %v2995_v34 = vpop.f32.mrf.mxu0 }
 0x37d   :  { %v964_v35 = vpop.f32.mrf.mxu0 }
 0x37e   :  { %v999_v55 = vpack.c.bf16 %v964_v35, %v961_v8 }
 0x37f   :  { %v2996_v40 = vpop.f32.mrf.mxu0 }
 0x381   :  { %v969_v10 = vpop.f32.mrf.mxu0 }
 0x383   :  { %v2999_v29 = vpop.f32.mrf.mxu0 }
 0x385   :  { %v972_v33 = vpop.f32.mrf.mxu0 }
 0x386   :  { %v1000_v54 = vpack.c.bf16 %v972_v33, %v969_v10 }
 0x387   :  { %v3000_v31 = vpop.f32.mrf.mxu0 }
 0x389   :  { %v977_v37 = vpop.f32.mrf.mxu0 }
 0x38b   :  { %v3003_v51 = vpop.f32.mrf.mxu0 }
 0x38d   :  { %v980_v11 = vpop.f32.mrf.mxu0 }
 0x38e   :  { %v1001_v49 = vpack.c.bf16 %v980_v11, %v977_v37 }
 0x38f   :  { %v3004_v39 = vpop.f32.mrf.mxu0 }
 0x391   :  { %v985_v46 = vpop.f32.mrf.mxu0 }
 0x393   :  { %v3007_v19 = vpop.f32.mrf.mxu0 }
 0x395   :  { %v988_v28 = vpop.f32.mrf.mxu0 }
 0x396   :  { %v1002_v41 = vpack.c.bf16 %v988_v28, %v985_v46 }
 0x397   :  { %v3008_v23 = vpop.f32.mrf.mxu0 }
 0x399   :  { %v993_v50 = vpop.f32.mrf.mxu0 }
 0x39a   :  { %v1003_v57 = vpack.c.bf16 %v993_v50, %v993_v50 }
 0x39b   :  { %v3011_v13 = vpop.f32.mrf.mxu0 }
 0x39c   :  { %v1027_v27 = vsel %vm763_vm3, %v1003_v57, 0 }
 0x39d   :  { %v996_v43 = vpop.f32.mrf.mxu0  ;;  %3014 = vmatpush3.bf16.msra.mxu1 %v1027_v27 }
 0x39e   :  { %3015 = vmatprep.subr.bf16.mxu1 %v3570_v0 }
 0x39f   :  { %v3012_v53 = vpop.f32.mrf.mxu0 }
 0x3a1   :  { %3016 = vmatpush3.bf16.msra.mxu1 %v1002_v41 }
 0x3a2   :  { %3017 = vmatprep.subr.bf16.mxu1 %v3570_v0 }
 0x3a5   :  { %3018 = vmatpush3.bf16.msra.mxu1 %v1001_v49 }
 0x3a6   :  { %3019 = vmatprep.subr.bf16.mxu1 %v3570_v0 }
 0x3a9   :  { %3020 = vmatpush3.bf16.msra.mxu1 %v1000_v54 }
 0x3aa   :  { %3021 = vmatprep.subr.bf16.mxu1 %v3570_v0 }
 0x3ad   :  { %3022 = vmatpush3.bf16.msra.mxu1 %v999_v55 }
 0x3ae   :  { %3035 = vmatprep.subr.bf16.mxu1 %v3570_v0 }
 0x3b0   :  { %3024 = vmatmul.mubr.msk.bf16.vlgmr.msra.gmra.mxu1 %vm753_vm4, %v4297_v32 }
 0x3b1   :  { %3027 = vmatprep.mubr.msk.bf16.mxu1 %vm3571_vm0, %v3570_v0  ;;  %3036 = vmatpush3.bf16.msra.mxu1 %v4325_v24 }
 0x3b2   :  { %3037 = vmatprep.subr.bf16.mxu1 %v3570_v0 }
 0x3b5   :  { %3038 = vmatpush3.bf16.msra.mxu1 %v4337_v42 }
 0x3b6   :  { %3067 = vmatprep.subr.bf16.mxu1 %v3570_v0 }
 0x3b8   :  { %3028 = vmatmul.mubr.msk.bf16.gmra.mxu1 %vm753_vm4, %v4307_v52 }
 0x3b9   :  { %3031 = vmatprep.mubr.msk.bf16.mxu1 %vm3571_vm0, %v3570_v0 }
 0x3c0   :  { %3032 = vmatmul.mubr.msk.bf16.gmra.mxu1 %vm753_vm4, %v4316_v58 }
 0x3c1   :  { %3039 = vmatprep.mubr.msk.bf16.mxu1 %vm3571_vm0, %v3570_v0 }
 0x470   :  { %v1063_v3 = vpop.f32.mrf.mxu1 }
 0x471   :  { %v1085_v63 = vadd.f32 %v1063_v3, %v4279_v59 }
 0x472   :  { %v3025_v1 = vpop.f32.mrf.mxu1 }
 0x473   :  { %v1090_v4 = vmul.f32 %v1085_v63, %v1085_v63 }
 0x474   :  { %v1066_v18 = vpop.f32.mrf.mxu1 }
 0x475   :  { %v1095_v56 = vmul.f32 %v1090_v4, %v1085_v63  ;;  %v1086_v45 = vadd.f32 %v1066_v18, %v4281_v62 }
 0x476   :  { %v3026_v16 = vpop.f32.mrf.mxu1 }
 0x477   :  { %v1100_v17 = vmul.f32 0.044715, %v1095_v56  ;;  %v1091_v26 = vmul.f32 %v1086_v45, %v1086_v45 }
 0x478   :  { %v1071_v8 = vpop.f32.mrf.mxu1 }
 0x479   :  { %v1105_v34 = vadd.f32 %v1100_v17, %v1085_v63  ;;  %v1096_v35 = vmul.f32 %v1091_v26, %v1086_v45  ;;  %v1087_v40 = vadd.f32 %v1071_v8, %v4283_v2 }
 0x47a   :  { %v3029_v10 = vpop.f32.mrf.mxu1 }
 0x47b   :  { %v1110_v29 = vmul.f32 0.7978846, %v1105_v34  ;;  %v1101_v33 = vmul.f32 0.044715, %v1096_v35  ;;  %v1092_v31 = vmul.f32 %v1087_v40, %v1087_v40 }
 0x47c   :  { %v1074_v37 = vpop.f32.mrf.mxu1 }
 0x47d   :  { %3372 = vtanh.f32 %v1110_v29  ;;  %v1106_v59 = vadd.f32 %v1101_v33, %v1086_v45  ;;  %v1097_v51 = vmul.f32 %v1092_v31, %v1087_v40  ;;  %v1088_v11 = vadd.f32 %v1074_v37, %v4285_v21 }
 0x47e   :  { %v3030_v39 = vpop.f32.mrf.mxu1 }
 0x47f   :  { %v1111_v62 = vmul.f32 0.7978846, %v1106_v59  ;;  %v1102_v46 = vmul.f32 0.044715, %v1097_v51  ;;  %v1093_v19 = vmul.f32 %v1088_v11, %v1088_v11 }
 0x480   :  { %v1079_v28 = vpop.f32.mrf.mxu1 }
 0x481   :  { %3374 = vtanh.f32 %v1111_v62  ;;  %v1107_v23 = vadd.f32 %v1102_v46, %v1087_v40  ;;  %v1098_v50 = vmul.f32 %v1093_v19, %v1088_v11  ;;  %v1089_v2 = vadd.f32 %v1079_v28, %v4287_v47 }
 0x482   :  { %v3033_v57 = vpop.f32.mrf.mxu1 }
 0x483   :  { %v1112_v13 = vmul.f32 0.7978846, %v1107_v23  ;;  %v1103_v27 = vmul.f32 0.044715, %v1098_v50  ;;  %v1094_v43 = vmul.f32 %v1089_v2, %v1089_v2 }
 0x484   :  { %v1082_v41 = vpop.f32.mrf.mxu1 }
 0x485   :  { %3376 = vtanh.f32 %v1112_v13  ;;  %v1108_v53 = vadd.f32 %v1103_v27, %v1088_v11  ;;  %v1099_v49 = vmul.f32 %v1094_v43, %v1089_v2 }
 0x486   :  { %v3034_v54 = vpop.f32.mrf.mxu1 }
 0x487   :  { %v1113_v21 = vmul.f32 0.7978846, %v1108_v53  ;;  %v1104_v55 = vmul.f32 0.044715, %v1099_v49 }
 0x489   :  { %3378 = vtanh.f32 %v1113_v21  ;;  %v1109_v3 = vadd.f32 %v1104_v55, %v1089_v2 }
 0x48a   :  { %v3373_v1 = vpop.eup %3372 }
 0x48b   :  { %v1120_v4 = vadd.f32 1.0, %v3373_v1  ;;  %v1114_v18 = vmul.f32 0.7978846, %v1109_v3 }
 0x48d   :  { %3380 = vtanh.f32 %v1114_v18  ;;  %v1125_v16 = vmul.f32 0.5, %v1120_v4 }
 0x48e   :  { %v3375_v56 = vpop.eup %3374 }
 0x48f   :  { %v1121_v47 = vadd.f32 1.0, %v3375_v56  ;;  %v1130_v8 = vmul.f32 %v1125_v16, %v1085_v63 }
 0x491   :  { %v1126_v17 = vmul.f32 0.5, %v1121_v47 }
 0x492   :  { %v3377_v26 = vpop.eup %3376 }
 0x493   :  { %v1131_v34 = vmul.f32 %v1126_v17, %v1086_v45  ;;  %v1122_v35 = vadd.f32 1.0, %v3377_v26 }
 0x495   :  { %v1141_v10 = vpack.c.bf16 %v1131_v34, %v1130_v8  ;;  %v1127_v33 = vmul.f32 0.5, %v1122_v35 }
 0x496   :  { %v3379_v29 = vpop.eup %3378 }
 0x497   :  { %v1123_v31 = vadd.f32 1.0, %v3379_v29  ;;  %3040 = vmatmul.mubr.msk.bf16.vlgmr.msra.gmra.mxu1 %vm328_vm2, %v1141_v10  ;;  %3056 = vmatmul.mubr.msk.bf16.vlgmr.msra.gmra.mxu0 %vm328_vm2, %v1141_v10  ;;  %v1132_v51 = vmul.f32 %v1127_v33, %v1087_v40  ;;  %v3572_v40 = vmov 0   ;;  %v1534_v10 = vmul.f32 %v4033_v38, %v4033_v38 }
 0x498   :  { %3043 = vmatprep.mubr.msk.bf16.mxu1 %vm3571_vm0, %v3570_v0  ;;  %3059 = vmatprep.mubr.msk.bf16.mxu0 %vm3571_vm0, %v3570_v0  ;;  %v4376_v4 = vsel %vm1312_vm5, 65535, %v3572_v40 }
 0x499   :  { %v1128_v37 = vmul.f32 0.5, %v1123_v31  ;;  %3300 = vset.pattern.permute.xlu1 %v3572_v40  ;;  %3299 = vset.pattern.permute.xlu0 %v3572_v40 }
 0x49a   :  { %v3381_v59 = vpop.eup %3380 }
 0x49b   :  { %v1133_v63 = vmul.f32 %v1128_v37, %v1088_v11  ;;  %v1124_v45 = vadd.f32 1.0, %v3381_v59  ;;  %v1543_v59 = vmul.f32 %v1534_v10, %v4033_v38 }
 0x49d   :  { %v1142_v39 = vpack.c.bf16 %v1133_v63, %v1132_v51  ;;  %v1129_v62 = vmul.f32 0.5, %v1124_v45  ;;  %v4390_v45 = vld [vmem:[%s4741_s6 + $0x8] sm:$0xff]  }
 0x49f   :  { %3044 = vmatmul.mubr.msk.bf16.gmra.mxu1 %vm328_vm2, %v1142_v39  ;;  %3060 = vmatmul.mubr.msk.bf16.gmra.mxu0 %vm328_vm2, %v1142_v39  ;;  %v1134_v46 = vmul.f32 %v1129_v62, %v1089_v2  ;;  %v4395_v39 = vld [vmem:[%s4741_s6] sm:$0xff]   ;;  %v1552_v62 = vmul.f32 0.044715, %v1543_v59 }
 0x4a0   :  { %3047 = vmatprep.mubr.msk.bf16.mxu1 %vm3571_vm0, %v3570_v0  ;;  %3063 = vmatprep.mubr.msk.bf16.mxu0 %vm3571_vm0, %v3570_v0 }
 0x4a1   :  { %v1143_v19 = vpack.c.bf16 %v1134_v46, %v1134_v46  ;;  %v3410_v46 = vld [vmem:[%s4740_s5 + $0x8] sm:$0xff]  }
 0x4a7   :  { %3048 = vmatmul.mubr.msk.bf16.gmra.mxu1 %vm328_vm2, %v1143_v19  ;;  %3064 = vmatmul.mubr.msk.bf16.gmra.mxu0 %vm328_vm2, %v1143_v19  ;;  %v1561_v19 = vadd.f32 %v1552_v62, %v4033_v38 }
 0x4a8   :  { %3073 = vmatprep.mubr.msk.bf16.mxu1 %vm3571_vm0, %v3570_v0  ;;  %3083 = vmatprep.mubr.msk.bf16.mxu0 %vm3571_vm0, %v3570_v0 }
 0x557   :  { %v1199_v11 = vpop.f32.mrf.mxu1  ;;  %v1278_v28 = vpop.f32.mrf.mxu0 }
 0x559   :  { %v3041_v23 = vpop.f32.mrf.mxu1  ;;  %v3057_v50 = vpop.f32.mrf.mxu0 }
 0x55b   :  { %v1202_v2 = vpop.f32.mrf.mxu1  ;;  %v1281_v57 = vpop.f32.mrf.mxu0 }
 0x55c   :  { %v1221_v51 = vpack.c.bf16 %v1202_v2, %v1199_v11  ;;  %v1300_v63 = vpack.c.bf16 %v1281_v57, %v1278_v28  ;;  %v3411_v11 = vld [vmem:[%s4740_s5] sm:$0xff]  }
 0x55d   :  { %v3042_v13 = vpop.f32.mrf.mxu1  ;;  %v3058_v27 = vpop.f32.mrf.mxu0 }
 0x55f   :  { %v1207_v43 = vpop.f32.mrf.mxu1  ;;  %v1286_v41 = vpop.f32.mrf.mxu0 }
 0x561   :  { %v3045_v53 = vpop.f32.mrf.mxu1  ;;  %v3061_v49 = vpop.f32.mrf.mxu0 }
 0x563   :  { %v1210_v54 = vpop.f32.mrf.mxu1  ;;  %v1289_v21 = vpop.f32.mrf.mxu0 }
 0x564   :  { %v1222_v31 = vpack.c.bf16 %v1210_v54, %v1207_v43  ;;  %v1301_v37 = vpack.c.bf16 %v1289_v21, %v1286_v41 }
 0x565   :  { %v3046_v55 = vpop.f32.mrf.mxu1  ;;  %v3062_v3 = vpop.f32.mrf.mxu0 }
 0x567   :  { %v1215_v1 = vpop.f32.mrf.mxu1  ;;  %v1294_v18 = vpop.f32.mrf.mxu0 }
 0x568   :  { %v1223_v56 = vpack.c.bf16 %v1215_v1, %v1215_v1  ;;  %v1302_v16 = vpack.c.bf16 %v1294_v18, %v1294_v18 }
 0x569   :  { %v3049_v47 = vpop.f32.mrf.mxu1  ;;  %v3065_v17 = vpop.f32.mrf.mxu0 }
 0x56a   :  { %v1368_v26 = vand.u32 %v4376_v4, %v1223_v56  ;;  %v1316_v8 = vand.u32 %v4376_v4, %v1302_v16 }
 0x56b   :  { %v1218_v34 = vpop.f32.mrf.mxu1  ;;  %v1297_v35 = vpop.f32.mrf.mxu0 }
 0x56c   :  { %3068 = vmatpush3.bf16.msra.mxu1 %v1316_v8  ;;  %3078 = vmatpush3.bf16.msra.mxu0 %v1368_v26 }
 0x56d   :  { %v3050_v29 = vpop.f32.mrf.mxu1  ;;  %v3066_v33 = vpop.f32.mrf.mxu0  ;;  %3069 = vmatprep.subr.bf16.mxu1 %v3570_v0  ;;  %3079 = vmatprep.subr.bf16.mxu0 %v3570_v0 }
 0x570   :  { %3070 = vmatpush3.bf16.msra.mxu1 %v1301_v37  ;;  %3080 = vmatpush3.bf16.msra.mxu0 %v1222_v31 }
 0x571   :  { %3071 = vmatprep.subr.bf16.mxu1 %v3570_v0  ;;  %3081 = vmatprep.subr.bf16.mxu0 %v3570_v0 }
 0x574   :  { %3072 = vmatpush3.bf16.msra.mxu1 %v1300_v63  ;;  %3082 = vmatpush3.bf16.msra.mxu0 %v1221_v51 }
 0x575   :  { %3087 = vmatprep.subr.bf16.mxu1 %v3570_v0  ;;  %3111 = vmatprep.subr.bf16.mxu0 %v3570_v0 }
 0x577   :  { %3074 = vmatmul.mubr.msk.bf16.vlgmr.msra.gmra.mxu1 %vm1308_vm6, %v4390_v45  ;;  %3084 = vmatmul.mubr.msk.bf16.vlgmr.msra.gmra.mxu0 %vm1308_vm6, %v4395_v39 }
 0x578   :  { %3088 = vmatpush3.bf16.msra.mxu1 %v3410_v46  ;;  %3112 = vmatpush3.bf16.msra.mxu0 %v4015_v6  ;;  %v1570_v6 = vmul.f32 0.7978846, %v1561_v19 }
 0x579   :  { %3089 = vmatprep.subr.bf16.mxu1 %v3570_v0  ;;  %3113 = vmatprep.subr.bf16.mxu0 %v3570_v0 }
 0x57a   :  { %3091 = vmatprep.mubr.msk.bf16.mxu1 %vm3571_vm0, %v3570_v0  ;;  %3115 = vmatprep.mubr.msk.bf16.mxu0 %vm3571_vm0, %v3570_v0  ;;  %3382 = vtanh.f32 %v1570_v6 }
 0x57c   :  { %3090 = vmatpush3.bf16.msra.mxu1 %v3411_v11  ;;  %3114 = vmatpush3.bf16.msra.mxu0 %v4041_v36 }
 0x57d   :  { %3135 = vmatprep.subr.bf16.mxu1 %v3570_v0  ;;  %3157 = vmatprep.subr.bf16.mxu0 %v3570_v0 }
 0x57f   :  { %3092 = vmatmul.mubr.msk.bf16.vlgmr.msra.gmra.mxu1 %vm328_vm2, %v4146_v9  ;;  %3116 = vmatmul.mubr.msk.bf16.vlgmr.msra.gmra.mxu0 %vm328_vm2, %v4146_v9 }
 0x580   :  { %3095 = vmatprep.mubr.msk.bf16.mxu1 %vm3571_vm0, %v3570_v0  ;;  %3119 = vmatprep.mubr.msk.bf16.mxu0 %vm3571_vm0, %v3570_v0 }
 0x587   :  { %3096 = vmatmul.mubr.msk.bf16.gmra.mxu1 %vm328_vm2, %v4150_v14  ;;  %3120 = vmatmul.mubr.msk.bf16.gmra.mxu0 %vm328_vm2, %v4150_v14  ;;  %v3383_v36 = vpop.eup %3382 }
 0x588   :  { %3099 = vmatprep.mubr.msk.bf16.mxu1 %vm3571_vm0, %v3570_v0  ;;  %3123 = vmatprep.mubr.msk.bf16.mxu0 %vm3571_vm0, %v3570_v0  ;;  %v1588_v28 = vadd.f32 1.0, %v3383_v36 }
 0x58a   :  { %v1597_v23 = vmul.f32 0.5, %v1588_v28 }
 0x58c   :  { %v1606_v50 = vmul.f32 %v1597_v23, %v4033_v38 }
 0x58e   :  { %v4453_v2 = vpack.c.bf16 %v1606_v50, %v1606_v50 }
 0x58f   :  { %3100 = vmatmul.mubr.msk.bf16.gmra.mxu1 %vm328_vm2, %v4158_v30  ;;  %3124 = vmatmul.mubr.msk.bf16.gmra.mxu0 %vm328_vm2, %v4158_v30 }
 0x590   :  { %3103 = vmatprep.mubr.msk.bf16.mxu1 %vm3571_vm0, %v3570_v0  ;;  %3127 = vmatprep.mubr.msk.bf16.mxu0 %vm3571_vm0, %v3570_v0 }
 0x597   :  { %3104 = vmatmul.mubr.msk.bf16.gmra.mxu1 %vm328_vm2, %v4165_v5  ;;  %3128 = vmatmul.mubr.msk.bf16.gmra.mxu0 %vm328_vm2, %v4165_v5 }
 0x598   :  { %3107 = vmatprep.mubr.msk.bf16.mxu1 %vm3571_vm0, %v3570_v0  ;;  %3131 = vmatprep.mubr.msk.bf16.mxu0 %vm3571_vm0, %v3570_v0 }
 0x59f   :  { %3108 = vmatmul.mubr.msk.bf16.gmra.mxu1 %vm328_vm2, %v4453_v2  ;;  %3132 = vmatmul.mubr.msk.bf16.gmra.mxu0 %vm328_vm2, %v4453_v2 }
 0x5a0   :  { %3145 = vmatprep.mubr.msk.bf16.mxu1 %vm3571_vm0, %v3570_v0  ;;  %3167 = vmatprep.mubr.msk.bf16.mxu0 %vm3571_vm0, %v3570_v0 }
 0x637   :  { %v1352_v57 = vpop.f32.mrf.mxu1  ;;  %v1404_v13 = vpop.f32.mrf.mxu0 }
 0x638   :  { %v1405_v27 = vadd.f32 %v1404_v13, %v1352_v57 }
 0x639   :  { %v3075_v43 = vpop.f32.mrf.mxu1  ;;  %v3085_v41 = vpop.f32.mrf.mxu0 }
 0x63a   :  { %v1411_v38 = vmul.f32 %v1405_v27, %v1405_v27 }
 0x63b   :  { %v1355_v53 = vpop.f32.mrf.mxu1  ;;  %v1407_v49 = vpop.f32.mrf.mxu0 }
 0x63c   :  { %v1413_v54 = vmul.f32 %v1411_v38, %v1405_v27  ;;  %v1408_v21 = vadd.f32 %v1407_v49, %v1355_v53 }
 0x63d   :  { %v3076_v55 = vpop.f32.mrf.mxu1  ;;  %v3086_v3 = vpop.f32.mrf.mxu0 }
 0x63e   :  { %v1415_v1 = vmul.f32 0.044715, %v1413_v54  ;;  %v1412_v18 = vmul.f32 %v1408_v21, %v1408_v21 }
 0x63f   :  { %v4463_v56 = vpop.f32.mrf.mxu1  ;;  %v4465_v16 = vpop.f32.mrf.mxu0 }
 0x640   :  { %v1417_v47 = vadd.f32 %v1415_v1, %v1405_v27  ;;  %v1414_v17 = vmul.f32 %v1412_v18, %v1408_v21 }
 0x641   :  { %v3093_v26 = vpop.f32.mrf.mxu1  ;;  %v3117_v8 = vpop.f32.mrf.mxu0 }
 0x642   :  { %v1419_v34 = vmul.f32 0.7978846, %v1417_v47  ;;  %v1416_v35 = vmul.f32 0.044715, %v1414_v17 }
 0x643   :  { %v4467_v10 = vpop.f32.mrf.mxu1  ;;  %v4469_v29 = vpop.f32.mrf.mxu0 }
 0x644   :  { %3384 = vtanh.f32 %v1419_v34  ;;  %v1418_v33 = vadd.f32 %v1416_v35, %v1408_v21 }
 0x645   :  { %v3094_v31 = vpop.f32.mrf.mxu1  ;;  %v3118_v37 = vpop.f32.mrf.mxu0 }
 0x646   :  { %v1420_v59 = vmul.f32 0.7978846, %v1418_v33 }
 0x647   :  { %v4471_v51 = vpop.f32.mrf.mxu1  ;;  %v4473_v63 = vpop.f32.mrf.mxu0 }
 0x648   :  { %3386 = vtanh.f32 %v1420_v59 }
 0x649   :  { %v3097_v62 = vpop.f32.mrf.mxu1  ;;  %v3121_v46 = vpop.f32.mrf.mxu0 }
 0x64b   :  { %v4475_v19 = vpop.f32.mrf.mxu1  ;;  %v4477_v11 = vpop.f32.mrf.mxu0 }
 0x64d   :  { %v3098_v6 = vpop.f32.mrf.mxu1  ;;  %v3122_v36 = vpop.f32.mrf.mxu0 }
 0x64f   :  { %v1677_v28 = vpop.f32.mrf.mxu1  ;;  %v1754_v23 = vpop.f32.mrf.mxu0 }
 0x651   :  { %v3385_v50 = vpop.eup %3384  ;;  %v3101_v57 = vpop.f32.mrf.mxu1 }
 0x652   :  { %v3125_v13 = vpop.f32.mrf.mxu0  ;;  %v1423_v43 = vadd.f32 1.0, %v3385_v50 }
 0x653   :  { %v1680_v41 = vpop.f32.mrf.mxu1 }
 0x654   :  { %v1757_v38 = vpop.f32.mrf.mxu0  ;;  %v1425_v53 = vmul.f32 0.5, %v1423_v43 }
 0x655   :  { %v3387_v49 = vpop.eup %3386  ;;  %v3102_v54 = vpop.f32.mrf.mxu1 }
 0x656   :  { %v3126_v55 = vpop.f32.mrf.mxu0  ;;  %v4479_v3 = vmul.f32 %v1425_v53, %v1405_v27  ;;  %v1424_v1 = vadd.f32 1.0, %v3387_v49 }
 0x657   :  { %v1685_v18 = vpop.f32.mrf.mxu1 }
 0x658   :  { %v1762_v47 = vpop.f32.mrf.mxu0  ;;  %v2323_v17 = vsel %vm328_vm2, %v4479_v3, 0.0  ;;  %v2340_v26 = vmul.f32 %v4479_v3, %v4479_v3  ;;  %v1426_v8 = vmul.f32 0.5, %v1424_v1 }
 0x659   :  { %v3105_v34 = vpop.f32.mrf.mxu1  ;;  %2324 = vadd.xlane.f32.xlu0 %v2323_v17 }
 0x65a   :  { %v3129_v35 = vpop.f32.mrf.mxu0  ;;  %v4485_v33 = vmul.f32 %v1426_v8, %v1408_v21  ;;  %v2344_v27 = vsel %vm328_vm2, %v2340_v26, 0.0 }
 0x65b   :  { %v1688_v31 = vpop.f32.mrf.mxu1  ;;  %v1701_v35 = vpack.c.bf16 %v1680_v41, %v1677_v28  ;;  %v1699_v28 = vpack.c.bf16 %v4467_v10, %v4463_v56 }
 0x65c   :  { %v1765_v37 = vpop.f32.mrf.mxu0  ;;  %v2341_v59 = vmul.f32 %v4485_v33, %v4485_v33  ;;  %v2326_v21 = vsel %vm328_vm2, %v4485_v33, 0.0  ;;  %v1702_v17 = vpack.c.bf16 %v1688_v31, %v1685_v18  ;;  %v1700_v18 = vpack.c.bf16 %v4475_v19, %v4471_v51 }
 0x65d   :  { %v3106_v62 = vpop.f32.mrf.mxu1  ;;  %2345 = vadd.xlane.f32.xlu0 %v2344_v27  ;;  %v1779_v26 = vpack.c.bf16 %v1765_v37, %v1762_v47  ;;  %v1778_v27 = vpack.c.bf16 %v1757_v38, %v1754_v23  ;;  %v1777_v47 = vpack.c.bf16 %v4477_v11, %v4473_v63  ;;  %v1776_v23 = vpack.c.bf16 %v4469_v29, %v4465_v16 }
 0x65e   :  { %v3130_v46 = vpop.f32.mrf.mxu0  ;;  %v2347_v6 = vsel %vm328_vm2, %v2341_v59, 0.0 }
 0x65f   :  { %v1693_v36 = vpop.f32.mrf.mxu1  ;;  %2348 = vadd.xlane.f32.xlu1 %v2347_v6 }
 0x660   :  { %v1770_v50 = vpop.f32.mrf.mxu0  ;;  %v1703_v57 = vpack.c.bf16 %v1693_v36, %v1693_v36 }
 0x661   :  { %v1780_v13 = vpack.c.bf16 %v1770_v50, %v1770_v50  ;;  %v3109_v43 = vpop.f32.mrf.mxu1  ;;  %2327 = vadd.xlane.f32.xlu0 %v2326_v21 }
 0x662   :  { %v3133_v53 = vpop.f32.mrf.mxu0  ;;  %v1841_v49 = vsel %vm763_vm3, %v1703_v57, 0 }
 0x663   :  { %v1782_v54 = vsel %vm763_vm3, %v1780_v13, 0  ;;  %v1696_v55 = vpop.f32.mrf.mxu1  ;;  %3158 = vmatpush3.bf16.msra.mxu0 %v1841_v49 }
 0x664   :  { %v1773_v1 = vpop.f32.mrf.mxu0  ;;  %3136 = vmatpush3.bf16.msra.mxu1 %v1782_v54  ;;  %3159 = vmatprep.subr.bf16.mxu0 %v3570_v0 }
 0x665   :  { %3137 = vmatprep.subr.bf16.mxu1 %v3570_v0  ;;  %v3110_v8 = vpop.f32.mrf.mxu1 }
 0x666   :  { %v3134_v34 = vpop.f32.mrf.mxu0 }
 0x667   :  { %3160 = vmatpush3.bf16.msra.mxu0 %v1702_v17 }
 0x668   :  { %3138 = vmatpush3.bf16.msra.mxu1 %v1779_v26  ;;  %3161 = vmatprep.subr.bf16.mxu0 %v3570_v0 }
 0x669   :  { %3139 = vmatprep.subr.bf16.mxu1 %v3570_v0 }
 0x66b   :  { %3162 = vmatpush3.bf16.msra.mxu0 %v1701_v35 }
 0x66c   :  { %3140 = vmatpush3.bf16.msra.mxu1 %v1778_v27  ;;  %3163 = vmatprep.subr.bf16.mxu0 %v3570_v0 }
 0x66d   :  { %3141 = vmatprep.subr.bf16.mxu1 %v3570_v0 }
 0x66f   :  { %3164 = vmatpush3.bf16.msra.mxu0 %v1700_v18 }
 0x670   :  { %3142 = vmatpush3.bf16.msra.mxu1 %v1777_v47  ;;  %3165 = vmatprep.subr.bf16.mxu0 %v3570_v0 }
 0x671   :  { %3143 = vmatprep.subr.bf16.mxu1 %v3570_v0 }
 0x673   :  { %3166 = vmatpush3.bf16.msra.mxu0 %v1699_v28 }
 0x674   :  { %3144 = vmatpush3.bf16.msra.mxu1 %v1776_v23  ;;  %3203 = vmatprep.subr.bf16.mxu0 %v3570_v0 }
 0x675   :  { %3179 = vmatprep.subr.bf16.mxu1 %v3570_v0 }
 0x676   :  { %3168 = vmatmul.mubr.msk.bf16.vlgmr.msra.gmra.mxu0 %vm753_vm4, %v4187_v25 }
 0x677   :  { %3146 = vmatmul.mubr.msk.bf16.vlgmr.msra.gmra.mxu1 %vm753_vm4, %v4220_v20  ;;  %3171 = vmatprep.mubr.msk.bf16.mxu0 %vm3571_vm0, %v3570_v0 }
 0x678   :  { %3149 = vmatprep.mubr.msk.bf16.mxu1 %vm3571_vm0, %v3570_v0  ;;  %3180 = vmatpush3.bf16.msra.mxu1 %v4225_v44 }
 0x679   :  { %3181 = vmatprep.subr.bf16.mxu1 %v3570_v0 }
 0x67c   :  { %3182 = vmatpush3.bf16.msra.mxu1 %v4236_v48 }
 0x67d   :  { %3241 = vmatprep.subr.bf16.mxu1 %v3570_v0 }
 0x67e   :  { %3172 = vmatmul.mubr.msk.bf16.gmra.mxu0 %vm753_vm4, %v4197_v15 }
 0x67f   :  { %3150 = vmatmul.mubr.msk.bf16.gmra.mxu1 %vm753_vm4, %v4242_v22  ;;  %3175 = vmatprep.mubr.msk.bf16.mxu0 %vm3571_vm0, %v3570_v0 }
 0x680   :  { %3153 = vmatprep.mubr.msk.bf16.mxu1 %vm3571_vm0, %v3570_v0 }
 0x686   :  { %3176 = vmatmul.mubr.msk.bf16.gmra.mxu0 %vm753_vm4, %v4206_v12 }
 0x687   :  { %3154 = vmatmul.mubr.msk.bf16.gmra.mxu1 %vm753_vm4, %v4253_v61  ;;  %3213 = vmatprep.mubr.msk.bf16.mxu0 %vm3571_vm0, %v3570_v0 }
 0x688   :  { %3183 = vmatprep.mubr.msk.bf16.mxu1 %vm3571_vm0, %v3570_v0 }
 0x68f   :  { %3184 = vmatmul.mubr.msk.bf16.vlgmr.msra.gmra.mxu1 %vm328_vm2, %v4146_v9 }
 0x690   :  { %3187 = vmatprep.mubr.msk.bf16.mxu1 %vm3571_vm0, %v3570_v0  ;;  %3242 = vmatpush3.bf16.msra.mxu1 %v4330_v7 }
 0x691   :  { %3243 = vmatprep.subr.bf16.mxu1 %v3570_v0 }
 0x694   :  { %3244 = vmatpush3.bf16.msra.mxu1 %v4342_v60 }
 0x697   :  { %3188 = vmatmul.mubr.msk.bf16.gmra.mxu1 %vm328_vm2, %v4150_v14 }
 0x698   :  { %3191 = vmatprep.mubr.msk.bf16.mxu1 %vm3571_vm0, %v3570_v0 }
 0x69f   :  { %3192 = vmatmul.mubr.msk.bf16.gmra.mxu1 %vm328_vm2, %v4158_v30 }
 0x6a0   :  { %3195 = vmatprep.mubr.msk.bf16.mxu1 %vm3571_vm0, %v3570_v0 }
 0x6a7   :  { %3196 = vmatmul.mubr.msk.bf16.gmra.mxu1 %vm328_vm2, %v4165_v5 }
 0x6a8   :  { %3199 = vmatprep.mubr.msk.bf16.mxu1 %vm3571_vm0, %v3570_v0 }
 0x6af   :  { %3200 = vmatmul.mubr.msk.bf16.gmra.mxu1 %vm328_vm2, %v4453_v2 }
 0x6b0   :  { %3245 = vmatprep.mubr.msk.bf16.mxu1 %vm3571_vm0, %v3570_v0 }
 0x736   :  { %v1877_v14 = vpop.f32.mrf.mxu0 }
 0x737   :  { %v1818_v9 = vpop.f32.mrf.mxu1 }
 0x738   :  { %v4564_v25 = vadd.f32 %v1877_v14, %v1818_v9  ;;  %v3169_v15 = vpop.f32.mrf.mxu0 }
 0x739   :  { %v3147_v30 = vpop.f32.mrf.mxu1 }
 0x73a   :  { %v1880_v20 = vpop.f32.mrf.mxu0 }
 0x73b   :  { %v1821_v12 = vpop.f32.mrf.mxu1 }
 0x73c   :  { %v4566_v44 = vadd.f32 %v1880_v20, %v1821_v12  ;;  %v3170_v48 = vpop.f32.mrf.mxu0 }
 0x73d   :  { %v3148_v5 = vpop.f32.mrf.mxu1 }
 0x73e   :  { %v1885_v61 = vpop.f32.mrf.mxu0 }
 0x73f   :  { %v1826_v22 = vpop.f32.mrf.mxu1 }
 0x740   :  { %v4568_v7 = vadd.f32 %v1885_v61, %v1826_v22  ;;  %v3173_v2 = vpop.f32.mrf.mxu0 }
 0x741   :  { %v3151_v60 = vpop.f32.mrf.mxu1 }
 0x742   :  { %v1888_v16 = vpop.f32.mrf.mxu0 }
 0x743   :  { %v1829_v56 = vpop.f32.mrf.mxu1 }
 0x744   :  { %v4570_v10 = vadd.f32 %v1888_v16, %v1829_v56  ;;  %v3174_v51 = vpop.f32.mrf.mxu0 }
 0x745   :  { %v3152_v29 = vpop.f32.mrf.mxu1 }
 0x746   :  { %v1893_v19 = vpop.f32.mrf.mxu0 }
 0x747   :  { %v1834_v63 = vpop.f32.mrf.mxu1 }
 0x748   :  { %v4572_v11 = vadd.f32 %v1893_v19, %v1834_v63  ;;  %v3177_v38 = vpop.f32.mrf.mxu0 }
 0x749   :  { %v3155_v41 = vpop.f32.mrf.mxu1  ;;  %v2349_v38 = vpop.xlane.xlu1 %2348 }
 0x74a   :  { %v1896_v37 = vpop.f32.mrf.mxu0 }
 0x74b   :  { %v1837_v31 = vpop.f32.mrf.mxu1 }
 0x74c   :  { %v3178_v62 = vpop.f32.mrf.mxu0 }
 0x74d   :  { %v3156_v59 = vpop.f32.mrf.mxu1 }
 0x74f   :  { %v1933_v46 = vpop.f32.mrf.mxu1 }
 0x751   :  { %v3185_v6 = vpop.f32.mrf.mxu1 }
 0x753   :  { %v1936_v36 = vpop.f32.mrf.mxu1 }
 0x754   :  { %v1971_v30 = vpack.c.bf16 %v1936_v36, %v1933_v46 }
 0x755   :  { %v3186_v50 = vpop.f32.mrf.mxu1 }
 0x757   :  { %v1941_v57 = vpop.f32.mrf.mxu1 }
 0x759   :  { %v3189_v13 = vpop.f32.mrf.mxu1 }
 0x75a   :  { %v2357_v13 = vmul.f32 0.03125, %v2349_v38 }
 0x75b   :  { %v1944_v21 = vpop.f32.mrf.mxu1 }
 0x75c   :  { %v1972_v14 = vpack.c.bf16 %v1944_v21, %v1941_v57 }
 0x75d   :  { %v3190_v43 = vpop.f32.mrf.mxu1 }
 0x75f   :  { %v1949_v53 = vpop.f32.mrf.mxu1 }
 0x761   :  { %v3193_v49 = vpop.f32.mrf.mxu1 }
 0x763   :  { %v1952_v54 = vpop.f32.mrf.mxu1 }
 0x764   :  { %v1973_v9 = vpack.c.bf16 %v1952_v54, %v1949_v53 }
 0x765   :  { %v3194_v55 = vpop.f32.mrf.mxu1 }
 0x767   :  { %v1957_v1 = vpop.f32.mrf.mxu1 }
 0x769   :  { %v3197_v17 = vpop.f32.mrf.mxu1 }
 0x76b   :  { %v1960_v26 = vpop.f32.mrf.mxu1 }
 0x76c   :  { %v1974_v28 = vpack.c.bf16 %v1960_v26, %v1957_v1 }
 0x76d   :  { %v3198_v8 = vpop.f32.mrf.mxu1 }
 0x76f   :  { %v1965_v34 = vpop.f32.mrf.mxu1 }
 0x770   :  { %v1975_v35 = vpack.c.bf16 %v1965_v34, %v1965_v34 }
 0x771   :  { %v3201_v27 = vpop.f32.mrf.mxu1 }
 0x772   :  { %v1977_v18 = vsel %vm763_vm3, %v1975_v35, 0 }
 0x773   :  { %v1968_v47 = vpop.f32.mrf.mxu1  ;;  %3204 = vmatpush3.bf16.msra.mxu0 %v1977_v18 }
 0x774   :  { %3205 = vmatprep.subr.bf16.mxu0 %v3570_v0 }
 0x775   :  { %v3202_v23 = vpop.f32.mrf.mxu1 }
 0x777   :  { %3206 = vmatpush3.bf16.msra.mxu0 %v1974_v28 }
 0x778   :  { %3207 = vmatprep.subr.bf16.mxu0 %v3570_v0 }
 0x77b   :  { %3208 = vmatpush3.bf16.msra.mxu0 %v1973_v9 }
 0x77c   :  { %3209 = vmatprep.subr.bf16.mxu0 %v3570_v0 }
 0x77f   :  { %3210 = vmatpush3.bf16.msra.mxu0 %v1972_v14 }
 0x780   :  { %3211 = vmatprep.subr.bf16.mxu0 %v3570_v0 }
 0x783   :  { %3212 = vmatpush3.bf16.msra.mxu0 %v1971_v30 }
 0x784   :  { %3225 = vmatprep.subr.bf16.mxu0 %v3570_v0 }
 0x786   :  { %3214 = vmatmul.mubr.msk.bf16.vlgmr.msra.gmra.mxu0 %vm753_vm4, %v4297_v32  ;;  %v2325_v32 = vpop.xlane.xlu0 %2324 }
 0x787   :  { %3217 = vmatprep.mubr.msk.bf16.mxu0 %vm3571_vm0, %v3570_v0  ;;  %3226 = vmatpush3.bf16.msra.mxu0 %v4325_v24  ;;  %v4619_v62 = vmul.f32 0.03125, %v2325_v32 }
 0x788   :  { %3227 = vmatprep.subr.bf16.mxu0 %v3570_v0 }
 0x78a   :  { %v2346_v15 = vpop.xlane.xlu0 %2345 }
 0x78b   :  { %3228 = vmatpush3.bf16.msra.mxu0 %v4337_v42  ;;  %v2356_v57 = vmul.f32 0.03125, %v2346_v15 }
 0x78c   :  { %3257 = vmatprep.subr.bf16.mxu0 %v3570_v0 }
 0x78e   :  { %3218 = vmatmul.mubr.msk.bf16.gmra.mxu0 %vm753_vm4, %v4307_v52  ;;  %v2328_v22 = vpop.xlane.xlu0 %2327 }
 0x78f   :  { %3221 = vmatprep.mubr.msk.bf16.mxu0 %vm3571_vm0, %v3570_v0  ;;  %v4612_v29 = vmul.f32 0.03125, %v2328_v22 }
 0x796   :  { %3222 = vmatmul.mubr.msk.bf16.gmra.mxu0 %vm753_vm4, %v4316_v58 }
 0x797   :  { %3229 = vmatprep.mubr.msk.bf16.mxu0 %vm3571_vm0, %v3570_v0 }
 0x846   :  { %v2013_v24 = vpop.f32.mrf.mxu0 }
 0x847   :  { %v4597_v12 = vadd.f32 %v2013_v24, %v4564_v25 }
 0x848   :  { %v3215_v42 = vpop.f32.mrf.mxu0 }
 0x849   :  { %v2040_v20 = vmul.f32 %v4597_v12, %v4597_v12 }
 0x84a   :  { %v2016_v52 = vpop.f32.mrf.mxu0 }
 0x84b   :  { %v2045_v5 = vmul.f32 %v2040_v20, %v4597_v12  ;;  %v4603_v48 = vadd.f32 %v2016_v52, %v4566_v44 }
 0x84c   :  { %v3216_v58 = vpop.f32.mrf.mxu0 }
 0x84d   :  { %v2050_v61 = vmul.f32 0.044715, %v2045_v5  ;;  %v2041_v60 = vmul.f32 %v4603_v48, %v4603_v48 }
 0x84e   :  { %v2021_v2 = vpop.f32.mrf.mxu0 }
 0x84f   :  { %v2055_v25 = vadd.f32 %v2050_v61, %v4597_v12  ;;  %v2046_v56 = vmul.f32 %v2041_v60, %v4603_v48  ;;  %v4610_v16 = vadd.f32 %v2021_v2, %v4568_v7  ;;  %v2361_v7 = vmul.f32 %v4612_v29, %v4612_v29 }
 0x850   :  { %v3219_v51 = vpop.f32.mrf.mxu0 }
 0x851   :  { %v2060_v63 = vmul.f32 0.7978846, %v2055_v25  ;;  %v2051_v44 = vmul.f32 0.044715, %v2046_v56  ;;  %v2042_v19 = vmul.f32 %v4610_v16, %v4610_v16  ;;  %v2365_v54 = vsub.f32 %v2357_v13, %v2361_v7  ;;  %v4640_v7 = vld [vmem:[#allocation8] ss:$0 sm:$0xff] }
 0x852   :  { %v2024_v41 = vpop.f32.mrf.mxu0  ;;  %v2369_v51 = vsub.f32 %v4485_v33, %v4612_v29 }
 0x853   :  { %3388 = vtanh.f32 %v2060_v63  ;;  %v2056_v31 = vadd.f32 %v2051_v44, %v4603_v48  ;;  %v2047_v37 = vmul.f32 %v2042_v19, %v4610_v16  ;;  %v2038_v59 = vadd.f32 %v2024_v41, %v4570_v10 }
 0x854   :  { %v3220_v46 = vpop.f32.mrf.mxu0  ;;  %v2360_v10 = vmul.f32 %v4619_v62, %v4619_v62  ;;  %v2373_v18 = vadd.f32 1e-05, %v2365_v54  ;;  %v2368_v44 = vsub.f32 %v4479_v3, %v4619_v62 }
 0x855   :  { %v2061_v6 = vmul.f32 0.7978846, %v2056_v31  ;;  %v2052_v36 = vmul.f32 0.044715, %v2047_v37  ;;  %v2043_v50 = vmul.f32 %v2038_v59, %v2038_v59 }
 0x856   :  { %v2029_v21 = vpop.f32.mrf.mxu0  ;;  %v2364_v8 = vsub.f32 %v2356_v57, %v2360_v10 }
 0x857   :  { %3390 = vtanh.f32 %v2061_v6  ;;  %v2057_v43 = vadd.f32 %v2052_v36, %v4610_v16  ;;  %v2048_v53 = vmul.f32 %v2043_v50, %v2038_v59  ;;  %v2039_v49 = vadd.f32 %v2029_v21, %v4572_v11 }
 0x858   :  { %v3223_v55 = vpop.f32.mrf.mxu0  ;;  %v2372_v9 = vadd.f32 1e-05, %v2364_v8 }
 0x859   :  { %v2062_v1 = vmul.f32 0.7978846, %v2057_v43  ;;  %v2053_v17 = vmul.f32 0.044715, %v2048_v53  ;;  %v2044_v26 = vmul.f32 %v2039_v49, %v2039_v49 }
 0x85a   :  { %v2032_v34 = vpop.f32.mrf.mxu0 }
 0x85b   :  { %3392 = vtanh.f32 %v2062_v1  ;;  %v2058_v35 = vadd.f32 %v2053_v17, %v2038_v59  ;;  %v2049_v27 = vmul.f32 %v2044_v26, %v2039_v49 }
 0x85c   :  { %v3224_v47 = vpop.f32.mrf.mxu0 }
 0x85d   :  { %v2063_v28 = vmul.f32 0.7978846, %v2058_v35  ;;  %v2054_v23 = vmul.f32 0.044715, %v2049_v27 }
 0x85f   :  { %3394 = vtanh.f32 %v2063_v28  ;;  %v2059_v11 = vadd.f32 %v2054_v23, %v2039_v49 }
 0x860   :  { %v3389_v14 = vpop.eup %3388  ;;  %3396 = vrsqrt.f32 %v2373_v18 }
 0x861   :  { %v2070_v30 = vadd.f32 1.0, %v3389_v14  ;;  %v2064_v32 = vmul.f32 0.7978846, %v2059_v11  ;;  %3398 = vrsqrt.f32 %v2372_v9 }
 0x863   :  { %3400 = vtanh.f32 %v2064_v32  ;;  %v2075_v15 = vmul.f32 0.5, %v2070_v30 }
 0x864   :  { %v3391_v24 = vpop.eup %3390 }
 0x865   :  { %v2071_v42 = vadd.f32 1.0, %v3391_v24  ;;  %v2080_v5 = vmul.f32 %v2075_v15, %v4597_v12 }
 0x867   :  { %v2076_v20 = vmul.f32 0.5, %v2071_v42 }
 0x868   :  { %v3393_v52 = vpop.eup %3392 }
 0x869   :  { %v2081_v58 = vmul.f32 %v2076_v20, %v4603_v48  ;;  %v2072_v22 = vadd.f32 1.0, %v3393_v52 }
 0x86b   :  { %v2085_v61 = vpack.c.bf16 %v2081_v58, %v2080_v5  ;;  %v2077_v25 = vmul.f32 0.5, %v2072_v22 }
 0x86c   :  { %v3395_v60 = vpop.eup %3394 }
 0x86d   :  { %v3397_v2 = vpop.eup %3396  ;;  %v2073_v56 = vadd.f32 1.0, %v3395_v60  ;;  %3230 = vmatmul.mubr.msk.bf16.vlgmr.msra.gmra.mxu0 %vm328_vm2, %v2085_v61  ;;  %3246 = vmatmul.mubr.msk.bf16.vlgmr.msra.gmra.mxu1 %vm328_vm2, %v2085_v61  ;;  %v2082_v41 = vmul.f32 %v2077_v25, %v4610_v16  ;;  %v4650_v16 = vld [vmem:[#allocation10] ss:$0 sm:$0xff] }
 0x86e   :  { %3233 = vmatprep.mubr.msk.bf16.mxu0 %vm3571_vm0, %v3570_v0  ;;  %3249 = vmatprep.mubr.msk.bf16.mxu1 %vm3571_vm0, %v3570_v0  ;;  %v3399_v12 = vpop.eup %3398  ;;  %v2381_v19 = vmul.f32 %v3397_v2, %v2369_v51 }
 0x86f   :  { %v2078_v48 = vmul.f32 0.5, %v2073_v56  ;;  %v2380_v37 = vmul.f32 %v3399_v12, %v2368_v44 }
 0x870   :  { %v3401_v63 = vpop.eup %3400  ;;  %v2391_v46 = vmul.f32 %v4640_v7, %v2381_v19 }
 0x871   :  { %v2083_v38 = vmul.f32 %v2078_v48, %v2038_v59  ;;  %v2074_v31 = vadd.f32 1.0, %v3401_v63  ;;  %v2390_v3 = vmul.f32 %v4640_v7, %v2380_v37 }
 0x872   :  { %v2401_v62 = vadd.f32 %v4650_v16, %v2391_v46 }
 0x873   :  { %v2086_v33 = vpack.c.bf16 %v2083_v38, %v2082_v41  ;;  %v2079_v29 = vmul.f32 0.5, %v2074_v31  ;;  %v2400_v6 = vadd.f32 %v4650_v16, %v2390_v3 }
 0x875   :  { %3234 = vmatmul.mubr.msk.bf16.gmra.mxu0 %vm328_vm2, %v2086_v33  ;;  %3250 = vmatmul.mubr.msk.bf16.gmra.mxu1 %vm328_vm2, %v2086_v33  ;;  %v2084_v59 = vmul.f32 %v2079_v29, %v2039_v49  ;;  %v2408_v50 = vpack.c.bf16 %v2401_v62, %v2400_v6 }
 0x876   :  { %3237 = vmatprep.mubr.msk.bf16.mxu0 %vm3571_vm0, %v3570_v0  ;;  %3253 = vmatprep.mubr.msk.bf16.mxu1 %vm3571_vm0, %v3570_v0 }
 0x877   :  { %v2087_v36 = vpack.c.bf16 %v2084_v59, %v2084_v59 }
 0x87d   :  { %3238 = vmatmul.mubr.msk.bf16.gmra.mxu0 %vm328_vm2, %v2087_v36  ;;  %3254 = vmatmul.mubr.msk.bf16.gmra.mxu1 %vm328_vm2, %v2087_v36 }
 0x87e   :  { %3281 = vmatprep.mubr.msk.bf16.mxu1 %vm328_vm2, %v2408_v50  ;;  %3263 = vmatprep.mubr.msk.bf16.mxu0 %vm3571_vm0, %v3570_v0 }
 0x92d   :  { %v2131_v57 = vpop.f32.mrf.mxu0  ;;  %v2190_v13 = vpop.f32.mrf.mxu1 }
 0x92f   :  { %v3231_v21 = vpop.f32.mrf.mxu0  ;;  %v3247_v43 = vpop.f32.mrf.mxu1 }
 0x931   :  { %v2134_v53 = vpop.f32.mrf.mxu0  ;;  %v2193_v49 = vpop.f32.mrf.mxu1 }
 0x932   :  { %v2212_v42 = vpack.c.bf16 %v2193_v49, %v2190_v13  ;;  %v2153_v58 = vpack.c.bf16 %v2134_v53, %v2131_v57 }
 0x933   :  { %v3232_v10 = vpop.f32.mrf.mxu0  ;;  %v3248_v54 = vpop.f32.mrf.mxu1 }
 0x934   :  { %v3332_v10 = vld [vmem:[%s4745_s10 + $0x8] sm:$0xff]   ;;  %v3333_v54 = vld [vmem:[%s4745_s10] sm:$0xff]  }
 0x935   :  { %v2139_v55 = vpop.f32.mrf.mxu0  ;;  %v2198_v1 = vpop.f32.mrf.mxu1  ;;  %3277 = vmatprep.subr.bf16.mxu1 %v3332_v10 }
 0x936   :  { %3278 = vmatpush3.bf16.msra.mxu1 %v3332_v10 }
 0x937   :  { %v3235_v17 = vpop.f32.mrf.mxu0  ;;  %v3251_v26 = vpop.f32.mrf.mxu1  ;;  %3279 = vmatprep.subr.bf16.mxu1 %v3333_v54 }
 0x938   :  { %v2484_v17 = vld [vmem:[%s4748_s13] sm:$0xff] }
 0x939   :  { %v2142_v8 = vpop.f32.mrf.mxu0  ;;  %v2201_v34 = vpop.f32.mrf.mxu1  ;;  %vm2488_vm9 = vcmp.gt.f32.partialorder %v2484_v17, 0.5 }
 0x93a   :  { %v2213_v15 = vpack.c.bf16 %v2201_v34, %v2198_v1  ;;  %v2154_v5 = vpack.c.bf16 %v2142_v8, %v2139_v55  ;;  %v2485_v55 = vld [vmem:[%s4748_s13 + $0x8] sm:$0xff]  ;;  %v2486_v1 = vld [vmem:[%s4748_s13 + $0x10] sm:$0xff]  ;;  %v2487_v8 = vld [vmem:[%s4748_s13 + $0x18] sm:$0xff]  ;;  %v2493_v34 = vsel %vm2488_vm9, 1, %v3572_v40  ;;  %3280 = vmatpush3.bf16.msra.mxu1 %v3333_v54 }
 0x93b   :  { %v3236_v35 = vpop.f32.mrf.mxu0  ;;  %v3252_v27 = vpop.f32.mrf.mxu1  ;;  %vm2489_vm7 = vcmp.gt.f32.partialorder %v2485_v55, 0.5  ;;  %vm2490_vm8 = vcmp.gt.f32.partialorder %v2486_v1, 0.5  ;;  %vm2491_vm10 = vcmp.gt.f32.partialorder %v2487_v8, 0.5 }
 0x93c   :  { %v2494_v26 = vsel %vm2489_vm7, 1, %v3572_v40  ;;  %v2495_v35 = vsel %vm2490_vm8, 1, %v3572_v40  ;;  %v2496_v27 = vsel %vm2491_vm10, 1, %v3572_v40  ;;  %v2526_v40 = vld [vmem:[%s4749_s14 + $0x18] sm:$0xff] }
 0x93d   :  { %v2147_v18 = vpop.f32.mrf.mxu0  ;;  %v2206_v47 = vpop.f32.mrf.mxu1 }
 0x93e   :  { %v2214_v28 = vpack.c.bf16 %v2206_v47, %v2206_v47  ;;  %v2155_v20 = vpack.c.bf16 %v2147_v18, %v2147_v18  ;;  %v2523_v18 = vld [vmem:[%s4749_s14] sm:$0xff]  ;;  %v2524_v47 = vld [vmem:[%s4749_s14 + $0x8] sm:$0xff] }
 0x93f   :  { %v3239_v23 = vpop.f32.mrf.mxu0  ;;  %v3255_v9 = vpop.f32.mrf.mxu1 }
 0x940   :  { %v2216_v11 = vand.u32 %v2214_v28, %v4376_v4  ;;  %v2260_v52 = vand.u32 %v2155_v20, %v4376_v4  ;;  %v2525_v28 = vld [vmem:[%s4749_s14 + $0x10] sm:$0xff] }
 0x941   :  { %v2150_v14 = vpop.f32.mrf.mxu0  ;;  %v2209_v30 = vpop.f32.mrf.mxu1 }
 0x942   :  { %3258 = vmatpush3.bf16.msra.mxu0 %v2216_v11 }
 0x943   :  { %v3240_v32 = vpop.f32.mrf.mxu0  ;;  %v3256_v24 = vpop.f32.mrf.mxu1  ;;  %3259 = vmatprep.subr.bf16.mxu0 %v3570_v0 }
 0x946   :  { %3260 = vmatpush3.bf16.msra.mxu0 %v2213_v15 }
 0x947   :  { %3261 = vmatprep.subr.bf16.mxu0 %v3570_v0 }
 0x94a   :  { %3262 = vmatpush3.bf16.msra.mxu0 %v2212_v42 }
 0x94b   :  { %3267 = vmatprep.subr.bf16.mxu0 %v3570_v0 }
 0x94d   :  { %3264 = vmatmul.mubr.msk.bf16.vlgmr.msra.gmra.mxu0 %vm1308_vm6, %v4390_v45 }
 0x94e   :  { %3268 = vmatpush3.bf16.msra.mxu0 %v2260_v52  ;;  %3273 = vmatprep.mubr.msk.bf16.mxu0 %vm3571_vm0, %v3570_v0 }
 0x94f   :  { %3269 = vmatprep.subr.bf16.mxu0 %v3570_v0 }
 0x952   :  { %3270 = vmatpush3.bf16.msra.mxu0 %v2154_v5 }
 0x953   :  { %3271 = vmatprep.subr.bf16.mxu0 %v3570_v0 }
 0x956   :  { %3272 = vmatpush3.bf16.msra.mxu0 %v2153_v58 }
 0x959   :  { %3274 = vmatmul.mubr.msk.bf16.vlgmr.msra.gmra.mxu0 %vm1308_vm6, %v4395_v39 }
 0xa0d   :  { %v2252_v22 = vpop.f32.mrf.mxu0 }
 0xa0f   :  { %v3265_v4 = vpop.f32.mrf.mxu0 }
 0xa11   :  { %v2255_v61 = vpop.f32.mrf.mxu0 }
 0xa13   :  { %v3266_v60 = vpop.f32.mrf.mxu0 }
 0xa19   :  { %v2296_v45 = vpop.f32.mrf.mxu0 }
 0xa1a   :  { %v2297_v2 = vadd.f32 %v2296_v45, %v2252_v22 }
 0xa1b   :  { %v3275_v25 = vpop.f32.mrf.mxu0 }
 0xa1c   :  { %v2303_v56 = vmul.f32 %v2297_v2, %v2297_v2 }
 0xa1d   :  { %v2299_v51 = vpop.f32.mrf.mxu0 }
 0xa1e   :  { %v2305_v12 = vmul.f32 %v2303_v56, %v2297_v2  ;;  %v2300_v48 = vadd.f32 %v2299_v51, %v2255_v61 }
 0xa1f   :  { %v3276_v63 = vpop.f32.mrf.mxu0 }
 0xa20   :  { %v2307_v44 = vmul.f32 0.044715, %v2305_v12  ;;  %v2304_v19 = vmul.f32 %v2300_v48, %v2300_v48 }
 0xa22   :  { %v2309_v41 = vadd.f32 %v2307_v44, %v2297_v2  ;;  %v2306_v38 = vmul.f32 %v2304_v19, %v2300_v48 }
 0xa24   :  { %v2311_v31 = vmul.f32 0.7978846, %v2309_v41  ;;  %v2308_v37 = vmul.f32 0.044715, %v2306_v38 }
 0xa26   :  { %3402 = vtanh.f32 %v2311_v31  ;;  %v2310_v39 = vadd.f32 %v2308_v37, %v2300_v48  ;;  %v2713_v31 = vld [vmem:[#allocation11] ss:$0 sm:$0xff] }
 0xa28   :  { %v2312_v33 = vmul.f32 0.7978846, %v2310_v39  ;;  %v2718_v39 = vld [vmem:[%s4747_s12] ss:$0 sm:$0xff]  ;;  %s3573_s12 = smov [#allocation13]  }
 0xa29   :  { %s2566_s28 = sshll.u32 %s3573_s12, 4  ;;  %s2567_s28 = int_to_ptr.vmem [resolvable:$true] %s2566_s28 }
 0xa2a   :  { %3404 = vtanh.f32 %v2312_v33  ;;  %s3532_s1 = scalar_lea.vmem %s2567_s28, 768  ;;  %p3537_p3 = scmp.lt.s32.totalorder %s2567_s28, %s2567_s28 }
 0xa2b   :  { %p3533_p2 = scmp.ne.s32.totalorder %s2567_s28, %s3532_s1  ;;  %p3538_p4 = scmp.lt.s32.totalorder %s3532_s1, %s3532_s1 }
 0xa2d   :  { %p3539_p5 = por %p3538_p4, %p3537_p3 }
 0xa2f   :  { %p3540_p6 = pnand %p3539_p5, %p3533_p2 }
 0xa33   :  { %v3403_v29 = vpop.eup %3402 }
 0xa34   :  { %v2315_v46 = vadd.f32 1.0, %v3403_v29 }
 0xa36   :  { %v2317_v3 = vmul.f32 0.5, %v2315_v46 }
 0xa37   :  { %v3405_v59 = vpop.eup %3404 }
 0xa38   :  { %v4672_v62 = vmul.f32 %v2317_v3, %v2297_v2  ;;  %v2316_v6 = vadd.f32 1.0, %v3405_v59 }
 0xa3a   :  { %v2329_v36 = vsel %vm328_vm2, %v4672_v62, 0.0  ;;  %v2342_v50 = vmul.f32 %v4672_v62, %v4672_v62  ;;  %v2318_v57 = vmul.f32 0.5, %v2316_v6 }
 0xa3b   :  { %2330 = vadd.xlane.f32.xlu1 %v2329_v36 }
 0xa3c   :  { %v2350_v13 = vsel %vm328_vm2, %v2342_v50, 0.0  ;;  %v2320_v21 = vmul.f32 %v2318_v57, %v2300_v48 }
 0xa3d   :  { %2351 = vadd.xlane.f32.xlu0 %v2350_v13 }
 0xa3e   :  { %v2332_v43 = vsel %vm328_vm2, %v2320_v21, 0.0  ;;  %v2343_v53 = vmul.f32 %v2320_v21, %v2320_v21 }
 0xa3f   :  { %2333 = vadd.xlane.f32.xlu1 %v2332_v43 }
 0xa40   :  { %v2353_v49 = vsel %vm328_vm2, %v2343_v53, 0.0 }
 0xa43   :  { %2354 = vadd.xlane.f32.xlu1 %v2353_v49 }
 0xa53   :  { %2498 = vperm.xlu0 %3299, %v2493_v34  }
 0xa54   :  { %2501 = vperm.xlu1 %3300, %v2494_v26  }
 0xa58   :  { %2504 = vperm.xlu1 %3300, %v2495_v35  }
 0xa5c   :  { %2507 = vperm.xlu1 %3300, %v2496_v27  }
 0xa60   :  { %2529 = vperm.xlu1 %3300, %v2523_v18  }
 0xa64   :  { %2534 = vperm.xlu1 %3300, %v2524_v47  }
 0xa68   :  { %2539 = vperm.xlu1 %3300, %v2525_v28  }
 0xa6c   :  { %2544 = vperm.xlu1 %3300, %v2526_v40  }
 0xac4   :  { %v2331_v23 = vpop.xlane.xlu1 %2330 }
 0xac5   :  { %v2338_v9 = vmul.f32 0.03125, %v2331_v23 }
 0xac6   :  { %v2352_v11 = vpop.xlane.xlu0 %2351 }
 0xac7   :  { %v2362_v14 = vmul.f32 %v2338_v9, %v2338_v9  ;;  %v2358_v30 = vmul.f32 0.03125, %v2352_v11  ;;  %v2370_v61 = vsub.f32 %v4672_v62, %v2338_v9 }
 0xac8   :  { %v2334_v32 = vpop.xlane.xlu1 %2333 }
 0xac9   :  { %v2366_v24 = vsub.f32 %v2358_v30, %v2362_v14  ;;  %v2339_v15 = vmul.f32 0.03125, %v2334_v32 }
 0xacb   :  { %v2374_v42 = vadd.f32 1e-05, %v2366_v24  ;;  %v2363_v52 = vmul.f32 %v2339_v15, %v2339_v15  ;;  %v2371_v45 = vsub.f32 %v2320_v21, %v2339_v15 }
 0xacc   :  { %v2355_v20 = vpop.xlane.xlu1 %2354 }
 0xacd   :  { %3406 = vrsqrt.f32 %v2374_v42  ;;  %v2359_v5 = vmul.f32 0.03125, %v2355_v20 }
 0xace   :  { %v2499_v37 = vpop.permute.xlu0 %2498 }
 0xacf   :  { %v2367_v58 = vsub.f32 %v2359_v5, %v2363_v52  ;;  %vm2509_vm13 = vcmp.eq.s32.totalorder %v2499_v37, 1 }
 0xad0   :  { %v2502_v44 = vpop.permute.xlu1 %2501 }
 0xad1   :  { %v2375_v22 = vadd.f32 1e-05, %v2367_v58  ;;  %vm2510_vm15 = vcmp.eq.s32.totalorder %v2502_v44, 1 }
 0xad3   :  { %3408 = vrsqrt.f32 %v2375_v22 }
 0xad4   :  { %v2505_v19 = vpop.permute.xlu1 %2504 }
 0xad5   :  { %vm2511_vm12 = vcmp.eq.s32.totalorder %v2505_v19, 1 }
 0xad8   :  { %v2508_v41 = vpop.permute.xlu1 %2507 }
 0xad9   :  { %vm2512_vm14 = vcmp.eq.s32.totalorder %v2508_v41, 1 }
 0xada   :  { %v3407_v4 = vpop.eup %3406 }
 0xadb   :  { %v2382_v60 = vmul.f32 %v3407_v4, %v2370_v61 }
 0xadd   :  { %v2392_v25 = vmul.f32 %v4640_v7, %v2382_v60 }
 0xadf   :  { %v2402_v12 = vadd.f32 %v4650_v16, %v2392_v25 }
 0xae0   :  { %v3409_v2 = vpop.eup %3408 }
 0xae1   :  { %v2383_v56 = vmul.f32 %v3409_v2, %v2371_v45 }
 0xae3   :  { %v2393_v51 = vmul.f32 %v4640_v7, %v2383_v56  ;;  %v2530_v7 = vpop.permute.xlu1 %2529 }
 0xae5   :  { %v2403_v48 = vadd.f32 %v4650_v16, %v2393_v51 }
 0xae7   :  { %v2409_v63 = vpack.c.bf16 %v2403_v48, %v2402_v12  ;;  %v2535_v38 = vpop.permute.xlu1 %2534 }
 0xae9   :  { %3282 = vmatmul.mubr.msk.bf16.vlgmr.msra.gmra.mxu1 %vm328_vm2, %v2409_v63 }
 0xaeb   :  { %v2540_v29 = vpop.permute.xlu1 %2539 }
 0xaef   :  { %v2545_v43 = vpop.permute.xlu1 %2544 }
 0xba9   :  { %v3283_v16 = vpop.f32.mrf.mxu1 }
 0xbaa   :  { %v2478_v33 = vadd.f32 %v3283_v16, %v2713_v31 }
 0xbab   :  { %v2469_v46 = vpop.f32.mrf.mxu1 }
 0xbac   :  { %v2470_v3 = vadd.f32 %v2713_v31, %v2469_v46  ;;  %v2521_v59 = vsel %vm2511_vm12, %v2718_v39, %v2478_v33 }
 0xbad   :  { %v2549_v0 = vmul.f32 %v2540_v29, %v2521_v59  ;;  %v3284_v62 = vpop.f32.mrf.mxu1 }
 0xbae   :  { %v2519_v6 = vsel %vm2509_vm13, %v2718_v39, %v2470_v3  ;;  %v2481_v36 = vadd.f32 %v3284_v62, %v2713_v31 }
 0xbaf   :  { %v2547_v50 = vmul.f32 %v2530_v7, %v2519_v6  ;;  %2558 = vst.msk [vmem:[#allocation13 + $0x1c] sm:$0xff] %vm328_vm2, %v2549_v0  ;;  %v2472_v57 = vpop.f32.mrf.mxu1 }
 0xbb0   :  { %v2473_v13 = vadd.f32 %v2713_v31, %v2472_v57  ;;  %v2522_v21 = vsel %vm2512_vm14, %v2718_v39, %v2481_v36 }
 0xbb1   :  { %2553 = vst.msk [vmem:[#allocation13 + $0x4] sm:$0xff] %vm328_vm2, %v2547_v50  ;;  %v2550_v53 = vmul.f32 %v2545_v43, %v2522_v21 }
 0xbb2   :  { %v2520_v49 = vsel %vm2510_vm15, %v2718_v39, %v2473_v13 }
 0xbb3   :  { %v2548_v10 = vmul.f32 %v2535_v38, %v2520_v49  ;;  %2559 = vst.msk [vmem:[#allocation13 + $0x24] sm:$0xff] %vm328_vm2, %v2550_v53 }
 0xbb5   :  { %2554 = vst.msk [vmem:[#allocation13 + $0xc] sm:$0xff] %vm328_vm2, %v2548_v10 }
 0xbb6   :  { %3543 = shalt.err (!%p3540_p6)
}
 0xbb7   :  { %s3574_s29 = smov 128   ;;  %s3575_s30 = smov 8  }
 0xbb8   :  { %2572 = dma.vmem_to_hbm [thread:$0]  %s2567_s28, 768, %s4750_s15, [#allocation4], %s3574_s29, %s3574_s29, %s3575_s30  }
 0xbb9   :  { %3560 = dma.done.wait [#allocation4], 768  }
 0xbba   :  { %3561 = vsyncadd [#allocation4], 4294966528 }
 0xbbb   :  { %2576 = vsyncpa [#allocation3], 1 }
 0xbbc   :  { %2577 = vsyncpa [#allocation6], 1 }
 0xbbd   :  { %2578 = vsyncpa [#allocation9], 1 }
 0xbbe   :  { %2579 = vsyncpa [#allocation12], 1 }
 0xbbf   :  { %2580 = vsyncpa [#allocation4], 1 }

</bundles_post_ra>
